<compile_context>
chip_gen: v6e
topology: v6e:2x2x1
jax: 0.10.0
libtpu: 0.0.40
codegen_flags: <defaults>
</compile_context>

<pallas_src>
import numpy as np
import jax
import jax.numpy as jnp
from jax.experimental import pallas as pl
from jax.experimental.pallas import tpu as pltpu

LATENT = 256
C1, H1 = 4, 14            # channels / spatial after PixelShuffle #1
HW1 = H1 * H1             # 196
H2 = 28                   # spatial after PixelShuffle #2
HW2 = H2 * H2             # 784
CPAD = 128                # lane-aligned margin for the conv2 shift buffer


# ------------------------------ fused kernel ---------------------------------

def gnet_kernel(x_ref, w1_ref, b1_ref, gmat_ref, gmatT_ref, m1_ref, bias1_ref,
                tap_ref, bias2_ref, o_ref, cbuf):
    f32, bf16 = jnp.float32, jnp.bfloat16

    # ---- Linear(256 -> 784); PixelShuffle #1 folded into the weight columns.
    y = jnp.dot(x_ref[...].astype(bf16), w1_ref[...],
                preferred_element_type=f32) + b1_ref[...]             # (B, 784)

    # ---- LayerNorm((14,14)) per (b, channel) on the flat lane-dense row via
    #      group-reduction matmuls (one chain, no per-channel Python loop).
    inv_n = 1.0 / HW1
    mu = jnp.dot(y, gmat_ref[...], preferred_element_type=f32) * inv_n        # (B,4)
    d = y - jnp.dot(mu, gmatT_ref[...], preferred_element_type=f32)           # (B,784)
    var = jnp.dot(d * d, gmat_ref[...], preferred_element_type=f32) * inv_n   # (B,4)
    rstd = jax.lax.rsqrt(var + 1e-5)
    zn1 = d * jnp.dot(rstd, gmatT_ref[...], preferred_element_type=f32)       # (B,784)
    # LN1 affine folded into m1 / bias1 host-side.
    # TODO(synk): Dropout(0.5) implemented as identity (inference semantics).

    # ---- ConvTranspose#1(4->4,3,1,1) + bias + PixelShuffle #2 as ONE matmul;
    #      LeakyReLU(0.1) fused.  Output is already in 28x28 (shuffled) layout.
    a = jnp.dot(zn1.astype(bf16), m1_ref[...],
                preferred_element_type=f32) + bias1_ref[...]          # (B, 784)
    a = jnp.where(a >= 0, a, 0.1 * a)

    # ---- LayerNorm((28,28)) over the full 784-lane row.
    mu2 = jnp.mean(a, axis=-1, keepdims=True)
    d2 = a - mu2
    var2 = jnp.mean(d2 * d2, axis=-1, keepdims=True)
    zn2 = d2 * jax.lax.rsqrt(var2 + 1e-5)                             # (B, 784)
    # LN2 affine + conv2 bias folded into tap / bias2 host-side.
    # TODO(synk): Dropout(0.5) implemented as identity (inference semantics).

    # ---- ConvTranspose#2(1->1,3,1,1) on the flat 28x28 row: one lane-aligned
    #      wide store into a margin buffer, then 9 shifted vector FMAs with
    #      validity + weights + LN2 scale folded into tap_ref.  Fused Tanh.
    B = zn2.shape[0]
    cbuf[:, 0:CPAD] = jnp.zeros((B, CPAD), f32)
    cbuf[:, CPAD + HW2:2 * CPAD + HW2] = jnp.zeros((B, CPAD), f32)
    cbuf[:, CPAD:CPAD + HW2] = zn2
    acc = bias2_ref[...]                                              # (1, 784)
    for k in range(9):
        kh, kw = divmod(k, 3)
        s = (kh - 1) * H2 + (kw - 1)
        acc = acc + tap_ref[k:k + 1, :] * cbuf[:, CPAD + s:CPAD + s + HW2]
    o_ref[...] = jnp.tanh(acc)                                        # (B, 784)


def gnet_forward(x, kp):
    B = x.shape[0]
    tile_b = B if B <= 256 else 256
    assert B % tile_b == 0, "pad batch to a multiple of 256 for the tiled path"
    grid_b = B // tile_b

    def const(shape):
        # Weight stays VMEM-resident: same block for every grid step.
        return pl.BlockSpec(shape, lambda i: (0,) * len(shape))

    out = pl.pallas_call(
        gnet_kernel,
        out_shape=jax.ShapeDtypeStruct((B, HW2), jnp.float32),
        grid=(grid_b,),
        in_specs=[
            pl.BlockSpec((tile_b, LATENT), lambda i: (i, 0)),   # x batch tile
            const((LATENT, HW2)),       # w1   (bf16)
            const((1, HW2)),            # b1
            const((HW2, C1)),           # gmat  (LN1 group sums)
            const((C1, HW2)),           # gmatT (LN1 group broadcast)
            const((HW2, HW2)),          # m1   (bf16) conv1+shuffle+LN1-affine
            const((1, HW2)),            # bias1
            const((9, HW2)),            # tap   conv2 taps * validity * LN2 w
            const((1, HW2)),            # bias2 conv2(LN2 bias) + conv2 bias
        ],
        out_specs=pl.BlockSpec((tile_b, HW2), lambda i: (i, 0)),
        scratch_shapes=[pltpu.VMEM((tile_b, HW2 + 2 * CPAD), jnp.float32)],
        compiler_params=pltpu.CompilerParams(
            dimension_semantics=("parallel",) if grid_b > 1 else ("arbitrary",)),
    )(x, kp["w1"], kp["b1"], kp["gmat"], kp["gmatT"], kp["m1"], kp["bias1"],
      kp["tap"], kp["bias2"])
    return out.reshape(B, 1, H2, H2)


# -------------------------- parameter preparation ----------------------------

def convtranspose_to_conv(wt):
    # ConvTranspose2d weight (Cin, Cout, kh, kw), stride=1, pad=1  ->
    # equivalent cross-correlation weight (Cout, Cin, kh, kw), spatially flipped.
    return np.flip(np.asarray(wt, np.float32), (-2, -1)).transpose(1, 0, 2, 3)


def init_base_params(key):
    """PyTorch-layout parameters of GNet (random init)."""
    ks = jax.random.split(key, 10)
    w1 = jax.random.uniform(ks[0], (16 * 49, LATENT), jnp.float32, -1 / 16, 1 / 16)
    b1 = jax.random.uniform(ks[1], (16 * 49,), jnp.float32, -1 / 16, 1 / 16)
    ln1_w = 1.0 + 0.1 * jax.random.normal(ks[2], (14, 14), jnp.float32)
    ln1_b = 0.1 * jax.random.normal(ks[3], (14, 14), jnp.float32)
    wt1 = jax.random.uniform(ks[4], (4, 4, 3, 3), jnp.float32, -1 / 6, 1 / 6)
    bc1 = jax.random.uniform(ks[5], (4,), jnp.float32, -1 / 6, 1 / 6)
    ln2_w = 1.0 + 0.1 * jax.random.normal(ks[6], (28, 28), jnp.float32)
    ln2_b = 0.1 * jax.random.normal(ks[7], (28, 28), jnp.float32)
    wt2 = jax.random.uniform(ks[8], (1, 1, 3, 3), jnp.float32, -1 / 3, 1 / 3)
    bc2 = jax.random.uniform(ks[9], (1,), jnp.float32, -1 / 3, 1 / 3)
    return dict(w1=w1, b1=b1, ln1_w=ln1_w, ln1_b=ln1_b, wt1=wt1, bc1=bc1,
                ln2_w=ln2_w, ln2_b=ln2_b, wt2=wt2, bc2=bc2)


def prepare_kernel_params(bp):
    """Host-side (numpy) folds into the layouts the fused kernel uses."""
    w1 = np.asarray(bp["w1"], np.float32)            # (784, 256) torch (out, in)
    b1 = np.asarray(bp["b1"], np.float32)            # (784,)

    # Fold Unflatten(16,7,7) + PixelShuffle(2) into a column permutation of the
    # Linear output features: column p = c*196 + H*14 + W reads original
    # feature (c*4 + (H%2)*2 + (W%2))*49 + (H//2)*7 + (W//2).
    perm = np.empty(HW2, np.int64)
    for c in range(C1):
        for hh in range(H1):
            for ww in range(H1):
                f = (c * 4 + (hh % 2) * 2 + (ww % 2)) * 49 + (hh // 2) * 7 + (ww // 2)
                perm[c * HW1 + hh * H1 + ww] = f
    w1_ps = w1.T[:, perm]                             # (256, 784)
    b1_ps = b1[perm][None, :]                         # (1, 784)

    ln1w = np.tile(np.asarray(bp["ln1_w"], np.float32).reshape(-1), C1)   # (784,)
    ln1b = np.tile(np.asarray(bp["ln1_b"], np.float32).reshape(-1), C1)   # (784,)

    # Group-reduction matrices for LayerNorm #1 (channel = lane-group of 196).
    gmat = np.zeros((HW2, C1), np.float32)
    gmat[np.arange(HW2), np.arange(HW2) // HW1] = 1.0
    gmatT = np.ascontiguousarray(gmat.T)

    # ConvTranspose#1 (as cross-correlation) + PixelShuffle#2 folded into one
    # (784, 784) matrix; LN1 affine and conv1 bias folded in as well.
    wc1 = convtranspose_to_conv(bp["wt1"])            # (co, ci, kh, kw)
    bc1 = np.asarray(bp["bc1"], np.float32)
    m1 = np.zeros((HW2, HW2), np.float32)
    bias1 = np.zeros((1, HW2), np.float32)
    for h2 in range(H2):
        for w2 in range(H2):
            co = (h2 % 2) * 2 + (w2 % 2)
            ho, wo = h2 // 2, w2 // 2
            jout = h2 * H2 + w2
            bias1[0, jout] = bc1[co]
            for ci in range(C1):
                for kh in range(3):
                    hi = ho + kh - 1
                    if not (0 <= hi < H1):
                        continue
                    for kw in range(3):
                        wi = wo + kw - 1
                        if not (0 <= wi < H1):
                            continue
                        m1[ci * HW1 + hi * H1 + wi, jout] += wc1[co, ci, kh, kw]
    bias1 += ln1b[None, :] @ m1          # conv of the LN1 bias (exact, host f32)
    m1 = m1 * ln1w[:, None]              # LN1 scale folded into the matrix rows

    # ConvTranspose#2 taps: weight * validity mask * LN2 scale (per shifted
    # input position), plus a bias row = conv2(LN2 bias) + conv2 bias.
    wc2 = convtranspose_to_conv(bp["wt2"]).reshape(3, 3)
    ln2w = np.asarray(bp["ln2_w"], np.float32).reshape(-1)
    ln2b = np.asarray(bp["ln2_b"], np.float32).reshape(-1)
    bc2 = float(np.asarray(bp["bc2"], np.float32).reshape(-1)[0])
    tap = np.zeros((9, HW2), np.float32)
    bias2 = np.full((1, HW2), bc2, np.float32)
    for kh in range(3):
        for kw in range(3):
            k = kh * 3 + kw
            for ho in range(H2):
                hi = ho + kh - 1
                if not (0 <= hi < H2):
                    continue
                for wo in range(H2):
                    wi = wo + kw - 1
                    if not (0 <= wi < H2):
                        continue
                    q = hi * H2 + wi
                    tap[k, ho * H2 + wo] = wc2[kh, kw] * ln2w[q]
                    bias2[0, ho * H2 + wo] += wc2[kh, kw] * ln2b[q]

    j = jnp.asarray
    return dict(
        w1=j(w1_ps, dtype=jnp.bfloat16), b1=j(b1_ps),
        gmat=j(gmat), gmatT=j(gmatT),
        m1=j(m1, dtype=jnp.bfloat16), bias1=j(bias1),
        tap=j(tap), bias2=j(bias2),
    )


# ----------------------------- pure-JAX reference ----------------------------

def pixel_shuffle(x, r):
    B, C, H, W = x.shape
    c = C // (r * r)
    x = x.reshape(B, c, r, r, H, W)
    x = x.transpose(0, 1, 4, 2, 5, 3)
    return x.reshape(B, c, H * r, W * r)


def layernorm_ref(x, w, b, eps=1e-5):
    mean = x.mean(axis=(-2, -1), keepdims=True)
    var = ((x - mean) ** 2).mean(axis=(-2, -1), keepdims=True)
    return (x - mean) / jnp.sqrt(var + eps) * w + b


def conv3x3_ref(x, w, b):
    y = jax.lax.conv_general_dilated(
        x, w, window_strides=(1, 1), padding=((1, 1), (1, 1)),
        dimension_numbers=("NCHW", "OIHW", "NCHW"),
        precision=jax.lax.Precision.HIGHEST)
    return y + b[None, :, None, None]


def gnet_reference(x, bp):
    B = x.shape[0]
    wc1 = jnp.asarray(convtranspose_to_conv(bp["wt1"]))
    wc2 = jnp.asarray(convtranspose_to_conv(bp["wt2"]))
    h = jnp.dot(x, bp["w1"].T, precision=jax.lax.Precision.HIGHEST) + bp["b1"]
    h = h.reshape(B, 16, 7, 7)
    h = pixel_shuffle(h, 2)
    h = layernorm_ref(h, bp["ln1_w"], bp["ln1_b"])
    h = conv3x3_ref(h, wc1, bp["bc1"])
    h = jnp.where(h >= 0, h, 0.1 * h)
    h = pixel_shuffle(h, 2)
    h = layernorm_ref(h, bp["ln2_w"], bp["ln2_b"])
    h = conv3x3_ref(h, wc2, bp["bc2"])
    return jnp.tanh(h)


# ----------------------------------- main -------------------------------------

if __name__ == "__main__":
    key = jax.random.PRNGKey(0)
    k_param, k_x = jax.random.split(key)
    base = init_base_params(k_param)
    kparams = prepare_kernel_params(base)
    x = jax.random.normal(k_x, (2, LATENT), jnp.float32)   # batch=2, latent=256

    out = jax.jit(gnet_forward)(x, kparams)
    out = jax.block_until_ready(out)
    assert out.shape == (2, 1, H2, H2), out.shape

    ref = jax.block_until_ready(gnet_reference(x, base))
    np.testing.assert_allclose(np.asarray(out), np.asarray(ref), atol=2e-2, rtol=2e-2)

    print("KERNEL_OK")
</pallas_src>

<mosaic_0001>
module attributes {stable_mosaic.version = 11 : i64} {
  func.func @gnet_kernel(%arg0: i32, %arg1: memref<2x256xf32, #tpu.memory_space<vmem>>, %arg2: memref<256x784xbf16, #tpu.memory_space<vmem>>, %arg3: memref<1x784xf32, #tpu.memory_space<vmem>>, %arg4: memref<784x4xf32, #tpu.memory_space<vmem>>, %arg5: memref<4x784xf32, #tpu.memory_space<vmem>>, %arg6: memref<784x784xbf16, #tpu.memory_space<vmem>>, %arg7: memref<1x784xf32, #tpu.memory_space<vmem>>, %arg8: memref<9x784xf32, #tpu.memory_space<vmem>>, %arg9: memref<1x784xf32, #tpu.memory_space<vmem>>, %arg10: memref<2x784xf32, #tpu.memory_space<vmem>>, %arg11: memref<2x1040xf32, #tpu.memory_space<vmem>>) attributes {dimension_semantics = [#tpu.dimension_semantics<arbitrary>], iteration_bounds = array<i64: 1>, scalar_prefetch = 0 : i64, scratch_operands = 1 : i64, tpu.core_type = #tpu.core_type<tc>, window_params = [{transform_indices = @transform_0, window_bounds = array<i64: 2, 256>}, {pipeline_mode = #tpu.pipeline_mode<synchronous>, transform_indices = @transform_1, window_bounds = array<i64: 256, 784>}, {pipeline_mode = #tpu.pipeline_mode<synchronous>, transform_indices = @transform_2, window_bounds = array<i64: 1, 784>}, {pipeline_mode = #tpu.pipeline_mode<synchronous>, transform_indices = @transform_3, window_bounds = array<i64: 784, 4>}, {pipeline_mode = #tpu.pipeline_mode<synchronous>, transform_indices = @transform_4, window_bounds = array<i64: 4, 784>}, {pipeline_mode = #tpu.pipeline_mode<synchronous>, transform_indices = @transform_5, window_bounds = array<i64: 784, 784>}, {pipeline_mode = #tpu.pipeline_mode<synchronous>, transform_indices = @transform_6, window_bounds = array<i64: 1, 784>}, {pipeline_mode = #tpu.pipeline_mode<synchronous>, transform_indices = @transform_7, window_bounds = array<i64: 9, 784>}, {pipeline_mode = #tpu.pipeline_mode<synchronous>, transform_indices = @transform_8, window_bounds = array<i64: 1, 784>}, {transform_indices = @transform_9, window_bounds = array<i64: 2, 784>}]} {
    %c0 = arith.constant 0 : index
    %c0_0 = arith.constant 0 : index
    %0 = vector.load %arg1[%c0, %c0_0] : memref<2x256xf32, #tpu.memory_space<vmem>>, vector<2x256xf32>
    %1 = arith.truncf %0 : vector<2x256xf32> to vector<2x256xbf16>
    %c0_1 = arith.constant 0 : index
    %c0_2 = arith.constant 0 : index
    %2 = vector.load %arg2[%c0_1, %c0_2] : memref<256x784xbf16, #tpu.memory_space<vmem>>, vector<256x784xbf16>
    %cst = arith.constant dense<0.000000e+00> : vector<2x784xf32>
    %3 = tpu.matmul %1, %2, %cst {dimension_numbers = #tpu.dot_dimension_numbers<[1], [0], [0], [1], [0, 0, 1, 1], [], []>} : vector<2x256xbf16>, vector<256x784xbf16>, vector<2x784xf32> -> vector<2x784xf32>
    %c0_3 = arith.constant 0 : index
    %c0_4 = arith.constant 0 : index
    %4 = vector.load %arg3[%c0_3, %c0_4] : memref<1x784xf32, #tpu.memory_space<vmem>>, vector<1x784xf32>
    %5 = vector.broadcast %4 : vector<1x784xf32> to vector<2x784xf32>
    %6 = arith.addf %3, %5 : vector<2x784xf32>
    %c0_5 = arith.constant 0 : index
    %c0_6 = arith.constant 0 : index
    %7 = vector.load %arg4[%c0_5, %c0_6] : memref<784x4xf32, #tpu.memory_space<vmem>>, vector<784x4xf32>
    %cst_7 = arith.constant dense<0.000000e+00> : vector<2x4xf32>
    %8 = tpu.matmul %6, %7, %cst_7 {dimension_numbers = #tpu.dot_dimension_numbers<[1], [0], [0], [1], [0, 0, 1, 1], [], []>} : vector<2x784xf32>, vector<784x4xf32>, vector<2x4xf32> -> vector<2x4xf32>
    %cst_8 = arith.constant 0.00510204071 : f32
    %9 = vector.broadcast %cst_8 : f32 to vector<2x4xf32>
    %10 = arith.mulf %8, %9 : vector<2x4xf32>
    %c0_9 = arith.constant 0 : index
    %c0_10 = arith.constant 0 : index
    %11 = vector.load %arg5[%c0_9, %c0_10] : memref<4x784xf32, #tpu.memory_space<vmem>>, vector<4x784xf32>
    %cst_11 = arith.constant dense<0.000000e+00> : vector<2x784xf32>
    %12 = tpu.matmul %10, %11, %cst_11 {dimension_numbers = #tpu.dot_dimension_numbers<[1], [0], [0], [1], [0, 0, 1, 1], [], []>} : vector<2x4xf32>, vector<4x784xf32>, vector<2x784xf32> -> vector<2x784xf32>
    %13 = arith.subf %6, %12 : vector<2x784xf32>
    %14 = arith.mulf %13, %13 : vector<2x784xf32>
    %c0_12 = arith.constant 0 : index
    %c0_13 = arith.constant 0 : index
    %15 = vector.load %arg4[%c0_12, %c0_13] : memref<784x4xf32, #tpu.memory_space<vmem>>, vector<784x4xf32>
    %cst_14 = arith.constant dense<0.000000e+00> : vector<2x4xf32>
    %16 = tpu.matmul %14, %15, %cst_14 {dimension_numbers = #tpu.dot_dimension_numbers<[1], [0], [0], [1], [0, 0, 1, 1], [], []>} : vector<2x784xf32>, vector<784x4xf32>, vector<2x4xf32> -> vector<2x4xf32>
    %cst_15 = arith.constant 0.00510204071 : f32
    %17 = vector.broadcast %cst_15 : f32 to vector<2x4xf32>
    %18 = arith.mulf %16, %17 : vector<2x4xf32>
    %cst_16 = arith.constant 9.99999974E-6 : f32
    %19 = vector.broadcast %cst_16 : f32 to vector<2x4xf32>
    %20 = arith.addf %18, %19 : vector<2x4xf32>
    %21 = math.rsqrt %20 : vector<2x4xf32>
    %c0_17 = arith.constant 0 : index
    %c0_18 = arith.constant 0 : index
    %22 = vector.load %arg5[%c0_17, %c0_18] : memref<4x784xf32, #tpu.memory_space<vmem>>, vector<4x784xf32>
    %cst_19 = arith.constant dense<0.000000e+00> : vector<2x784xf32>
    %23 = tpu.matmul %21, %22, %cst_19 {dimension_numbers = #tpu.dot_dimension_numbers<[1], [0], [0], [1], [0, 0, 1, 1], [], []>} : vector<2x4xf32>, vector<4x784xf32>, vector<2x784xf32> -> vector<2x784xf32>
    %24 = arith.mulf %13, %23 : vector<2x784xf32>
    %25 = arith.truncf %24 : vector<2x784xf32> to vector<2x784xbf16>
    %c0_20 = arith.constant 0 : index
    %c0_21 = arith.constant 0 : index
    %26 = vector.load %arg6[%c0_20, %c0_21] : memref<784x784xbf16, #tpu.memory_space<vmem>>, vector<784x784xbf16>
    %cst_22 = arith.constant dense<0.000000e+00> : vector<2x784xf32>
    %27 = tpu.matmul %25, %26, %cst_22 {dimension_numbers = #tpu.dot_dimension_numbers<[1], [0], [0], [1], [0, 0, 1, 1], [], []>} : vector<2x784xbf16>, vector<784x784xbf16>, vector<2x784xf32> -> vector<2x784xf32>
    %c0_23 = arith.constant 0 : index
    %c0_24 = arith.constant 0 : index
    %28 = vector.load %arg7[%c0_23, %c0_24] : memref<1x784xf32, #tpu.memory_space<vmem>>, vector<1x784xf32>
    %29 = vector.broadcast %28 : vector<1x784xf32> to vector<2x784xf32>
    %30 = arith.addf %27, %29 : vector<2x784xf32>
    %cst_25 = arith.constant 0.000000e+00 : f32
    %31 = vector.broadcast %cst_25 : f32 to vector<2x784xf32>
    %32 = arith.cmpf oge, %30, %31 : vector<2x784xf32>
    %cst_26 = arith.constant 1.000000e-01 : f32
    %33 = vector.broadcast %cst_26 : f32 to vector<2x784xf32>
    %34 = arith.mulf %33, %30 : vector<2x784xf32>
    %35 = arith.select %32, %30, %34 : vector<2x784xi1>, vector<2x784xf32>
    %cst_27 = arith.constant dense<0.000000e+00> : vector<2xf32>
    %36 = vector.multi_reduction <add>, %35, %cst_27 [1] : vector<2x784xf32> to vector<2xf32>
    %37 = vector.shape_cast %36 : vector<2xf32> to vector<2x1xf32>
    %cst_28 = arith.constant 7.840000e+02 : f32
    %38 = vector.broadcast %cst_28 : f32 to vector<2x1xf32>
    %39 = arith.divf %37, %38 : vector<2x1xf32>
    %40 = vector.broadcast %39 : vector<2x1xf32> to vector<2x784xf32>
    %41 = arith.subf %35, %40 : vector<2x784xf32>
    %42 = arith.mulf %41, %41 : vector<2x784xf32>
    %cst_29 = arith.constant dense<0.000000e+00> : vector<2xf32>
    %43 = vector.multi_reduction <add>, %42, %cst_29 [1] : vector<2x784xf32> to vector<2xf32>
    %44 = vector.shape_cast %43 : vector<2xf32> to vector<2x1xf32>
    %cst_30 = arith.constant 7.840000e+02 : f32
    %45 = vector.broadcast %cst_30 : f32 to vector<2x1xf32>
    %46 = arith.divf %44, %45 : vector<2x1xf32>
    %cst_31 = arith.constant 9.99999974E-6 : f32
    %47 = vector.broadcast %cst_31 : f32 to vector<2x1xf32>
    %48 = arith.addf %46, %47 : vector<2x1xf32>
    %49 = math.rsqrt %48 : vector<2x1xf32>
    %50 = vector.broadcast %49 : vector<2x1xf32> to vector<2x784xf32>
    %51 = arith.mulf %41, %50 : vector<2x784xf32>
    %cst_32 = arith.constant 0.000000e+00 : f32
    %52 = vector.broadcast %cst_32 : f32 to vector<2x128xf32>
    %c0_33 = arith.constant 0 : index
    %c0_34 = arith.constant 0 : index
    %53 = vector.load %arg11[%c0_33, %c0_34] : memref<2x1040xf32, #tpu.memory_space<vmem>>, vector<2x128xf32>
    tpu.vector_store %arg11[%c0_33, %c0_34], %52 {strides = array<i32>} : memref<2x1040xf32, #tpu.memory_space<vmem>>, vector<2x128xf32>,
    %cst_35 = arith.constant 0.000000e+00 : f32
    %54 = vector.broadcast %cst_35 : f32 to vector<2x128xf32>
    %c0_36 = arith.constant 0 : index
    %c912 = arith.constant 912 : index
    %55 = vector.load %arg11[%c0_36, %c912] : memref<2x1040xf32, #tpu.memory_space<vmem>>, vector<2x128xf32>
    tpu.vector_store %arg11[%c0_36, %c912], %54 {strides = array<i32>} : memref<2x1040xf32, #tpu.memory_space<vmem>>, vector<2x128xf32>,
    %c0_37 = arith.constant 0 : index
    %c128 = arith.constant 128 : index
    %56 = vector.load %arg11[%c0_37, %c128] : memref<2x1040xf32, #tpu.memory_space<vmem>>, vector<2x784xf32>
    tpu.vector_store %arg11[%c0_37, %c128], %51 {strides = array<i32>} : memref<2x1040xf32, #tpu.memory_space<vmem>>, vector<2x784xf32>,
    %c0_38 = arith.constant 0 : index
    %c0_39 = arith.constant 0 : index
    %57 = vector.load %arg9[%c0_38, %c0_39] : memref<1x784xf32, #tpu.memory_space<vmem>>, vector<1x784xf32>
    %c0_40 = arith.constant 0 : index
    %c0_41 = arith.constant 0 : index
    %58 = vector.load %arg8[%c0_40, %c0_41] : memref<9x784xf32, #tpu.memory_space<vmem>>, vector<1x784xf32>
    %c0_42 = arith.constant 0 : index
    %c99 = arith.constant 99 : index
    %59 = vector.load %arg11[%c0_42, %c99] : memref<2x1040xf32, #tpu.memory_space<vmem>>, vector<2x784xf32>
    %60 = vector.broadcast %58 : vector<1x784xf32> to vector<2x784xf32>
    %61 = arith.mulf %60, %59 : vector<2x784xf32>
    %62 = vector.broadcast %57 : vector<1x784xf32> to vector<2x784xf32>
    %63 = arith.addf %62, %61 : vector<2x784xf32>
    %c1 = arith.constant 1 : index
    %c0_43 = arith.constant 0 : index
    %64 = vector.load %arg8[%c1, %c0_43] : memref<9x784xf32, #tpu.memory_space<vmem>>, vector<1x784xf32>
    %c0_44 = arith.constant 0 : index
    %c100 = arith.constant 100 : index
    %65 = vector.load %arg11[%c0_44, %c100] : memref<2x1040xf32, #tpu.memory_space<vmem>>, vector<2x784xf32>
    %66 = vector.broadcast %64 : vector<1x784xf32> to vector<2x784xf32>
    %67 = arith.mulf %66, %65 : vector<2x784xf32>
    %68 = arith.addf %63, %67 : vector<2x784xf32>
    %c2 = arith.constant 2 : index
    %c0_45 = arith.constant 0 : index
    %69 = vector.load %arg8[%c2, %c0_45] : memref<9x784xf32, #tpu.memory_space<vmem>>, vector<1x784xf32>
    %c0_46 = arith.constant 0 : index
    %c101 = arith.constant 101 : index
    %70 = vector.load %arg11[%c0_46, %c101] : memref<2x1040xf32, #tpu.memory_space<vmem>>, vector<2x784xf32>
    %71 = vector.broadcast %69 : vector<1x784xf32> to vector<2x784xf32>
    %72 = arith.mulf %71, %70 : vector<2x784xf32>
    %73 = arith.addf %68, %72 : vector<2x784xf32>
    %c3 = arith.constant 3 : index
    %c0_47 = arith.constant 0 : index
    %74 = vector.load %arg8[%c3, %c0_47] : memref<9x784xf32, #tpu.memory_space<vmem>>, vector<1x784xf32>
    %c0_48 = arith.constant 0 : index
    %c127 = arith.constant 127 : index
    %75 = vector.load %arg11[%c0_48, %c127] : memref<2x1040xf32, #tpu.memory_space<vmem>>, vector<2x784xf32>
    %76 = vector.broadcast %74 : vector<1x784xf32> to vector<2x784xf32>
    %77 = arith.mulf %76, %75 : vector<2x784xf32>
    %78 = arith.addf %73, %77 : vector<2x784xf32>
    %c4 = arith.constant 4 : index
    %c0_49 = arith.constant 0 : index
    %79 = vector.load %arg8[%c4, %c0_49] : memref<9x784xf32, #tpu.memory_space<vmem>>, vector<1x784xf32>
    %c0_50 = arith.constant 0 : index
    %c128_51 = arith.constant 128 : index
    %80 = vector.load %arg11[%c0_50, %c128_51] : memref<2x1040xf32, #tpu.memory_space<vmem>>, vector<2x784xf32>
    %81 = vector.broadcast %79 : vector<1x784xf32> to vector<2x784xf32>
    %82 = arith.mulf %81, %80 : vector<2x784xf32>
    %83 = arith.addf %78, %82 : vector<2x784xf32>
    %c5 = arith.constant 5 : index
    %c0_52 = arith.constant 0 : index
    %84 = vector.load %arg8[%c5, %c0_52] : memref<9x784xf32, #tpu.memory_space<vmem>>, vector<1x784xf32>
    %c0_53 = arith.constant 0 : index
    %c129 = arith.constant 129 : index
    %85 = vector.load %arg11[%c0_53, %c129] : memref<2x1040xf32, #tpu.memory_space<vmem>>, vector<2x784xf32>
    %86 = vector.broadcast %84 : vector<1x784xf32> to vector<2x784xf32>
    %87 = arith.mulf %86, %85 : vector<2x784xf32>
    %88 = arith.addf %83, %87 : vector<2x784xf32>
    %c6 = arith.constant 6 : index
    %c0_54 = arith.constant 0 : index
    %89 = vector.load %arg8[%c6, %c0_54] : memref<9x784xf32, #tpu.memory_space<vmem>>, vector<1x784xf32>
    %c0_55 = arith.constant 0 : index
    %c155 = arith.constant 155 : index
    %90 = vector.load %arg11[%c0_55, %c155] : memref<2x1040xf32, #tpu.memory_space<vmem>>, vector<2x784xf32>
    %91 = vector.broadcast %89 : vector<1x784xf32> to vector<2x784xf32>
    %92 = arith.mulf %91, %90 : vector<2x784xf32>
    %93 = arith.addf %88, %92 : vector<2x784xf32>
    %c7 = arith.constant 7 : index
    %c0_56 = arith.constant 0 : index
    %94 = vector.load %arg8[%c7, %c0_56] : memref<9x784xf32, #tpu.memory_space<vmem>>, vector<1x784xf32>
    %c0_57 = arith.constant 0 : index
    %c156 = arith.constant 156 : index
    %95 = vector.load %arg11[%c0_57, %c156] : memref<2x1040xf32, #tpu.memory_space<vmem>>, vector<2x784xf32>
    %96 = vector.broadcast %94 : vector<1x784xf32> to vector<2x784xf32>
    %97 = arith.mulf %96, %95 : vector<2x784xf32>
    %98 = arith.addf %93, %97 : vector<2x784xf32>
    %c8 = arith.constant 8 : index
    %c0_58 = arith.constant 0 : index
    %99 = vector.load %arg8[%c8, %c0_58] : memref<9x784xf32, #tpu.memory_space<vmem>>, vector<1x784xf32>
    %c0_59 = arith.constant 0 : index
    %c157 = arith.constant 157 : index
    %100 = vector.load %arg11[%c0_59, %c157] : memref<2x1040xf32, #tpu.memory_space<vmem>>, vector<2x784xf32>
    %101 = vector.broadcast %99 : vector<1x784xf32> to vector<2x784xf32>
    %102 = arith.mulf %101, %100 : vector<2x784xf32>
    %103 = arith.addf %98, %102 : vector<2x784xf32>
    %104 = math.tanh %103 : vector<2x784xf32>
    %c0_60 = arith.constant 0 : index
    %c0_61 = arith.constant 0 : index
    %105 = vector.load %arg10[%c0_60, %c0_61] : memref<2x784xf32, #tpu.memory_space<vmem>>, vector<2x784xf32>
    tpu.vector_store %arg10[%c0_60, %c0_61], %104 {strides = array<i32>} : memref<2x784xf32, #tpu.memory_space<vmem>>, vector<2x784xf32>,
    return
  }
  func.func @transform_0(%arg0: i32) -> (i32, i32) {
    %c0_i32 = arith.constant 0 : i32
    %c0_i32_0 = arith.constant 0 : i32
    return %arg0, %c0_i32 : i32, i32
  }
  func.func @transform_1(%arg0: i32) -> (i32, i32) {
    %c0_i32 = arith.constant 0 : i32
    %c0_i32_0 = arith.constant 0 : i32
    %c0_i32_1 = arith.constant 0 : i32
    return %c0_i32, %c0_i32_0 : i32, i32
  }
  func.func @transform_2(%arg0: i32) -> (i32, i32) {
    %c0_i32 = arith.constant 0 : i32
    %c0_i32_0 = arith.constant 0 : i32
    %c0_i32_1 = arith.constant 0 : i32
    return %c0_i32, %c0_i32_0 : i32, i32
  }
  func.func @transform_3(%arg0: i32) -> (i32, i32) {
    %c0_i32 = arith.constant 0 : i32
    %c0_i32_0 = arith.constant 0 : i32
    %c0_i32_1 = arith.constant 0 : i32
    return %c0_i32, %c0_i32_0 : i32, i32
  }
  func.func @transform_4(%arg0: i32) -> (i32, i32) {
    %c0_i32 = arith.constant 0 : i32
    %c0_i32_0 = arith.constant 0 : i32
    %c0_i32_1 = arith.constant 0 : i32
    return %c0_i32, %c0_i32_0 : i32, i32
  }
  func.func @transform_5(%arg0: i32) -> (i32, i32) {
    %c0_i32 = arith.constant 0 : i32
    %c0_i32_0 = arith.constant 0 : i32
    %c0_i32_1 = arith.constant 0 : i32
    return %c0_i32, %c0_i32_0 : i32, i32
  }
  func.func @transform_6(%arg0: i32) -> (i32, i32) {
    %c0_i32 = arith.constant 0 : i32
    %c0_i32_0 = arith.constant 0 : i32
    %c0_i32_1 = arith.constant 0 : i32
    return %c0_i32, %c0_i32_0 : i32, i32
  }
  func.func @transform_7(%arg0: i32) -> (i32, i32) {
    %c0_i32 = arith.constant 0 : i32
    %c0_i32_0 = arith.constant 0 : i32
    %c0_i32_1 = arith.constant 0 : i32
    return %c0_i32, %c0_i32_0 : i32, i32
  }
  func.func @transform_8(%arg0: i32) -> (i32, i32) {
    %c0_i32 = arith.constant 0 : i32
    %c0_i32_0 = arith.constant 0 : i32
    %c0_i32_1 = arith.constant 0 : i32
    return %c0_i32, %c0_i32_0 : i32, i32
  }
  func.func @transform_9(%arg0: i32) -> (i32, i32) {
    %c0_i32 = arith.constant 0 : i32
    %c0_i32_0 = arith.constant 0 : i32
    return %arg0, %c0_i32 : i32, i32
  }
}

</mosaic_0001>

<bundles_post_ra>
// kernel: gnet_forward.1
= control target key start
LH: loop header
LB: loop body
LE: loop exit
PB: predicated region body
PF: predicated region fallthrough
CT: control target
= control target key end

     0   :  { %14 = vsyncpa [#allocation4], 0  ;;  %s9902_s0 = inlined_call_operand.hbm [shape: f32[2,256], index: 0, kind: input, shape index: {}]   ;;  %s9903_s1 = inlined_call_operand.vmem [shape: bf16[256,784], index: 1, kind: input, shape index: {}]   ;;  %s9904_s2 = inlined_call_operand.hbm [shape: f32[1,784], index: 2, kind: input, shape index: {}]   ;;  %s9905_s3 = inlined_call_operand.vmem [shape: f32[784,4], index: 3, kind: input, shape index: {}]   ;;  %s9906_s4 = inlined_call_operand.hbm [shape: f32[4,784], index: 4, kind: input, shape index: {}]   ;;  %s9907_s5 = inlined_call_operand.hbm [shape: bf16[784,784], index: 5, kind: input, shape index: {}]   ;;  %s9908_s6 = inlined_call_operand.hbm [shape: f32[1,784], index: 6, kind: input, shape index: {}]   ;;  %s9909_s7 = inlined_call_operand.hbm [shape: f32[9,784], index: 7, kind: input, shape index: {}]   ;;  %s9910_s8 = inlined_call_operand.hbm [shape: f32[1,784], index: 8, kind: input, shape index: {}]   ;;  %s9911_s9 = inlined_call_operand.vmem [shape: f32[2,784], index: 9, kind: output, shape index: {}]  }
   0x1   :  { %15 = vsyncpa [#allocation6], 0 }
   0x2   :  { %16 = vsyncpa [#allocation9], 0 }
   0x3   :  { %17 = vsyncpa [#allocation12], 0  ;;  %s7935_s30 = smov [#allocation5]   ;;  %s7936_s11 = smov [#allocation8]  }
   0x4   :  { %s36_s10 = sshll.u32 %s7935_s30, 4  ;;  %s57_s12 = sshll.u32 %s7936_s11, 4  ;;  %s37_s10 = int_to_ptr.vmem [resolvable:$true] %s36_s10  ;;  %s58_s12 = int_to_ptr.vmem [resolvable:$true] %s57_s12 }
   0x5   :  { %s7795_s13 = scalar_lea.vmem %s37_s10, 112  ;;  %s7799_s14 = scalar_lea.vmem %s37_s10, 128 }
   0x6   :  { %p7796_p0 = scmp.ne.s32.totalorder %s37_s10, %s7795_s13  ;;  %p7800_p1 = scmp.lt.s32.totalorder %s37_s10, %s37_s10 }
   0x7   :  { %p7801_p2 = scmp.lt.s32.totalorder %s7799_s14, %s7795_s13 }
   0x9   :  { %p7802_p3 = por %p7801_p2, %p7800_p1 }
   0xb   :  { %p7803_p4 = pnand %p7802_p3, %p7796_p0 }
   0xd   :  { %7806 = shalt.err (!%p7803_p4)
}
   0xe   :  { %39 = dma.hbm_to_vmem [thread:$0]  %s9904_s2, 112, %s37_s10, [#allocation6]  }
   0xf   :  { %s7815_s17 = scalar_lea.vmem %s58_s12, 43904  ;;  %p7820_p6 = scmp.lt.s32.totalorder %s58_s12, %s58_s12 }
  0x10   :  { %p7816_p5 = scmp.ne.s32.totalorder %s58_s12, %s7815_s17  ;;  %p7821_p7 = scmp.lt.s32.totalorder %s7815_s17, %s7815_s17 }
  0x12   :  { %p7822_p8 = por %p7821_p7, %p7820_p6 }
  0x14   :  { %p7823_p9 = pnand %p7822_p8, %p7816_p5 }
  0x16   :  { %7826 = shalt.err (!%p7823_p9)
}
  0x17   :  { %s7937_s18 = smov 448   ;;  %s7938_s19 = smov 28  }
  0x18   :  { %63 = dma.hbm_to_vmem [thread:$0]  %s9907_s5, 43904, %s58_s12, [#allocation9], %s7937_s18, %s7937_s18, %s7938_s19  }
  0x19   :  { %s7939_s22 = smov [#allocation11]  }
  0x1a   :  { %s79_s23 = sshll.u32 %s7939_s22, 4  ;;  %s80_s23 = int_to_ptr.vmem [resolvable:$true] %s79_s23 }
  0x1b   :  { %s7835_s24 = scalar_lea.vmem %s80_s23, 1792  ;;  %p7840_p11 = scmp.lt.s32.totalorder %s80_s23, %s80_s23 }
  0x1c   :  { %p7836_p10 = scmp.ne.s32.totalorder %s80_s23, %s7835_s24  ;;  %p7841_p12 = scmp.lt.s32.totalorder %s7835_s24, %s7835_s24 }
  0x1e   :  { %p7842_p13 = por %p7841_p12, %p7840_p11 }
  0x20   :  { %p7843_p0 = pnand %p7842_p13, %p7836_p10 }
  0x22   :  { %7846 = shalt.err (!%p7843_p0)
}
  0x23   :  { %s7940_s2 = smov 896   ;;  %s7941_s25 = smov 56  }
  0x24   :  { %85 = dma.hbm_to_vmem [thread:$0]  %s9909_s7, 1792, %s80_s23, [#allocation12], %s7940_s2, %s7940_s2, %s7941_s25  }
  0x25   :  { %s7942_s28 = smov [#allocation3]   ;;  %s7943_s5 = smov [#allocation7]  }
  0x26   :  { %s24_s29 = sshll.u32 %s7942_s28, 4  ;;  %s48_s30 = sshll.u32 %s7943_s5, 4  ;;  %s25_s29 = int_to_ptr.vmem [resolvable:$true] %s24_s29  ;;  %s49_s30 = int_to_ptr.vmem [resolvable:$true] %s48_s30 }
  0x27   :  { %s7855_s10 = scalar_lea.vmem %s25_s29, 64  ;;  %p7860_p2 = scmp.lt.s32.totalorder %s25_s29, %s25_s29 }
  0x28   :  { %p7856_p1 = scmp.ne.s32.totalorder %s25_s29, %s7855_s10  ;;  %p7861_p3 = scmp.lt.s32.totalorder %s7855_s10, %s7855_s10 }
  0x2a   :  { %p7862_p4 = por %p7861_p3, %p7860_p2 }
  0x2c   :  { %p7863_p5 = pnand %p7862_p4, %p7856_p1 }
  0x2e   :  { %7866 = shalt.err (!%p7863_p5)
}
  0x2f   :  { %27 = dma.hbm_to_vmem [thread:$0]  %s9902_s0, 64, %s25_s29, [#allocation4]  }
  0x30   :  { %s7875_s13 = scalar_lea.vmem %s49_s30, 448  ;;  %p7880_p7 = scmp.lt.s32.totalorder %s49_s30, %s49_s30 }
  0x31   :  { %p7876_p6 = scmp.ne.s32.totalorder %s49_s30, %s7875_s13  ;;  %p7881_p8 = scmp.lt.s32.totalorder %s7875_s13, %s7875_s13 }
  0x33   :  { %p7882_p9 = por %p7881_p8, %p7880_p7 }
  0x35   :  { %p7883_p10 = pnand %p7882_p9, %p7876_p6 }
  0x37   :  { %7886 = shalt.err (!%p7883_p10)
}
  0x38   :  { %51 = dma.hbm_to_vmem [thread:$0]  %s9906_s4, 448, %s49_s30, [#allocation6]  }
  0x39   :  { %s7944_s15 = smov [#allocation10]   ;;  %s7945_s17 = smov [#allocation13]  }
  0x3a   :  { %s70_s16 = sshll.u32 %s7944_s15, 4  ;;  %s92_s18 = sshll.u32 %s7945_s17, 4  ;;  %s71_s16 = int_to_ptr.vmem [resolvable:$true] %s70_s16  ;;  %s93_s18 = int_to_ptr.vmem [resolvable:$true] %s92_s18 }
  0x3b   :  { %s7895_s20 = scalar_lea.vmem %s71_s16, 112  ;;  %s7899_s0 = scalar_lea.vmem %s71_s16, 128 }
  0x3c   :  { %p7896_p11 = scmp.ne.s32.totalorder %s71_s16, %s7895_s20  ;;  %p7900_p12 = scmp.lt.s32.totalorder %s71_s16, %s71_s16 }
  0x3d   :  { %p7901_p13 = scmp.lt.s32.totalorder %s7899_s0, %s7895_s20 }
  0x3f   :  { %p7902_p0 = por %p7901_p13, %p7900_p12 }
  0x41   :  { %p7903_p1 = pnand %p7902_p0, %p7896_p11 }
  0x43   :  { %7906 = shalt.err (!%p7903_p1)
}
  0x44   :  { %73 = dma.hbm_to_vmem [thread:$0]  %s9908_s6, 112, %s71_s16, [#allocation9]  }
  0x45   :  { %s7915_s23 = scalar_lea.vmem %s93_s18, 112  ;;  %s7919_s4 = scalar_lea.vmem %s93_s18, 128 }
  0x46   :  { %p7916_p2 = scmp.ne.s32.totalorder %s93_s18, %s7915_s23  ;;  %p7920_p3 = scmp.lt.s32.totalorder %s93_s18, %s93_s18 }
  0x47   :  { %p7921_p4 = scmp.lt.s32.totalorder %s7919_s4, %s7915_s23 }
  0x49   :  { %p7922_p5 = por %p7921_p4, %p7920_p3 }
  0x4b   :  { %p7923_p6 = pnand %p7922_p5, %p7916_p2 }
  0x4d   :  { %7926 = shalt.err (!%p7923_p6)
}
  0x4e   :  { %95 = dma.hbm_to_vmem [thread:$0]  %s9910_s8, 112, %s93_s18, [#allocation12]  }
  0x4f   :  { %7927 = dma.done.wait [#allocation4], 64  }
  0x50   :  { %7928 = vsyncadd [#allocation4], 4294967232 }
  0x51   :  { %7929 = dma.done.wait [#allocation6], 560  }
  0x52   :  { %7930 = vsyncadd [#allocation6], 4294966736 }
  0x53   :  { %7931 = dma.done.wait [#allocation9], 44016  }
  0x54   :  { %7932 = vsyncadd [#allocation9], 4294923280 }
  0x55   :  { %7933 = dma.done.wait [#allocation12], 1904  }
  0x56   :  { %7934 = vsyncadd [#allocation12], 4294965392  ;;  %v7066_v0 = vld [vmem:[%s9903_s1 + $0x18c] ss:$28 sps:$4 sm:$0xff]   ;;  %v7068_v1 = vld [vmem:[%s9903_s1 + $0x194] ss:$28 sps:$4 sm:$0xff]  }
  0x57   :  { %873 = vmatprep.subr.bf16.mxu0 %v7066_v0  ;;  %v7070_v2 = vld [vmem:[%s9903_s1 + $0x188] ss:$28 sps:$4 sm:$0xff]   ;;  %v7071_v3 = vld [vmem:[%s9903_s1 + $0x190] ss:$28 sps:$4 sm:$0xff]   ;;  %914 = vmatprep.subr.bf16.mxu1 %v7068_v1  ;;  %v7074_v5 = vld [vmem:[%s9903_s1 + $0x15c] ss:$28 sps:$4 sm:$0xff]  }
  0x58   :  { %v7072_v4 = vld [vmem:[%s9903_s1 + $0x154] ss:$28 sps:$4 sm:$0xff]   ;;  %874 = vmatpush1.bf16.msra.mxu0 %v7070_v2  ;;  %915 = vmatpush1.bf16.msra.mxu1 %v7071_v3  ;;  %v7078_v8 = vld [vmem:[%s9903_s1 + $0x11c] ss:$28 sps:$4 sm:$0xff]   ;;  %v7080_v9 = vld [vmem:[%s9903_s1 + $0x124] ss:$28 sps:$4 sm:$0xff]  }
  0x59   :  { %v7076_v6 = vld [vmem:[%s9903_s1 + $0x150] ss:$28 sps:$4 sm:$0xff]   ;;  %875 = vmatprep.subr.bf16.mxu0 %v7072_v4  ;;  %v7077_v7 = vld [vmem:[%s9903_s1 + $0x158] ss:$28 sps:$4 sm:$0xff]   ;;  %916 = vmatprep.subr.bf16.mxu1 %v7074_v5  ;;  %v7083_v11 = vld [vmem:[%s9903_s1 + $0x120] ss:$28 sps:$4 sm:$0xff]  }
  0x5a   :  { %v7082_v10 = vld [vmem:[%s9903_s1 + $0x118] ss:$28 sps:$4 sm:$0xff]   ;;  %v7084_v12 = vld [vmem:[%s9903_s1 + $0xe4] ss:$28 sps:$4 sm:$0xff]   ;;  %v7086_v13 = vld [vmem:[%s9903_s1 + $0xec] ss:$28 sps:$4 sm:$0xff]  }
  0x5b   :  { %v7088_v14 = vld [vmem:[%s9903_s1 + $0xe0] ss:$28 sps:$4 sm:$0xff]   ;;  %v7089_v15 = vld [vmem:[%s9903_s1 + $0xe8] ss:$28 sps:$4 sm:$0xff]   ;;  %v7092_v17 = vld [vmem:[%s9903_s1 + $0xb4] ss:$28 sps:$4 sm:$0xff]  }
  0x5c   :  { %876 = vmatpush1.bf16.msra.mxu0 %v7076_v6  ;;  %917 = vmatpush1.bf16.msra.mxu1 %v7077_v7  ;;  %v7090_v16 = vld [vmem:[%s9903_s1 + $0xac] ss:$28 sps:$4 sm:$0xff]   ;;  %v7096_v20 = vld [vmem:[%s9903_s1 + $0x74] ss:$28 sps:$4 sm:$0xff]   ;;  %v7098_v21 = vld [vmem:[%s9903_s1 + $0x7c] ss:$28 sps:$4 sm:$0xff]  }
  0x5d   :  { %877 = vmatprep.subr.bf16.mxu0 %v7078_v8  ;;  %918 = vmatprep.subr.bf16.mxu1 %v7080_v9  ;;  %v7094_v18 = vld [vmem:[%s9903_s1 + $0xa8] ss:$28 sps:$4 sm:$0xff]   ;;  %v7095_v19 = vld [vmem:[%s9903_s1 + $0xb0] ss:$28 sps:$4 sm:$0xff]   ;;  %v7101_v23 = vld [vmem:[%s9903_s1 + $0x78] ss:$28 sps:$4 sm:$0xff]  }
  0x5e   :  { %v7100_v22 = vld [vmem:[%s9903_s1 + $0x70] ss:$28 sps:$4 sm:$0xff]   ;;  %v7102_v24 = vld [vmem:[%s9903_s1 + $0x3c] ss:$28 sps:$4 sm:$0xff]   ;;  %v7104_v25 = vld [vmem:[%s9903_s1 + $0x44] ss:$28 sps:$4 sm:$0xff]  }
  0x5f   :  { %v7106_v26 = vld [vmem:[%s9903_s1 + $0x38] ss:$28 sps:$4 sm:$0xff]   ;;  %v7107_v27 = vld [vmem:[%s9903_s1 + $0x40] ss:$28 sps:$4 sm:$0xff]   ;;  %v7110_v29 = vld [vmem:[%s9903_s1 + $0xc] ss:$28 sps:$4 sm:$0xff]  }
  0x60   :  { %878 = vmatpush1.bf16.msra.mxu0 %v7082_v10  ;;  %919 = vmatpush1.bf16.msra.mxu1 %v7083_v11  ;;  %v7108_v28 = vld [vmem:[%s9903_s1 + $0x4] ss:$28 sps:$4 sm:$0xff]   ;;  %v7114_v32 = vld [vmem:[%s9903_s1 + $0x34c] ss:$28 sps:$4 sm:$0xff]   ;;  %v7116_v33 = vld [vmem:[%s9903_s1 + $0x354] ss:$28 sps:$4 sm:$0xff]  }
  0x61   :  { %879 = vmatprep.subr.bf16.mxu0 %v7084_v12  ;;  %920 = vmatprep.subr.bf16.mxu1 %v7086_v13  ;;  %v7112_v30 = vld [vmem:[%s9903_s1] ss:$28 sps:$4 sm:$0xff]   ;;  %v7113_v31 = vld [vmem:[%s9903_s1 + $0x8] ss:$28 sps:$4 sm:$0xff]   ;;  %v7119_v35 = vld [vmem:[%s9903_s1 + $0x350] ss:$28 sps:$4 sm:$0xff]  }
  0x62   :  { %v7118_v34 = vld [vmem:[%s9903_s1 + $0x348] ss:$28 sps:$4 sm:$0xff]   ;;  %v7120_v36 = vld [vmem:[%s9903_s1 + $0x314] ss:$28 sps:$4 sm:$0xff]   ;;  %v7122_v37 = vld [vmem:[%s9903_s1 + $0x31c] ss:$28 sps:$4 sm:$0xff]  }
  0x63   :  { %v7124_v38 = vld [vmem:[%s9903_s1 + $0x310] ss:$28 sps:$4 sm:$0xff]   ;;  %v7125_v39 = vld [vmem:[%s9903_s1 + $0x318] ss:$28 sps:$4 sm:$0xff]   ;;  %v7128_v41 = vld [vmem:[%s9903_s1 + $0x2e4] ss:$28 sps:$4 sm:$0xff]  }
  0x64   :  { %880 = vmatpush1.bf16.msra.mxu0 %v7088_v14  ;;  %921 = vmatpush1.bf16.msra.mxu1 %v7089_v15  ;;  %v7126_v40 = vld [vmem:[%s9903_s1 + $0x2dc] ss:$28 sps:$4 sm:$0xff]   ;;  %v7132_v44 = vld [vmem:[%s9903_s1 + $0x2a4] ss:$28 sps:$4 sm:$0xff]   ;;  %v7134_v45 = vld [vmem:[%s9903_s1 + $0x2ac] ss:$28 sps:$4 sm:$0xff]  }
  0x65   :  { %881 = vmatprep.subr.bf16.mxu0 %v7090_v16  ;;  %922 = vmatprep.subr.bf16.mxu1 %v7092_v17  ;;  %v7130_v42 = vld [vmem:[%s9903_s1 + $0x2d8] ss:$28 sps:$4 sm:$0xff]   ;;  %v7131_v43 = vld [vmem:[%s9903_s1 + $0x2e0] ss:$28 sps:$4 sm:$0xff]   ;;  %v7137_v48 = vld [vmem:[%s9903_s1 + $0x2a8] ss:$28 sps:$4 sm:$0xff]  }
  0x66   :  { %v6220_v46 = vld.sshfl [vmem:[#allocation3] sm:$0x33 pattern:$0x76325410]  ;;  %v7136_v47 = vld [vmem:[%s9903_s1 + $0x2a0] ss:$28 sps:$4 sm:$0xff]  }
  0x67   :  { %v127_v49 = vcombine.high %v6220_v46, %v6220_v46  ;;  %v7138_v50 = vld [vmem:[%s9903_s1 + $0x26c] ss:$28 sps:$4 sm:$0xff]   ;;  %v7140_v51 = vld [vmem:[%s9903_s1 + $0x274] ss:$28 sps:$4 sm:$0xff]   ;;  %v7146_v56 = vld [vmem:[%s9903_s1 + $0x23c] ss:$28 sps:$4 sm:$0xff]   ;;  %v8227_v5 = vpack.c.bf16 %v6220_v46, %v6220_v46 }
  0x68   :  { %882 = vmatpush1.bf16.msra.mxu0 %v7094_v18  ;;  %923 = vmatpush1.bf16.msra.mxu1 %v7095_v19  ;;  %v7142_v53 = vld [vmem:[%s9903_s1 + $0x268] ss:$28 sps:$4 sm:$0xff]   ;;  %v7143_v54 = vld [vmem:[%s9903_s1 + $0x270] ss:$28 sps:$4 sm:$0xff]   ;;  %v7149_v58 = vld [vmem:[%s9903_s1 + $0x238] ss:$28 sps:$4 sm:$0xff]  }
  0x69   :  { %883 = vmatprep.subr.bf16.mxu0 %v7096_v20  ;;  %924 = vmatprep.subr.bf16.mxu1 %v7098_v21  ;;  %v131_v52 = vpack.c.bf16 %v127_v49, %v127_v49  ;;  %v7144_v55 = vld [vmem:[%s9903_s1 + $0x234] ss:$28 sps:$4 sm:$0xff]   ;;  %v7150_v59 = vld [vmem:[%s9903_s1 + $0x1fc] ss:$28 sps:$4 sm:$0xff]   ;;  %v7152_v60 = vld [vmem:[%s9903_s1 + $0x204] ss:$28 sps:$4 sm:$0xff]  }
  0x6a   :  { %v7148_v57 = vld [vmem:[%s9903_s1 + $0x230] ss:$28 sps:$4 sm:$0xff]   ;;  %v7154_v61 = vld [vmem:[%s9903_s1 + $0x1f8] ss:$28 sps:$4 sm:$0xff]   ;;  %v7155_v62 = vld [vmem:[%s9903_s1 + $0x200] ss:$28 sps:$4 sm:$0xff]  }
  0x6b   :  { %905 = vmatprep.mubr.bf16.mxu0 %v131_v52  ;;  %946 = vmatprep.mubr.bf16.mxu1 %v131_v52  ;;  %v7156_v63 = vld [vmem:[%s9903_s1 + $0x1c4] ss:$28 sps:$4 sm:$0xff]   ;;  %v7158_v0 = vld [vmem:[%s9903_s1 + $0x1cc] ss:$28 sps:$4 sm:$0xff]   ;;  %v7164_v3 = vld [vmem:[%s9903_s1 + $0x19c] ss:$28 sps:$4 sm:$0xff]  }
  0x6c   :  { %884 = vmatpush1.bf16.msra.mxu0 %v7100_v22  ;;  %925 = vmatpush1.bf16.msra.mxu1 %v7101_v23  ;;  %v7160_v1 = vld [vmem:[%s9903_s1 + $0x1c0] ss:$28 sps:$4 sm:$0xff]   ;;  %v7161_v2 = vld [vmem:[%s9903_s1 + $0x1c8] ss:$28 sps:$4 sm:$0xff]   ;;  %v7162_v6 = vld [vmem:[%s9903_s1 + $0x198] ss:$28 sps:$4 sm:$0xff]  }
  0x6d   :  { %885 = vmatprep.subr.bf16.mxu0 %v7102_v24  ;;  %926 = vmatprep.subr.bf16.mxu1 %v7104_v25  ;;  %v7186_v4 = vld [vmem:[%s9903_s1 + $0x360] ss:$28 sps:$4 sm:$0xff]   ;;  %v7191_v9 = vld [vmem:[%s9903_s1 + $0x328] ss:$28 sps:$4 sm:$0xff]   ;;  %v7196_v13 = vld [vmem:[%s9903_s1 + $0x2f0] ss:$28 sps:$4 sm:$0xff]  }
  0x6e   :  { %v7190_v7 = vld [vmem:[%s9903_s1 + $0x1a0] ss:$28 sps:$4 sm:$0xff]   ;;  %v7170_v11 = vld [vmem:[%s9903_s1 + $0x12c] ss:$28 sps:$4 sm:$0xff]   ;;  %v7173_v15 = vld [vmem:[%s9903_s1 + $0xf4] ss:$28 sps:$4 sm:$0xff]  }
  0x6f   :  { %v7167_v8 = vld [vmem:[%s9903_s1 + $0x164] ss:$28 sps:$4 sm:$0xff]   ;;  %v7200_v16 = vld [vmem:[%s9903_s1 + $0x130] ss:$28 sps:$4 sm:$0xff]   ;;  %v7201_v17 = vld [vmem:[%s9903_s1 + $0x2b8] ss:$28 sps:$4 sm:$0xff]  }
  0x70   :  { %886 = vmatpush1.bf16.msra.mxu0 %v7106_v26  ;;  %927 = vmatpush1.bf16.msra.mxu1 %v7107_v27  ;;  %v7165_v10 = vld [vmem:[%s9903_s1 + $0x160] ss:$28 sps:$4 sm:$0xff]   ;;  %v7195_v12 = vld [vmem:[%s9903_s1 + $0x168] ss:$28 sps:$4 sm:$0xff]   ;;  %v7171_v18 = vld [vmem:[%s9903_s1 + $0xf0] ss:$28 sps:$4 sm:$0xff]  }
  0x71   :  { %887 = vmatprep.subr.bf16.mxu0 %v7108_v28  ;;  %928 = vmatprep.subr.bf16.mxu1 %v7110_v29  ;;  %v7168_v14 = vld [vmem:[%s9903_s1 + $0x128] ss:$28 sps:$4 sm:$0xff]   ;;  %v7176_v19 = vld [vmem:[%s9903_s1 + $0xbc] ss:$28 sps:$4 sm:$0xff]   ;;  %v7216_v29 = vld [vmem:[%s9903_s1 + $0x210] ss:$28 sps:$4 sm:$0xff]  }
  0x72   :  { %v7205_v20 = vld [vmem:[%s9903_s1 + $0xf8] ss:$28 sps:$4 sm:$0xff]   ;;  %v7206_v21 = vld [vmem:[%s9903_s1 + $0x280] ss:$28 sps:$4 sm:$0xff]   ;;  %v7211_v25 = vld [vmem:[%s9903_s1 + $0x248] ss:$28 sps:$4 sm:$0xff]  }
  0x73   :  { %v7174_v22 = vld [vmem:[%s9903_s1 + $0xb8] ss:$28 sps:$4 sm:$0xff]   ;;  %v7210_v23 = vld [vmem:[%s9903_s1 + $0xc0] ss:$28 sps:$4 sm:$0xff]   ;;  %v7215_v27 = vld [vmem:[%s9903_s1 + $0x88] ss:$28 sps:$4 sm:$0xff]  }
  0x74   :  { %888 = vmatpush1.bf16.msra.mxu0 %v7112_v30  ;;  %929 = vmatpush1.bf16.msra.mxu1 %v7113_v31  ;;  %v7179_v24 = vld [vmem:[%s9903_s1 + $0x84] ss:$28 sps:$4 sm:$0xff]   ;;  %v7182_v28 = vld [vmem:[%s9903_s1 + $0x4c] ss:$28 sps:$4 sm:$0xff]   ;;  %vm7947_vm0 = vmmov 0   ;;  %vm1134_vm1 = vcmask 130048  }
  0x75   :  { %889 = vmatprep.subr.bf16.mxu0 %v7114_v32  ;;  %930 = vmatprep.subr.bf16.mxu1 %v7116_v33  ;;  %v7177_v26 = vld [vmem:[%s9903_s1 + $0x80] ss:$28 sps:$4 sm:$0xff]   ;;  %v7180_v30 = vld [vmem:[%s9903_s1 + $0x48] ss:$28 sps:$4 sm:$0xff]   ;;  %v7220_v31 = vld [vmem:[%s9903_s1 + $0x50] ss:$28 sps:$4 sm:$0xff]  }
  0x76   :  { %v7185_v32 = vld [vmem:[%s9903_s1 + $0x14] ss:$28 sps:$4 sm:$0xff]   ;;  %v1049_v46 = vld [vmem:[%s9905_s3 + $0x68] sm:$0xff]  ;;  %vm1434_vm2 = vcmask 1043456   ;;  %vm1430_vm3 = vcmask 31744   ;;  %vm5201_vm7 = vcmask 1041408  }
  0x77   :  { %v7221_v33 = vld [vmem:[%s9903_s1 + $0x1d8] ss:$28 sps:$4 sm:$0xff]   ;;  %v7197_v49 = vld [vmem:[%s9903_s1 + $0x2e8] ss:$28 sps:$4 sm:$0xff]   ;;  %vm5213_vm12 = vcmask 123904   ;;  %vm5260_vm13 = vcmask 1041536  }
  0x78   :  { %890 = vmatpush2.bf16.msra.mxu0 %v7118_v34  ;;  %931 = vmatpush2.bf16.msra.mxu1 %v7119_v35  ;;  %v7183_v34 = vld [vmem:[%s9903_s1 + $0x10] ss:$28 sps:$4 sm:$0xff]   ;;  %v7225_v35 = vld [vmem:[%s9903_s1 + $0x18] ss:$28 sps:$4 sm:$0xff]   ;;  %vm5261_vm14 = vcmask 125954   ;;  %s7951_s15 = smov 1  }
  0x79   :  { %891 = vmatprep.subr.bf16.mxu0 %v7120_v36  ;;  %932 = vmatprep.subr.bf16.mxu1 %v7122_v37  ;;  %v7189_v36 = vld [vmem:[%s9903_s1 + $0x35c] ss:$28 sps:$4 sm:$0xff]   ;;  %vm5262_vm15 = vmor %vm5261_vm14, %vm5260_vm13  ;;  %s7952_s16 = smov 27   ;;  %s7953_s17 = smov 127  }
  0x7a   :  { %v1067_v37 = vld [vmem:[%s9905_s3 + $0xf8] sm:$0xff]  ;;  %s7954_s18 = smov 101   ;;  %s7955_s20 = smov 100  }
  0x7b   :  { %s7956_s0 = smov 99  }
  0x7c   :  { %892 = vmatpush2.bf16.msra.mxu0 %v7124_v38  ;;  %933 = vmatpush2.bf16.msra.mxu1 %v7125_v39  ;;  %v7187_v38 = vld [vmem:[%s9903_s1 + $0x358] ss:$28 sps:$4 sm:$0xff]   ;;  %v7194_v39 = vld [vmem:[%s9903_s1 + $0x324] ss:$28 sps:$4 sm:$0xff]  }
  0x7d   :  { %893 = vmatprep.subr.bf16.mxu0 %v7126_v40  ;;  %934 = vmatprep.subr.bf16.mxu1 %v7128_v41  ;;  %v1051_v40 = vld [vmem:[%s9905_s3 + $0x78] sm:$0xff]  ;;  %v1066_v41 = vld [vmem:[%s9905_s3 + $0xf0] sm:$0xff] }
  0x80   :  { %894 = vmatpush2.bf16.msra.mxu0 %v7130_v42  ;;  %935 = vmatpush2.bf16.msra.mxu1 %v7131_v43  ;;  %v1050_v42 = vld [vmem:[%s9905_s3 + $0x70] sm:$0xff]  ;;  %v7192_v43 = vld [vmem:[%s9903_s1 + $0x320] ss:$28 sps:$4 sm:$0xff]  }
  0x81   :  { %895 = vmatprep.subr.bf16.mxu0 %v7132_v44  ;;  %936 = vmatprep.subr.bf16.mxu1 %v7134_v45  ;;  %v1065_v44 = vld [vmem:[%s9905_s3 + $0xe8] sm:$0xff] }
  0x82   :  { %v7199_v45 = vld [vmem:[%s9903_s1 + $0x2ec] ss:$28 sps:$4 sm:$0xff]  }
  0x84   :  { %896 = vmatpush2.bf16.msra.mxu0 %v7136_v47  ;;  %937 = vmatpush2.bf16.msra.mxu1 %v7137_v48  ;;  %v1064_v47 = vld [vmem:[%s9905_s3 + $0xe0] sm:$0xff] }
  0x85   :  { %897 = vmatprep.subr.bf16.mxu0 %v7138_v50  ;;  %938 = vmatprep.subr.bf16.mxu1 %v7140_v51  ;;  %v1048_v48 = vld [vmem:[%s9905_s3 + $0x60] sm:$0xff]  ;;  %v1063_v50 = vld [vmem:[%s9905_s3 + $0xd8] sm:$0xff]  ;;  %v7204_v51 = vld [vmem:[%s9903_s1 + $0x2b4] ss:$28 sps:$4 sm:$0xff]  }
  0x88   :  { %898 = vmatpush2.bf16.msra.mxu0 %v7142_v53  ;;  %939 = vmatpush2.bf16.msra.mxu1 %v7143_v54  ;;  %v1062_v53 = vld [vmem:[%s9905_s3 + $0xd0] sm:$0xff] }
  0x89   :  { %899 = vmatprep.subr.bf16.mxu0 %v7144_v55  ;;  %940 = vmatprep.subr.bf16.mxu1 %v7146_v56  ;;  %v1046_v54 = vld [vmem:[%s9905_s3 + $0x50] sm:$0xff]  ;;  %v1061_v56 = vld [vmem:[%s9905_s3 + $0xc8] sm:$0xff] }
  0x8a   :  { %v7202_v55 = vld [vmem:[%s9903_s1 + $0x2b0] ss:$28 sps:$4 sm:$0xff]  }
  0x8c   :  { %900 = vmatpush2.bf16.msra.mxu0 %v7148_v57  ;;  %941 = vmatpush2.bf16.msra.mxu1 %v7149_v58  ;;  %v7209_v57 = vld [vmem:[%s9903_s1 + $0x27c] ss:$28 sps:$4 sm:$0xff]   ;;  %v1045_v58 = vld [vmem:[%s9905_s3 + $0x48] sm:$0xff] }
  0x8d   :  { %901 = vmatprep.subr.bf16.mxu0 %v7150_v59  ;;  %942 = vmatprep.subr.bf16.mxu1 %v7152_v60  ;;  %v1060_v59 = vld [vmem:[%s9905_s3 + $0xc0] sm:$0xff] }
  0x8e   :  { %v1044_v60 = vld [vmem:[%s9905_s3 + $0x40] sm:$0xff] }
  0x90   :  { %902 = vmatpush2.bf16.msra.mxu0 %v7154_v61  ;;  %943 = vmatpush2.bf16.msra.mxu1 %v7155_v62  ;;  %v7207_v61 = vld [vmem:[%s9903_s1 + $0x278] ss:$28 sps:$4 sm:$0xff]  }
  0x91   :  { %903 = vmatprep.subr.bf16.mxu0 %v7156_v63  ;;  %944 = vmatprep.subr.bf16.mxu1 %v7158_v0  ;;  %v1059_v62 = vld [vmem:[%s9905_s3 + $0xb8] sm:$0xff]  ;;  %v7214_v63 = vld [vmem:[%s9903_s1 + $0x244] ss:$28 sps:$4 sm:$0xff]  }
  0x92   :  { %v1043_v0 = vld [vmem:[%s9905_s3 + $0x38] sm:$0xff] }
  0x94   :  { %904 = vmatpush2.bf16.msra.mxu0 %v7160_v1  ;;  %945 = vmatpush2.bf16.msra.mxu1 %v7161_v2  ;;  %v1058_v1 = vld [vmem:[%s9905_s3 + $0xb0] sm:$0xff] }
  0x95   :  { %955 = vmatprep.subr.bf16.mxu0 %v7164_v3  ;;  %6704 = vmatprep.subr.bf16.mxu1 %v7186_v4  ;;  %v1042_v2 = vld [vmem:[%s9905_s3 + $0x30] sm:$0xff]  ;;  %v7212_v3 = vld [vmem:[%s9903_s1 + $0x240] ss:$28 sps:$4 sm:$0xff]   ;;  %v1057_v4 = vld [vmem:[%s9905_s3 + $0xa8] sm:$0xff] }
  0x97   :  { %906 = vmatmul.mubr.bf16.vlgmr.msra.gmra.mxu0 %v8227_v5  ;;  %947 = vmatmul.mubr.bf16.vlgmr.msra.gmra.mxu1 %v8227_v5 }
  0x98   :  { %956 = vmatpush1.bf16.msra.mxu0 %v7162_v6  ;;  %6705 = vmatpush3.bf16.msra.mxu1 %v7190_v7  ;;  %v7219_v6 = vld [vmem:[%s9903_s1 + $0x20c] ss:$28 sps:$4 sm:$0xff]  }
  0x99   :  { %957 = vmatprep.subr.bf16.mxu0 %v7167_v8  ;;  %6706 = vmatprep.subr.bf16.mxu1 %v7191_v9  ;;  %v1041_v7 = vld [vmem:[%s9905_s3 + $0x28] sm:$0xff]  ;;  %v1056_v8 = vld [vmem:[%s9905_s3 + $0xa0] sm:$0xff] }
  0x9a   :  { %1028 = vmatprep.mubr.bf16.mxu1 %v131_v52  ;;  %987 = vmatprep.mubr.bf16.mxu0 %v131_v52  ;;  %v1047_v52 = vld [vmem:[%s9905_s3 + $0x58] sm:$0xff]  ;;  %v1040_v9 = vld [vmem:[%s9905_s3 + $0x20] sm:$0xff] }
  0x9c   :  { %958 = vmatpush1.bf16.msra.mxu0 %v7165_v10  ;;  %6707 = vmatpush3.bf16.msra.mxu1 %v7195_v12  ;;  %v7217_v10 = vld [vmem:[%s9903_s1 + $0x208] ss:$28 sps:$4 sm:$0xff]   ;;  %v7224_v12 = vld [vmem:[%s9903_s1 + $0x1d4] ss:$28 sps:$4 sm:$0xff]  }
  0x9d   :  { %959 = vmatprep.subr.bf16.mxu0 %v7170_v11  ;;  %6708 = vmatprep.subr.bf16.mxu1 %v7196_v13  ;;  %v1055_v11 = vld [vmem:[%s9905_s3 + $0x98] sm:$0xff] }
  0x9e   :  { %v1039_v13 = vld [vmem:[%s9905_s3 + $0x18] sm:$0xff] }
  0xa0   :  { %960 = vmatpush1.bf16.msra.mxu0 %v7168_v14  ;;  %6709 = vmatpush3.bf16.msra.mxu1 %v7200_v16  ;;  %v7222_v14 = vld [vmem:[%s9903_s1 + $0x1d0] ss:$28 sps:$4 sm:$0xff]   ;;  %v1083_v16 = vld [vmem:[%s9905_s3 + $0x178] sm:$0xff] }
  0xa1   :  { %961 = vmatprep.subr.bf16.mxu0 %v7173_v15  ;;  %6710 = vmatprep.subr.bf16.mxu1 %v7201_v17  ;;  %v1099_v15 = vld [vmem:[%s9905_s3 + $0x1f8] sm:$0xff]  ;;  %v1098_v17 = vld [vmem:[%s9905_s3 + $0x1f0] sm:$0xff] }
  0xa4   :  { %962 = vmatpush1.bf16.msra.mxu0 %v7171_v18  ;;  %6711 = vmatpush3.bf16.msra.mxu1 %v7205_v20  ;;  %v1082_v18 = vld [vmem:[%s9905_s3 + $0x170] sm:$0xff]  ;;  %v1097_v20 = vld [vmem:[%s9905_s3 + $0x1e8] sm:$0xff] }
  0xa5   :  { %963 = vmatprep.subr.bf16.mxu0 %v7176_v19  ;;  %6712 = vmatprep.subr.bf16.mxu1 %v7206_v21  ;;  %v1054_v19 = vld [vmem:[%s9905_s3 + $0x90] sm:$0xff] }
  0xa6   :  { %v1038_v21 = vld [vmem:[%s9905_s3 + $0x10] sm:$0xff] }
  0xa8   :  { %964 = vmatpush1.bf16.msra.mxu0 %v7174_v22  ;;  %6713 = vmatpush3.bf16.msra.mxu1 %v7210_v23  ;;  %v1081_v22 = vld [vmem:[%s9905_s3 + $0x168] sm:$0xff] }
  0xa9   :  { %965 = vmatprep.subr.bf16.mxu0 %v7179_v24  ;;  %6714 = vmatprep.subr.bf16.mxu1 %v7211_v25  ;;  %v1053_v23 = vld [vmem:[%s9905_s3 + $0x88] sm:$0xff]  ;;  %v1080_v25 = vld [vmem:[%s9905_s3 + $0x160] sm:$0xff] }
  0xaa   :  { %v1037_v24 = vld [vmem:[%s9905_s3 + $0x8] sm:$0xff] }
  0xac   :  { %966 = vmatpush1.bf16.msra.mxu0 %v7177_v26  ;;  %6715 = vmatpush3.bf16.msra.mxu1 %v7215_v27  ;;  %v1052_v26 = vld [vmem:[%s9905_s3 + $0x80] sm:$0xff]  ;;  %v1095_v27 = vld [vmem:[%s9905_s3 + $0x1d8] sm:$0xff] }
  0xad   :  { %967 = vmatprep.subr.bf16.mxu0 %v7182_v28  ;;  %6716 = vmatprep.subr.bf16.mxu1 %v7216_v29  ;;  %v1036_v28 = vld [vmem:[%s9905_s3] sm:$0xff]  ;;  %v1079_v29 = vld [vmem:[%s9905_s3 + $0x158] sm:$0xff] }
  0xb0   :  { %968 = vmatpush1.bf16.msra.mxu0 %v7180_v30  ;;  %6717 = vmatpush3.bf16.msra.mxu1 %v7220_v31  ;;  %v1131_v30 = vld [vmem:[%s9905_s3 + $0x2f8] sm:$0xff]  ;;  %v1094_v31 = vld [vmem:[%s9905_s3 + $0x1d0] sm:$0xff] }
  0xb1   :  { %969 = vmatprep.subr.bf16.mxu0 %v7185_v32  ;;  %6718 = vmatprep.subr.bf16.mxu1 %v7221_v33  ;;  %v1078_v32 = vld [vmem:[%s9905_s3 + $0x150] sm:$0xff]  ;;  %v8509_v33 = vld [vmem:[%s9905_s3 + $0x1c8] sm:$0xff] }
  0xb4   :  { %970 = vmatpush1.bf16.msra.mxu0 %v7183_v34  ;;  %6719 = vmatpush3.bf16.msra.mxu1 %v7225_v35  ;;  %v8514_v34 = vld [vmem:[%s9905_s3 + $0x148] sm:$0xff]  ;;  %v8519_v35 = vld [vmem:[%s9905_s3 + $0x1c0] sm:$0xff] }
  0xb5   :  { %971 = vmatprep.subr.bf16.mxu0 %v7189_v36  ;;  %6726 = vmatprep.subr.mxu1 %v1067_v37  ;;  %v8525_v36 = vld [vmem:[%s9905_s3 + $0x140] sm:$0xff]  ;;  %v8531_v37 = vld [vmem:[%s9905_s3 + $0x1b8] sm:$0xff] }
  0xb7   :  { %1029 = vmatmul.mubr.bf16.vlgmr.msra.gmra.mxu1 %v8227_v5 }
  0xb8   :  { %972 = vmatpush2.bf16.msra.mxu0 %v7187_v38  ;;  %6727 = vmatpush3.msra.mxu1 %v1051_v40  ;;  %v8537_v38 = vld [vmem:[%s9905_s3 + $0x138] sm:$0xff]  ;;  %v8549_v40 = vld [vmem:[%s9905_s3 + $0x130] sm:$0xff] }
  0xb9   :  { %973 = vmatprep.subr.bf16.mxu0 %v7194_v39  ;;  %6728 = vmatprep.subr.mxu1 %v1066_v41  ;;  %v8543_v39 = vld [vmem:[%s9905_s3 + $0x1b0] sm:$0xff]  ;;  %v8555_v41 = vld [vmem:[%s9905_s3 + $0x1a8] sm:$0xff] }
  0xba   :  { %6729 = vmatpush3.msra.mxu1 %v1050_v42  ;;  %v8561_v42 = vld [vmem:[%s9905_s3 + $0x128] sm:$0xff] }
  0xbb   :  { %6730 = vmatprep.subr.mxu1 %v1065_v44  ;;  %v8573_v44 = vld [vmem:[%s9905_s3 + $0x120] sm:$0xff] }
  0xbc   :  { %974 = vmatpush2.bf16.msra.mxu0 %v7192_v43  ;;  %6731 = vmatpush3.msra.mxu1 %v1049_v46  ;;  %v8567_v43 = vld [vmem:[%s9905_s3 + $0x1a0] sm:$0xff]  ;;  %v8585_v46 = vld [vmem:[%s9905_s3 + $0x118] sm:$0xff] }
  0xbd   :  { %975 = vmatprep.subr.bf16.mxu0 %v7199_v45  ;;  %6732 = vmatprep.subr.mxu1 %v1064_v47  ;;  %v8579_v45 = vld [vmem:[%s9905_s3 + $0x198] sm:$0xff]  ;;  %v8591_v47 = vld [vmem:[%s9905_s3 + $0x190] sm:$0xff] }
  0xbe   :  { %6733 = vmatpush3.msra.mxu1 %v1048_v48  ;;  %v8597_v48 = vld [vmem:[%s9905_s3 + $0x110] sm:$0xff] }
  0xbf   :  { %6734 = vmatprep.subr.mxu1 %v1063_v50  ;;  %v8609_v50 = vld [vmem:[%s9905_s3 + $0x108] sm:$0xff] }
  0xc0   :  { %976 = vmatpush2.bf16.msra.mxu0 %v7197_v49  ;;  %6735 = vmatpush3.msra.mxu1 %v1047_v52  ;;  %v8603_v49 = vld [vmem:[%s9905_s3 + $0x188] sm:$0xff]  ;;  %v8621_v52 = vld [vmem:[%s9905_s3 + $0x100] sm:$0xff] }
  0xc1   :  { %977 = vmatprep.subr.bf16.mxu0 %v7204_v51  ;;  %6736 = vmatprep.subr.mxu1 %v1062_v53  ;;  %v8615_v51 = vld [vmem:[%s9905_s3 + $0x180] sm:$0xff]  ;;  %v9912_v53 = vmov 0.0  }
  0xc2   :  { %6737 = vmatpush3.msra.mxu1 %v1046_v54  ;;  %5259 = vst [vmem:[#allocation2] sm:$0x3] %v9912_v53  ;;  %v262_v54 = vlaneseq }
  0xc3   :  { %6738 = vmatprep.subr.mxu1 %v1061_v56 }
  0xc4   :  { %978 = vmatpush2.bf16.msra.mxu0 %v7202_v55  ;;  %6739 = vmatpush3.msra.mxu1 %v1045_v58  ;;  %v8627_v55 = vshrl.u32 %v262_v54, 7  ;;  %v8785_v54 = vld [vmem:[%s9905_s3 + $0x228] sm:$0xff] }
  0xc5   :  { %979 = vmatprep.subr.bf16.mxu0 %v7209_v57  ;;  %6740 = vmatprep.subr.mxu1 %v1060_v59  ;;  %v8638_v59 = vld [vmem:[#allocation5] sm:$0x7f]  ;;  %9978 = vst [vmem:[#allocation29_spill] sm:$0xff] %v8785_v54 }
  0xc6   :  { %6741 = vmatpush3.msra.mxu1 %v1044_v60  ;;  %9967 = vst [vmem:[#allocation18_spill] sm:$0xff] %v8627_v55  ;;  %v8630_v56 = vsub.s32 2, %v8627_v55  ;;  %v8633_v57 = vsub.s32 1, %v8627_v55  ;;  %v8636_v58 = vsub.s32 3, %v8627_v55  ;;  %v8641_v60 = vsub.s32 0, %v8627_v55 }
  0xc7   :  { %6742 = vmatprep.subr.mxu1 %v1059_v62 }
  0xc8   :  { %980 = vmatpush2.bf16.msra.mxu0 %v7207_v61  ;;  %6743 = vmatpush3.msra.mxu1 %v1043_v0  ;;  %9968 = vst [vmem:[#allocation19_spill] sm:$0xff] %v8630_v56  ;;  %9969 = vst [vmem:[#allocation20_spill] sm:$0xff] %v8633_v57  ;;  %v273_v61 = vrot.slane %v8638_v59, %v8630_v56  ;;  %v269_v62 = vrot.slane %v8638_v59, %v8633_v57  ;;  %v9989_v56 = vmov 0.0   ;;  %v8852_v57 = vsub.s32 5, %v8627_v55 }
  0xc9   :  { %981 = vmatprep.subr.bf16.mxu0 %v7214_v63  ;;  %6744 = vmatprep.subr.mxu1 %v1058_v1  ;;  %9970 = vst [vmem:[#allocation21_spill] sm:$0xff] %v8636_v58  ;;  %9971 = vst [vmem:[#allocation22_spill] sm:$0xff] %v8641_v60  ;;  %v277_v63 = vrot.slane %v8638_v59, %v8636_v58  ;;  %v265_v0 = vrot.slane %v8638_v59, %v8641_v60  ;;  %v8855_v60 = vsub.s32 4, %v8627_v55 }
  0xca   :  { %6745 = vmatpush3.msra.mxu1 %v1042_v2  ;;  %9990 = vst [vmem:[#allocation40_spill] sm:$0xff] %v8852_v57  ;;  %5263 = vst.msk [vmem:[#allocation2 + $0xe] sm:$0xf] %vm5262_vm15, %v9989_v56 }
  0xcb   :  { %6746 = vmatprep.subr.mxu1 %v1057_v4  ;;  %9991 = vst [vmem:[#allocation41_spill] sm:$0xff] %v8855_v60 }
  0xcc   :  { %982 = vmatpush2.bf16.msra.mxu0 %v7212_v3  ;;  %6747 = vmatpush3.msra.mxu1 %v1041_v7 }
  0xcd   :  { %983 = vmatprep.subr.bf16.mxu0 %v7219_v6  ;;  %6748 = vmatprep.subr.mxu1 %v1056_v8 }
  0xce   :  { %6749 = vmatpush3.msra.mxu1 %v1040_v9 }
  0xcf   :  { %6750 = vmatprep.subr.mxu1 %v1055_v11 }
  0xd0   :  { %984 = vmatpush2.bf16.msra.mxu0 %v7217_v10  ;;  %6751 = vmatpush3.msra.mxu1 %v1039_v13  ;;  %v8669_v13 = vld [vmem:[%s9905_s3 + $0x2f0] sm:$0xff] }
  0xd1   :  { %985 = vmatprep.subr.bf16.mxu0 %v7224_v12  ;;  %6752 = vmatprep.subr.mxu1 %v1054_v19  ;;  %v8662_v12 = vld [vmem:[%s9905_s3 + $0x278] sm:$0xff]  ;;  %v8695_v19 = vld [vmem:[%s9905_s3 + $0x2e0] sm:$0xff] }
  0xd2   :  { %6753 = vmatpush3.msra.mxu1 %v1038_v21  ;;  %v8707_v21 = vld [vmem:[%s9905_s3 + $0x2d8] sm:$0xff] }
  0xd3   :  { %6754 = vmatprep.subr.mxu1 %v1053_v23  ;;  %v8719_v23 = vld [vmem:[%s9905_s3 + $0x2d0] sm:$0xff] }
  0xd4   :  { %986 = vmatpush2.bf16.msra.mxu0 %v7222_v14  ;;  %6755 = vmatpush3.msra.mxu1 %v1037_v24  ;;  %v8731_v24 = vld [vmem:[%s9905_s3 + $0x2c8] sm:$0xff] }
  0xd5   :  { %6761 = vmatprep.subr.mxu0 %v1099_v15  ;;  %6756 = vmatprep.subr.mxu1 %v1052_v26  ;;  %v8743_v26 = vld [vmem:[%s9905_s3 + $0x2c0] sm:$0xff] }
  0xd6   :  { %6757 = vmatpush3.msra.mxu1 %v1036_v28  ;;  %v8755_v28 = vld [vmem:[%s9905_s3 + $0x2b8] sm:$0xff] }
  0xd7   :  { %988 = vmatmul.mubr.bf16.vlgmr.msra.gmra.mxu0 %v8227_v5  ;;  %v1096_v5 = vld [vmem:[%s9905_s3 + $0x1e0] sm:$0xff]  ;;  %6796 = vmatprep.subr.mxu1 %v1131_v30  ;;  %9973 = vst [vmem:[#allocation24_spill] sm:$0xff] %v8755_v28  ;;  %v8767_v30 = vld [vmem:[%s9905_s3 + $0x2b0] sm:$0xff] }
  0xd8   :  { %6762 = vmatpush3.msra.mxu0 %v1083_v16  ;;  %v8676_v16 = vld [vmem:[%s9905_s3 + $0x270] sm:$0xff]  ;;  %9975 = vst [vmem:[#allocation26_spill] sm:$0xff] %v8767_v30 }
  0xd9   :  { %6763 = vmatprep.subr.mxu0 %v1098_v17  ;;  %v8682_v17 = vld [vmem:[%s9905_s3 + $0x2e8] sm:$0xff] }
  0xda   :  { %6764 = vmatpush3.msra.mxu0 %v1082_v18  ;;  %v8689_v18 = vld [vmem:[%s9905_s3 + $0x268] sm:$0xff] }
  0xdb   :  { %6765 = vmatprep.subr.mxu0 %v1097_v20  ;;  %v8701_v20 = vld [vmem:[%s9905_s3 + $0x260] sm:$0xff] }
  0xdc   :  { %6766 = vmatpush3.msra.mxu0 %v1081_v22  ;;  %v8713_v22 = vld [vmem:[%s9905_s3 + $0x258] sm:$0xff] }
  0xdd   :  { %6767 = vmatprep.subr.mxu0 %v1096_v5  ;;  %v8725_v5 = vld [vmem:[%s9905_s3 + $0x250] sm:$0xff] }
  0xde   :  { %6768 = vmatpush3.msra.mxu0 %v1080_v25  ;;  %v8737_v25 = vld [vmem:[%s9905_s3 + $0x248] sm:$0xff] }
  0xdf   :  { %6769 = vmatprep.subr.mxu0 %v1095_v27  ;;  %v8749_v27 = vld [vmem:[%s9905_s3 + $0x240] sm:$0xff] }
  0xe0   :  { %6770 = vmatpush3.msra.mxu0 %v1079_v29  ;;  %9972 = vst [vmem:[#allocation23_spill] sm:$0xff] %v8749_v27  ;;  %v8761_v29 = vld [vmem:[%s9905_s3 + $0x238] sm:$0xff] }
  0xe1   :  { %6771 = vmatprep.subr.mxu0 %v1094_v31  ;;  %9974 = vst [vmem:[#allocation25_spill] sm:$0xff] %v8761_v29  ;;  %v8773_v31 = vld [vmem:[%s9905_s3 + $0x230] sm:$0xff] }
  0xe2   :  { %6772 = vmatpush3.msra.mxu0 %v1078_v32  ;;  %9976 = vst [vmem:[#allocation27_spill] sm:$0xff] %v8773_v31  ;;  %v8779_v32 = vld [vmem:[%s9905_s3 + $0x2a8] sm:$0xff] }
  0xe3   :  { %6773 = vmatprep.subr.mxu0 %v8509_v33  ;;  %9977 = vst [vmem:[#allocation28_spill] sm:$0xff] %v8779_v32 }
  0xe4   :  { %6774 = vmatpush3.msra.mxu0 %v8514_v34 }
  0xe5   :  { %6775 = vmatprep.subr.mxu0 %v8519_v35 }
  0xe6   :  { %6776 = vmatpush3.msra.mxu0 %v8525_v36 }
  0xe7   :  { %6777 = vmatprep.subr.mxu0 %v8531_v37 }
  0xe8   :  { %6778 = vmatpush3.msra.mxu0 %v8537_v38 }
  0xe9   :  { %6779 = vmatprep.subr.mxu0 %v8543_v39 }
  0xea   :  { %6780 = vmatpush3.msra.mxu0 %v8549_v40 }
  0xeb   :  { %6781 = vmatprep.subr.mxu0 %v8555_v41 }
  0xec   :  { %6782 = vmatpush3.msra.mxu0 %v8561_v42 }
  0xed   :  { %6783 = vmatprep.subr.mxu0 %v8567_v43 }
  0xee   :  { %6784 = vmatpush3.msra.mxu0 %v8573_v44 }
  0xef   :  { %6785 = vmatprep.subr.mxu0 %v8579_v45 }
  0xf0   :  { %6786 = vmatpush3.msra.mxu0 %v8585_v46 }
  0xf1   :  { %6787 = vmatprep.subr.mxu0 %v8591_v47 }
  0xf2   :  { %6788 = vmatpush3.msra.mxu0 %v8597_v48 }
  0xf3   :  { %6789 = vmatprep.subr.mxu0 %v8603_v49 }
  0xf4   :  { %6790 = vmatpush3.msra.mxu0 %v8609_v50 }
  0xf5   :  { %6791 = vmatprep.subr.mxu0 %v8615_v51 }
  0xf6   :  { %6792 = vmatpush3.msra.mxu0 %v8621_v52 }
 0x157   :  { %v907_v1 = vpop.f32.mrf.mxu0  ;;  %v948_v2 = vpop.f32.mrf.mxu1 }
 0x158   :  { %v8651_v3 = vadd.f32 %v948_v2, %v273_v61  ;;  %v8657_v9 = vadd.f32 %v907_v1, %v265_v0  ;;  %v8791_v61 = vld [vmem:[%s9905_s3 + $0x2a0] sm:$0xff]  ;;  %v8809_v0 = vld [vmem:[%s9905_s3 + $0x218] sm:$0xff]  ;;  %v8815_v1 = vld [vmem:[%s9905_s3 + $0x290] sm:$0xff] }
 0x159   :  { %v909_v4 = vpop.f32.mrf.mxu0  ;;  %v950_v6 = vpop.f32.mrf.mxu1  ;;  %9979 = vst [vmem:[#allocation30_spill] sm:$0xff] %v8791_v61  ;;  %9982 = vst [vmem:[#allocation33_spill] sm:$0xff] %v8809_v0  ;;  %v8821_v2 = vld [vmem:[%s9905_s3 + $0x210] sm:$0xff] }
 0x15a   :  { %v8653_v7 = vadd.f32 %v909_v4, %v269_v62  ;;  %v8655_v8 = vadd.f32 %v950_v6, %v277_v63  ;;  %v8797_v62 = vld [vmem:[%s9905_s3 + $0x220] sm:$0xff]  ;;  %v8803_v63 = vld [vmem:[%s9905_s3 + $0x298] sm:$0xff]  ;;  %9983 = vst [vmem:[#allocation34_spill] sm:$0xff] %v8815_v1  ;;  %9984 = vst [vmem:[#allocation35_spill] sm:$0xff] %v8821_v2 }
 0x15b   :  { %v911_v10 = vpop.f32.mrf.mxu0  ;;  %v952_v11 = vpop.f32.mrf.mxu1  ;;  %9980 = vst [vmem:[#allocation31_spill] sm:$0xff] %v8797_v62  ;;  %9981 = vst [vmem:[#allocation32_spill] sm:$0xff] %v8803_v63  ;;  %v8827_v4 = vld [vmem:[%s9905_s3 + $0x288] sm:$0xff] }
 0x15c   :  { %1202 = vmatprep.mubr.f32.mxu1 %v8653_v7  ;;  %1272 = vmatprep.mubr.f32.mxu0 %v8655_v8  ;;  %9985 = vst [vmem:[#allocation36_spill] sm:$0xff] %v8827_v4  ;;  %v8833_v10 = vld [vmem:[%s9905_s3 + $0x208] sm:$0xff]  ;;  %v8839_v11 = vld [vmem:[%s9905_s3 + $0x280] sm:$0xff] }
 0x15d   :  { %v912_v14 = vpop.f32.mrf.mxu0  ;;  %1203 = vmatmul.mubr.f32.vlgmr.msra.gmra.mxu1 %v8657_v9  ;;  %1273 = vmatmul.mubr.f32.vlgmr.msra.gmra.mxu0 %v8651_v3  ;;  %v953_v15 = vpop.f32.mrf.mxu1  ;;  %9986 = vst [vmem:[#allocation37_spill] sm:$0xff] %v8833_v10  ;;  %9987 = vst [vmem:[#allocation38_spill] sm:$0xff] %v8839_v11 }
 0x15e   :  { %6797 = vmatpush3.msra.mxu1 %v8662_v12  ;;  %1584 = vmatprep.mubr.f32.mxu0 %v9912_v53  ;;  %v8845_v15 = vld [vmem:[%s9905_s3 + $0x200] sm:$0xff] }
 0x15f   :  { %6798 = vmatprep.subr.mxu1 %v8669_v13  ;;  %9988 = vst [vmem:[#allocation39_spill] sm:$0xff] %v8845_v15 }
 0x160   :  { %6799 = vmatpush3.msra.mxu1 %v8676_v16 }
 0x161   :  { %6800 = vmatprep.subr.mxu1 %v8682_v17 }
 0x162   :  { %6801 = vmatpush3.msra.mxu1 %v8689_v18 }
 0x163   :  { %6802 = vmatprep.subr.mxu1 %v8695_v19 }
 0x164   :  { %6803 = vmatpush3.msra.mxu1 %v8701_v20 }
 0x165   :  { %6804 = vmatprep.subr.mxu1 %v8707_v21 }
 0x166   :  { %6805 = vmatpush3.msra.mxu1 %v8713_v22 }
 0x167   :  { %6806 = vmatprep.subr.mxu1 %v8719_v23 }
 0x168   :  { %6807 = vmatpush3.msra.mxu1 %v8725_v5 }
 0x169   :  { %6808 = vmatprep.subr.mxu1 %v8731_v24 }
 0x16a   :  { %6809 = vmatpush3.msra.mxu1 %v8737_v25 }
 0x16b   :  { %6810 = vmatprep.subr.mxu1 %v8743_v26 }
 0x16c   :  { %6811 = vmatpush3.msra.mxu1 %v8749_v27  ;;  %v8921_v27 = vld [vmem:[#allocation7 + $0x18] sm:$0xf] }
 0x16d   :  { %6812 = vmatprep.subr.mxu1 %v8755_v28 }
 0x16e   :  { %6813 = vmatpush3.msra.mxu1 %v8761_v29 }
 0x16f   :  { %6814 = vmatprep.subr.mxu1 %v8767_v30 }
 0x170   :  { %6815 = vmatpush3.msra.mxu1 %v8773_v31 }
 0x171   :  { %6816 = vmatprep.subr.mxu1 %v8779_v32 }
 0x172   :  { %6817 = vmatpush3.msra.mxu1 %v8785_v54 }
 0x173   :  { %6818 = vmatprep.subr.mxu1 %v8791_v61 }
 0x174   :  { %6819 = vmatpush3.msra.mxu1 %v8797_v62 }
 0x175   :  { %6820 = vmatprep.subr.mxu1 %v8803_v63 }
 0x176   :  { %6821 = vmatpush3.msra.mxu1 %v8809_v0 }
 0x177   :  { %v6720_v6 = vpop.f32.mrf.mxu1  ;;  %6822 = vmatprep.subr.mxu1 %v8815_v1 }
 0x178   :  { %6823 = vmatpush3.msra.mxu1 %v8821_v2 }
 0x179   :  { %v6721_v14 = vpop.f32.mrf.mxu1  ;;  %6824 = vmatprep.subr.mxu1 %v8827_v4  ;;  %v8858_v4 = vsub.s32 6, %v8627_v55  ;;  %v8873_v55 = vld [vmem:[%s9905_s3 + $0x308] sm:$0xff] }
 0x17a   :  { %6825 = vmatpush3.msra.mxu1 %v8833_v10  ;;  %v285_v10 = vrot.slane %v8638_v59, %v8852_v57 }
 0x17b   :  { %v6723_v53 = vpop.f32.mrf.mxu1  ;;  %6826 = vmatprep.subr.mxu1 %v8839_v11  ;;  %9992 = vst [vmem:[#allocation42_spill] sm:$0xff] %v8858_v4 }
 0x17c   :  { %6827 = vmatpush3.msra.mxu1 %v8845_v15  ;;  %v281_v53 = vrot.slane %v8638_v59, %v8855_v60  ;;  %v6722_v15 = vadd.f32 %v6721_v14, %v6720_v6 }
 0x17d   :  { %v6724_v58 = vpop.f32.mrf.mxu1  ;;  %7014 = vmatprep.subr.mxu1 %v9989_v56 }
 0x17e   :  { %v289_v58 = vrot.slane %v8638_v59, %v8858_v4  ;;  %v8882_v59 = vld [vmem:[%s9905_s3 + $0x300] sm:$0xff] }
 0x180   :  { %v8876_v57 = vadd.f32 %v6722_v15, %v289_v58 }
 0x197   :  { %v989_v11 = vpop.f32.mrf.mxu0 }
 0x198   :  { %v8868_v0 = vadd.f32 %v989_v11, %v281_v53 }
 0x199   :  { %v991_v2 = vpop.f32.mrf.mxu0 }
 0x19a   :  { %v8866_v1 = vadd.f32 %v991_v2, %v285_v10  ;;  %9993 = vst [vmem:[#allocation43_spill] sm:$0xff] %v8868_v0  ;;  %v8912_v10 = vld [vmem:[#allocation7 + $0x10] sm:$0xff] }
 0x19b   :  { %v993_v63 = vpop.f32.mrf.mxu0  ;;  %v8916_v11 = vcombine.high %v8912_v10, %v8912_v10 }
 0x19c   :  { %1342 = vmatprep.mubr.f32.mxu1 %v8866_v1  ;;  %v8894_v63 = vld [vmem:[#allocation7 + $0x8] sm:$0xff] }
 0x19d   :  { %v994_v60 = vpop.f32.mrf.mxu0  ;;  %1343 = vmatmul.mubr.f32.vlgmr.msra.gmra.mxu1 %v8868_v0  ;;  %9994 = vst [vmem:[#allocation44_spill] sm:$0xff] %v8894_v63  ;;  %v8902_v6 = vcombine.high %v8894_v63, %v8894_v63 }
 0x19e   :  { %7015 = vmatpush3.msra.mxu1 %v8873_v55  ;;  %7018 = vmatprep.mubr.msk.f32.mxu1 %vm7947_vm0, %v9989_v56  ;;  %v8892_v60 = vld [vmem:[#allocation7] sm:$0xff] }
 0x19f   :  { %7016 = vmatprep.subr.mxu1 %v9989_v56  ;;  %v8898_v2 = vcombine.high %v8892_v60, %v8892_v60  ;;  %6337 = vmatprep.subr.msk.mxu0 %vm1434_vm2, %v8902_v6 }
 0x1a0   :  { %7017 = vmatpush3.msra.mxu1 %v8882_v59  ;;  %6338 = vmatpush1.msk.msra.mxu0 %vm1434_vm2, %v8894_v63 }
 0x1a1   :  { %7019 = vmatmul.mubr.msk.f32.vlgmr.msra.gmra.mxu1 %vm1134_vm1, %v8876_v57  ;;  %6334 = vmatprep.subr.msk.mxu1 %vm1434_vm2, %v8898_v2 }
 0x1a2   :  { %1513 = vmatprep.mubr.f32.mxu1 %v9989_v56  ;;  %6335 = vmatpush1.msk.msra.mxu1 %vm1434_vm2, %v8892_v60 }
 0x1a3   :  { %7021 = vmatprep.subr.mxu0 %v9989_v56  ;;  %6340 = vmatprep.subr.msk.mxu1 %vm1434_vm2, %v8916_v11 }
 0x21d   :  { %v6758_v14 = vpop.f32.mrf.mxu1  ;;  %v6793_v15 = vpop.f32.mrf.mxu0 }
 0x21f   :  { %v6759_v53 = vpop.f32.mrf.mxu1  ;;  %v6794_v58 = vpop.f32.mrf.mxu0 }
 0x220   :  { %v6760_v4 = vadd.f32 %v6759_v53, %v6758_v14  ;;  %v6795_v0 = vadd.f32 %v6794_v58, %v6793_v15  ;;  %v7752_v14 = vld [vmem:[%s9905_s3 + $0x168] sm:$0xff]  ;;  %v7753_v15 = vld [vmem:[%s9905_s3 + $0xe0] sm:$0xff] }
 0x221   :  { %v7754_v53 = vld [vmem:[%s9905_s3 + $0x1e0] sm:$0xff] }
 0x222   :  { %v1275_v63 = vadd.f32 %v6795_v0, %v6760_v4  ;;  %v7749_v0 = vld [vmem:[%s9905_s3 + $0xe8] sm:$0xff]  ;;  %v7755_v58 = vld [vmem:[%s9905_s3 + $0x60] sm:$0xff] }
 0x223   :  { %v7750_v4 = vld [vmem:[%s9905_s3 + $0x1e8] sm:$0xff] }
 0x25d   :  { %v6828_v62 = vpop.f32.mrf.mxu1 }
 0x25f   :  { %v6829_v61 = vpop.f32.mrf.mxu1 }
 0x260   :  { %v6830_v54 = vadd.f32 %v6829_v61, %v6828_v62  ;;  %v7746_v61 = vld [vmem:[%s9905_s3 + $0x1f0] sm:$0xff] }
 0x261   :  { %v1414_v32 = vpop.f32.mrf.mxu1  ;;  %v7748_v62 = vld [vmem:[%s9905_s3 + $0x170] sm:$0xff] }
 0x262   :  { %v1345_v31 = vadd.f32 %v6830_v54, %v1275_v63  ;;  %v7745_v54 = vld [vmem:[%s9905_s3 + $0xf0] sm:$0xff]  ;;  %v7751_v63 = vld [vmem:[%s9905_s3 + $0x68] sm:$0xff] }
 0x263   :  { %v7020_v30 = vpop.f32.mrf.mxu1 }
 0x264   :  { %v1415_v29 = vadd.f32 %v1414_v32, %v1345_v31  ;;  %v7742_v30 = vld [vmem:[%s9905_s3 + $0x1f8] sm:$0xff] }
 0x265   :  { %v7743_v31 = vld [vmem:[%s9905_s3 + $0x78] sm:$0xff] }
 0x266   :  { %v1418_v28 = vmul.f32 0.0051020407, %v1415_v29  ;;  %v7741_v29 = vld [vmem:[%s9905_s3 + $0xf8] sm:$0xff] }
 0x267   :  { %v7744_v32 = vld [vmem:[%s9905_s3 + $0x178] sm:$0xff] }
 0x268   :  { %6336 = vmatmul.mubr.msk.f32.vlgmr.msra.gmra.mxu1 %vm1430_vm3, %v1418_v28  ;;  %6339 = vmatmul.mubr.msk.f32.vlgmr.msra.gmra.mxu0 %vm1430_vm3, %v1418_v28 }
 0x269   :  { %6341 = vmatpush1.msk.msra.mxu1 %vm1434_vm2, %v8912_v10  ;;  %1655 = vmatprep.mubr.f32.mxu1 %v9989_v56 }
 0x26a   :  { %7022 = vmatpush3.msk.msra.mxu0 %vm1434_vm2, %v8921_v27  ;;  %7023 = vmatprep.mubr.msk.f32.mxu0 %vm7947_vm0, %v9989_v56 }
 0x26b   :  { %6836 = vmatprep.subr.mxu1 %v7741_v29  ;;  %6871 = vmatprep.subr.mxu0 %v7742_v30  ;;  %v7756_v29 = vld [vmem:[%s9905_s3 + $0x160] sm:$0xff]  ;;  %v7757_v30 = vld [vmem:[%s9905_s3 + $0xd8] sm:$0xff] }
 0x26c   :  { %6342 = vmatmul.mubr.msk.f32.vlgmr.msra.gmra.mxu1 %vm1430_vm3, %v1418_v28  ;;  %7024 = vmatmul.mubr.msk.f32.vlgmr.msra.gmra.mxu0 %vm1430_vm3, %v1418_v28  ;;  %v7747_v28 = vld [vmem:[%s9905_s3 + $0x70] sm:$0xff] }
 0x26d   :  { %6837 = vmatpush3.msra.mxu1 %v7743_v31  ;;  %6872 = vmatpush3.msra.mxu0 %v7744_v32  ;;  %v7758_v31 = vld [vmem:[%s9905_s3 + $0x1d8] sm:$0xff] }
 0x26e   :  { %6838 = vmatprep.subr.mxu1 %v7745_v54  ;;  %6873 = vmatprep.subr.mxu0 %v7746_v61  ;;  %v7759_v32 = vld [vmem:[%s9905_s3 + $0x58] sm:$0xff]  ;;  %v7761_v61 = vld [vmem:[%s9905_s3 + $0xd0] sm:$0xff] }
 0x26f   :  { %6839 = vmatpush3.msra.mxu1 %v7747_v28  ;;  %6874 = vmatpush3.msra.mxu0 %v7748_v62  ;;  %v7760_v54 = vld [vmem:[%s9905_s3 + $0x158] sm:$0xff]  ;;  %v7762_v28 = vld [vmem:[%s9905_s3 + $0x1d0] sm:$0xff] }
 0x270   :  { %6840 = vmatprep.subr.mxu1 %v7749_v0  ;;  %6875 = vmatprep.subr.mxu0 %v7750_v4  ;;  %v7763_v62 = vld [vmem:[%s9905_s3 + $0x50] sm:$0xff]  ;;  %v7765_v4 = vld [vmem:[%s9905_s3 + $0xc8] sm:$0xff] }
 0x271   :  { %6841 = vmatpush3.msra.mxu1 %v7751_v63  ;;  %6876 = vmatpush3.msra.mxu0 %v7752_v14  ;;  %v7764_v0 = vld [vmem:[%s9905_s3 + $0x150] sm:$0xff]  ;;  %v7766_v63 = vld [vmem:[%s9905_s3 + $0x48] sm:$0xff]  ;;  %v7767_v14 = vld [vmem:[%s9905_s3 + $0xc0] sm:$0xff] }
 0x272   :  { %6842 = vmatprep.subr.mxu1 %v7753_v15  ;;  %6877 = vmatprep.subr.mxu0 %v7754_v53  ;;  %v7768_v15 = vld [vmem:[%s9905_s3 + $0x40] sm:$0xff] }
 0x273   :  { %6843 = vmatpush3.msra.mxu1 %v7755_v58  ;;  %6878 = vmatpush3.msra.mxu0 %v7756_v29 }
 0x274   :  { %6844 = vmatprep.subr.mxu1 %v7757_v30  ;;  %6879 = vmatprep.subr.mxu0 %v7758_v31 }
 0x275   :  { %6845 = vmatpush3.msra.mxu1 %v7759_v32  ;;  %6880 = vmatpush3.msra.mxu0 %v7760_v54 }
 0x276   :  { %6846 = vmatprep.subr.mxu1 %v7761_v61  ;;  %6881 = vmatprep.subr.mxu0 %v7762_v28 }
 0x277   :  { %6847 = vmatpush3.msra.mxu1 %v7763_v62  ;;  %6882 = vmatpush3.msra.mxu0 %v7764_v0 }
 0x278   :  { %6848 = vmatprep.subr.mxu1 %v7765_v4  ;;  %6883 = vmatprep.subr.mxu0 %v8509_v33  ;;  %v7769_v33 = vld [vmem:[%s9905_s3 + $0xb8] sm:$0xff] }
 0x279   :  { %6849 = vmatpush3.msra.mxu1 %v7766_v63  ;;  %6884 = vmatpush3.msra.mxu0 %v8514_v34  ;;  %v7770_v34 = vld [vmem:[%s9905_s3 + $0x38] sm:$0xff] }
 0x27a   :  { %6850 = vmatprep.subr.mxu1 %v7767_v14  ;;  %6885 = vmatprep.subr.mxu0 %v8519_v35  ;;  %v7771_v35 = vld [vmem:[%s9905_s3 + $0xb0] sm:$0xff]  ;;  %v7235_v63 = vld [vmem:[#allocation8 + $0x508] ss:$28 sps:$4 sm:$0xff]  }
 0x27b   :  { %6851 = vmatpush3.msra.mxu1 %v7768_v15  ;;  %6886 = vmatpush3.msra.mxu0 %v8525_v36  ;;  %v7772_v36 = vld [vmem:[%s9905_s3 + $0x30] sm:$0xff]  ;;  %v7237_v14 = vld [vmem:[#allocation8 + $0x50c] ss:$28 sps:$4 sm:$0xff]  }
 0x27c   :  { %6852 = vmatprep.subr.mxu1 %v7769_v33  ;;  %6887 = vmatprep.subr.mxu0 %v8531_v37  ;;  %v7773_v37 = vld [vmem:[%s9905_s3 + $0xa8] sm:$0xff] }
 0x27d   :  { %6853 = vmatpush3.msra.mxu1 %v7770_v34  ;;  %6888 = vmatpush3.msra.mxu0 %v8537_v38  ;;  %v7774_v38 = vld [vmem:[%s9905_s3 + $0x28] sm:$0xff] }
 0x27e   :  { %6854 = vmatprep.subr.mxu1 %v7771_v35  ;;  %6889 = vmatprep.subr.mxu0 %v8543_v39  ;;  %v7775_v39 = vld [vmem:[%s9905_s3 + $0xa0] sm:$0xff]  ;;  %v7243_v33 = vld [vmem:[#allocation8 + $0x4d4] ss:$28 sps:$4 sm:$0xff]   ;;  %v7249_v35 = vld [vmem:[#allocation8 + $0x49c] ss:$28 sps:$4 sm:$0xff]  }
 0x27f   :  { %6855 = vmatpush3.msra.mxu1 %v7772_v36  ;;  %6890 = vmatpush3.msra.mxu0 %v8549_v40  ;;  %v7776_v40 = vld [vmem:[%s9905_s3 + $0x20] sm:$0xff]  ;;  %v7247_v34 = vld [vmem:[#allocation8 + $0x498] ss:$28 sps:$4 sm:$0xff]   ;;  %v7253_v36 = vld [vmem:[#allocation8 + $0x460] ss:$28 sps:$4 sm:$0xff]  }
 0x280   :  { %6856 = vmatprep.subr.mxu1 %v7773_v37  ;;  %6891 = vmatprep.subr.mxu0 %v8555_v41  ;;  %v7777_v41 = vld [vmem:[%s9905_s3 + $0x98] sm:$0xff]  ;;  %v7241_v15 = vld [vmem:[#allocation8 + $0x4d0] ss:$28 sps:$4 sm:$0xff]  }
 0x281   :  { %6857 = vmatpush3.msra.mxu1 %v7774_v38  ;;  %6892 = vmatpush3.msra.mxu0 %v8561_v42  ;;  %v7778_v42 = vld [vmem:[%s9905_s3 + $0x18] sm:$0xff] }
 0x282   :  { %6858 = vmatprep.subr.mxu1 %v7775_v39  ;;  %6893 = vmatprep.subr.mxu0 %v8567_v43  ;;  %v7779_v43 = vld [vmem:[%s9905_s3 + $0x90] sm:$0xff]  ;;  %v7255_v37 = vld [vmem:[#allocation8 + $0x464] ss:$28 sps:$4 sm:$0xff]   ;;  %v7261_v39 = vld [vmem:[#allocation8 + $0x42c] ss:$28 sps:$4 sm:$0xff]  }
 0x283   :  { %6859 = vmatpush3.msra.mxu1 %v7776_v40  ;;  %6894 = vmatpush3.msra.mxu0 %v8573_v44  ;;  %v7780_v44 = vld [vmem:[%s9905_s3 + $0x10] sm:$0xff]  ;;  %v7259_v38 = vld [vmem:[#allocation8 + $0x428] ss:$28 sps:$4 sm:$0xff]   ;;  %v7265_v40 = vld [vmem:[#allocation8 + $0x3f0] ss:$28 sps:$4 sm:$0xff]  }
 0x284   :  { %6860 = vmatprep.subr.mxu1 %v7777_v41  ;;  %6895 = vmatprep.subr.mxu0 %v8579_v45  ;;  %v7781_v45 = vld [vmem:[%s9905_s3 + $0x88] sm:$0xff] }
 0x285   :  { %6861 = vmatpush3.msra.mxu1 %v7778_v42  ;;  %6896 = vmatpush3.msra.mxu0 %v8585_v46  ;;  %v7782_v46 = vld [vmem:[%s9905_s3 + $0x8] sm:$0xff] }
 0x286   :  { %6862 = vmatprep.subr.mxu1 %v7779_v43  ;;  %6897 = vmatprep.subr.mxu0 %v8591_v47  ;;  %v7783_v47 = vld [vmem:[%s9905_s3 + $0x80] sm:$0xff]  ;;  %v7267_v41 = vld [vmem:[#allocation8 + $0x3f4] ss:$28 sps:$4 sm:$0xff]   ;;  %v7273_v43 = vld [vmem:[#allocation8 + $0x3bc] ss:$28 sps:$4 sm:$0xff]  }
 0x287   :  { %6863 = vmatpush3.msra.mxu1 %v7780_v44  ;;  %6898 = vmatpush3.msra.mxu0 %v8597_v48  ;;  %v7784_v48 = vld [vmem:[%s9905_s3] sm:$0xff]  ;;  %v7271_v42 = vld [vmem:[#allocation8 + $0x3b8] ss:$28 sps:$4 sm:$0xff]   ;;  %v7277_v44 = vld [vmem:[#allocation8 + $0x380] ss:$28 sps:$4 sm:$0xff]  }
 0x288   :  { %6864 = vmatprep.subr.mxu1 %v7781_v45  ;;  %6899 = vmatprep.subr.mxu0 %v8603_v49  ;;  %v7785_v49 = vld [vmem:[%s9905_s3 + $0x2f8] sm:$0xff]  ;;  %s7950_s3 = smov 29  }
 0x289   :  { %6865 = vmatpush3.msra.mxu1 %v7782_v46  ;;  %6900 = vmatpush3.msra.mxu0 %v8609_v50  ;;  %v7279_v45 = vld [vmem:[#allocation8 + $0x384] ss:$28 sps:$4 sm:$0xff]  }
 0x28a   :  { %6866 = vmatprep.subr.mxu1 %v7783_v47  ;;  %6901 = vmatprep.subr.mxu0 %v8615_v51  ;;  %v7283_v46 = vld [vmem:[#allocation8 + $0x6c8] ss:$28 sps:$4 sm:$0xff]  }
 0x28b   :  { %6867 = vmatpush3.msra.mxu1 %v7784_v48  ;;  %6902 = vmatpush3.msra.mxu0 %v8621_v52  ;;  %v7285_v47 = vld [vmem:[#allocation8 + $0x6cc] ss:$28 sps:$4 sm:$0xff]  }
 0x28c   :  { %6906 = vmatprep.subr.mxu1 %v7785_v49  ;;  %7026 = vmatprep.subr.mxu0 %v9989_v56  ;;  %v7289_v48 = vld [vmem:[#allocation8 + $0x690] ss:$28 sps:$4 sm:$0xff]  }
 0x28d   :  { %v7291_v49 = vld [vmem:[#allocation8 + $0x694] ss:$28 sps:$4 sm:$0xff]  }
 0x328   :  { %v1515_v50 = vpop.f32.mrf.mxu1  ;;  %v1586_v53 = vpop.f32.mrf.mxu0 }
 0x329   :  { %v9091_v58 = vsub.f32 %v8657_v9, %v1515_v50  ;;  %v9094_v51 = vsub.f32 %v8651_v3, %v1586_v53  ;;  %v7295_v50 = vld [vmem:[#allocation8 + $0x658] ss:$28 sps:$4 sm:$0xff]  }
 0x32a   :  { %v1517_v29 = vpop.f32.mrf.mxu1  ;;  %v1588_v30 = vpop.f32.mrf.mxu0  ;;  %v7297_v53 = vld [vmem:[#allocation8 + $0x65c] ss:$28 sps:$4 sm:$0xff]  }
 0x32b   :  { %v9097_v31 = vsub.f32 %v8653_v7, %v1517_v29  ;;  %v9100_v52 = vsub.f32 %v8655_v8, %v1588_v30  ;;  %v1739_v3 = vmul.f32 %v9091_v58, %v9091_v58  ;;  %v1741_v28 = vmul.f32 %v9094_v51, %v9094_v51  ;;  %v7301_v29 = vld [vmem:[#allocation8 + $0x620] ss:$28 sps:$4 sm:$0xff]  }
 0x32c   :  { %v1657_v32 = vpop.f32.mrf.mxu1  ;;  %v1728_v54 = vpop.f32.mrf.mxu0  ;;  %v7303_v30 = vld [vmem:[#allocation8 + $0x624] ss:$28 sps:$4 sm:$0xff]  }
 0x32d   :  { %v1740_v61 = vmul.f32 %v9097_v31, %v9097_v31  ;;  %v1742_v9 = vmul.f32 %v9100_v52, %v9100_v52  ;;  %v9114_v8 = vsub.f32 %v8876_v57, %v1728_v54  ;;  %v7309_v54 = vld [vmem:[#allocation8 + $0x5ec] ss:$28 sps:$4 sm:$0xff]  }
 0x32e   :  { %v1659_v62 = vpop.f32.mrf.mxu1  ;;  %v7025_v7 = vpop.f32.mrf.mxu0 }
 0x32f   :  { %v9111_v0 = vsub.f32 %v8866_v1, %v1659_v62  ;;  %1813 = vmatprep.mubr.f32.mxu1 %v1740_v61  ;;  %1883 = vmatprep.mubr.f32.mxu0 %v1742_v9  ;;  %v1745_v57 = vmul.f32 %v9114_v8, %v9114_v8  ;;  %v10009_v1 = vld [vmem:[#allocation36_spill] sm:$0xff] }
 0x330   :  { %1814 = vmatmul.mubr.f32.vlgmr.msra.gmra.mxu1 %v1739_v3  ;;  %1884 = vmatmul.mubr.f32.vlgmr.msra.gmra.mxu0 %v1741_v28 }
 0x331   :  { %v1744_v4 = vmul.f32 %v9111_v0, %v9111_v0  ;;  %6907 = vmatpush3.msra.mxu1 %v8662_v12  ;;  %7027 = vmatpush3.msra.mxu0 %v8873_v55  ;;  %v9995_v55 = vld [vmem:[#allocation23_spill] sm:$0xff]  ;;  %v9996_v12 = vld [vmem:[#allocation24_spill] sm:$0xff] }
 0x332   :  { %6908 = vmatprep.subr.mxu1 %v8669_v13  ;;  %7028 = vmatprep.subr.mxu0 %v9989_v56  ;;  %v9997_v13 = vld [vmem:[#allocation25_spill] sm:$0xff] }
 0x333   :  { %6909 = vmatpush3.msra.mxu1 %v8676_v16  ;;  %1953 = vmatprep.mubr.f32.mxu1 %v1744_v4  ;;  %v9998_v16 = vld [vmem:[#allocation26_spill] sm:$0xff] }
 0x334   :  { %6910 = vmatprep.subr.mxu1 %v8682_v17  ;;  %7029 = vmatpush3.msra.mxu0 %v8882_v59  ;;  %v9999_v17 = vld [vmem:[#allocation27_spill] sm:$0xff]  ;;  %v10010_v59 = vld [vmem:[#allocation37_spill] sm:$0xff] }
 0x335   :  { %7030 = vmatprep.mubr.msk.f32.mxu0 %vm7947_vm0, %v9989_v56  ;;  %6911 = vmatpush3.msra.mxu1 %v8689_v18  ;;  %v10000_v18 = vld [vmem:[#allocation28_spill] sm:$0xff] }
 0x336   :  { %7031 = vmatmul.mubr.msk.f32.vlgmr.msra.gmra.mxu0 %vm1134_vm1, %v1745_v57  ;;  %6912 = vmatprep.subr.mxu1 %v8695_v19  ;;  %v10001_v19 = vld [vmem:[#allocation29_spill] sm:$0xff] }
 0x337   :  { %6913 = vmatpush3.msra.mxu1 %v8701_v20  ;;  %6346 = vmatprep.subr.msk.mxu0 %vm1434_vm2, %v8898_v2  ;;  %v10002_v20 = vld [vmem:[#allocation30_spill] sm:$0xff] }
 0x338   :  { %6914 = vmatprep.subr.mxu1 %v8707_v21  ;;  %6347 = vmatpush1.msk.msra.mxu0 %vm1434_vm2, %v8892_v60  ;;  %v10003_v21 = vld [vmem:[#allocation31_spill] sm:$0xff]  ;;  %v10011_v2 = vld [vmem:[#allocation38_spill] sm:$0xff] }
 0x339   :  { %6915 = vmatpush3.msra.mxu1 %v8713_v22  ;;  %2099 = vmatprep.mubr.f32.mxu0 %v9989_v56  ;;  %v10004_v22 = vld [vmem:[#allocation32_spill] sm:$0xff] }
 0x33a   :  { %6916 = vmatprep.subr.mxu1 %v8719_v23  ;;  %6349 = vmatprep.subr.msk.mxu0 %vm1434_vm2, %v8902_v6  ;;  %v10005_v23 = vld [vmem:[#allocation33_spill] sm:$0xff]  ;;  %v10012_v6 = vld [vmem:[#allocation39_spill] sm:$0xff] }
 0x33b   :  { %6917 = vmatpush3.msra.mxu1 %v8725_v5  ;;  %v10006_v5 = vld [vmem:[#allocation43_spill] sm:$0xff] }
 0x33c   :  { %6918 = vmatprep.subr.mxu1 %v8731_v24  ;;  %v9159_v24 = vsub.f32 %v10006_v5, %v1657_v32  ;;  %v7307_v32 = vld [vmem:[#allocation8 + $0x5e8] ss:$28 sps:$4 sm:$0xff]  }
 0x33d   :  { %6919 = vmatpush3.msra.mxu1 %v8737_v25  ;;  %v10007_v25 = vld [vmem:[#allocation34_spill] sm:$0xff]  ;;  %v7229_v5 = vld [vmem:[#allocation8 + $0x188] ss:$28 sps:$4 sm:$0xff]  }
 0x33e   :  { %6920 = vmatprep.subr.mxu1 %v8743_v26  ;;  %v10008_v26 = vld [vmem:[#allocation35_spill] sm:$0xff]  ;;  %v1743_v60 = vmul.f32 %v9159_v24, %v9159_v24 }
 0x33f   :  { %6921 = vmatpush3.msra.mxu1 %v9995_v55 }
 0x340   :  { %6922 = vmatprep.subr.mxu1 %v9996_v12 }
 0x341   :  { %6923 = vmatpush3.msra.mxu1 %v9997_v13 }
 0x342   :  { %6924 = vmatprep.subr.mxu1 %v9998_v16 }
 0x343   :  { %6925 = vmatpush3.msra.mxu1 %v9999_v17 }
 0x344   :  { %6926 = vmatprep.subr.mxu1 %v10000_v18 }
 0x345   :  { %6927 = vmatpush3.msra.mxu1 %v10001_v19 }
 0x346   :  { %6928 = vmatprep.subr.mxu1 %v10002_v20 }
 0x347   :  { %6929 = vmatpush3.msra.mxu1 %v10003_v21 }
 0x348   :  { %6930 = vmatprep.subr.mxu1 %v10004_v22  ;;  %v10013_v22 = vld [vmem:[#allocation44_spill] sm:$0xff] }
 0x349   :  { %6931 = vmatpush3.msra.mxu1 %v10005_v23  ;;  %v7231_v23 = vld [vmem:[#allocation8 + $0x18c] ss:$28 sps:$4 sm:$0xff]  }
 0x34a   :  { %6932 = vmatprep.subr.mxu1 %v10007_v25  ;;  %v7240_v25 = vld [vmem:[#allocation8 + $0x11c] ss:$28 sps:$4 sm:$0xff]  }
 0x34b   :  { %6933 = vmatpush3.msra.mxu1 %v10008_v26  ;;  %v7238_v26 = vld [vmem:[#allocation8 + $0x118] ss:$28 sps:$4 sm:$0xff]  }
 0x34c   :  { %6934 = vmatprep.subr.mxu1 %v10009_v1  ;;  %v7246_v1 = vld [vmem:[#allocation8 + $0xe4] ss:$28 sps:$4 sm:$0xff]  }
 0x34d   :  { %6935 = vmatpush3.msra.mxu1 %v10010_v59  ;;  %v7244_v59 = vld [vmem:[#allocation8 + $0xe0] ss:$28 sps:$4 sm:$0xff]  }
 0x34e   :  { %6936 = vmatprep.subr.mxu1 %v10011_v2  ;;  %v7258_v2 = vld [vmem:[#allocation8 + $0x74] ss:$28 sps:$4 sm:$0xff]  }
 0x34f   :  { %6937 = vmatpush3.msra.mxu1 %v10012_v6  ;;  %v7256_v6 = vld [vmem:[#allocation8 + $0x70] ss:$28 sps:$4 sm:$0xff]  }
 0x350   :  { %1954 = vmatmul.mubr.f32.vlgmr.msra.gmra.mxu1 %v1743_v60  ;;  %4569 = vmatprep.subr.bf16.mxu1 %v7237_v14  ;;  %v7250_v60 = vld [vmem:[#allocation8 + $0xa8] ss:$28 sps:$4 sm:$0xff]   ;;  %v7262_v14 = vld [vmem:[#allocation8 + $0x38] ss:$28 sps:$4 sm:$0xff]  }
 0x351   :  { %4570 = vmatpush1.bf16.msra.mxu1 %v7235_v63  ;;  %v7264_v63 = vld [vmem:[#allocation8 + $0x3c] ss:$28 sps:$4 sm:$0xff]  }
 0x352   :  { %4571 = vmatprep.subr.bf16.mxu1 %v7243_v33  ;;  %v7268_v33 = vld [vmem:[#allocation8] ss:$28 sps:$4 sm:$0xff]  }
 0x355   :  { %4572 = vmatpush1.bf16.msra.mxu1 %v7241_v15  ;;  %v7270_v15 = vld [vmem:[#allocation8 + $0x4] ss:$28 sps:$4 sm:$0xff]  }
 0x356   :  { %4573 = vmatprep.subr.bf16.mxu1 %v7249_v35  ;;  %v7274_v35 = vld [vmem:[#allocation8 + $0x348] ss:$28 sps:$4 sm:$0xff]  }
 0x359   :  { %4574 = vmatpush1.bf16.msra.mxu1 %v7247_v34  ;;  %v7276_v34 = vld [vmem:[#allocation8 + $0x34c] ss:$28 sps:$4 sm:$0xff]  }
 0x35a   :  { %4575 = vmatprep.subr.bf16.mxu1 %v7255_v37  ;;  %v7280_v37 = vld [vmem:[#allocation8 + $0x310] ss:$28 sps:$4 sm:$0xff]  }
 0x35d   :  { %4576 = vmatpush1.bf16.msra.mxu1 %v7253_v36  ;;  %v7282_v36 = vld [vmem:[#allocation8 + $0x314] ss:$28 sps:$4 sm:$0xff]  }
 0x35e   :  { %4577 = vmatprep.subr.bf16.mxu1 %v7261_v39  ;;  %v7286_v39 = vld [vmem:[#allocation8 + $0x2d8] ss:$28 sps:$4 sm:$0xff]  }
 0x361   :  { %4578 = vmatpush1.bf16.msra.mxu1 %v7259_v38  ;;  %v7288_v38 = vld [vmem:[#allocation8 + $0x2dc] ss:$28 sps:$4 sm:$0xff]  }
 0x362   :  { %4579 = vmatprep.subr.bf16.mxu1 %v7267_v41  ;;  %v7292_v41 = vld [vmem:[#allocation8 + $0x2a0] ss:$28 sps:$4 sm:$0xff]  }
 0x365   :  { %4580 = vmatpush1.bf16.msra.mxu1 %v7265_v40  ;;  %v7294_v40 = vld [vmem:[#allocation8 + $0x2a4] ss:$28 sps:$4 sm:$0xff]  }
 0x366   :  { %4581 = vmatprep.subr.bf16.mxu1 %v7273_v43  ;;  %v7298_v43 = vld [vmem:[#allocation8 + $0x268] ss:$28 sps:$4 sm:$0xff]  }
 0x369   :  { %4582 = vmatpush1.bf16.msra.mxu1 %v7271_v42  ;;  %v7300_v42 = vld [vmem:[#allocation8 + $0x26c] ss:$28 sps:$4 sm:$0xff]  }
 0x36a   :  { %4583 = vmatprep.subr.bf16.mxu1 %v7279_v45  ;;  %v7304_v45 = vld [vmem:[#allocation8 + $0x230] ss:$28 sps:$4 sm:$0xff]  }
 0x36d   :  { %4584 = vmatpush1.bf16.msra.mxu1 %v7277_v44  ;;  %v7306_v44 = vld [vmem:[#allocation8 + $0x234] ss:$28 sps:$4 sm:$0xff]  }
 0x36e   :  { %4585 = vmatprep.subr.bf16.mxu1 %v7285_v47  ;;  %v7315_v47 = vld [vmem:[#allocation8 + $0x5b4] ss:$28 sps:$4 sm:$0xff]  }
 0x371   :  { %4586 = vmatpush2.bf16.msra.mxu1 %v7283_v46  ;;  %v7312_v46 = vld [vmem:[#allocation8 + $0x1fc] ss:$28 sps:$4 sm:$0xff]  }
 0x372   :  { %4587 = vmatprep.subr.bf16.mxu1 %v7291_v49  ;;  %v7310_v49 = vld [vmem:[#allocation8 + $0x1f8] ss:$28 sps:$4 sm:$0xff]  }
 0x375   :  { %4588 = vmatpush2.bf16.msra.mxu1 %v7289_v48  ;;  %v7313_v48 = vld [vmem:[#allocation8 + $0x5b0] ss:$28 sps:$4 sm:$0xff]  }
 0x376   :  { %4589 = vmatprep.subr.bf16.mxu1 %v7297_v53  ;;  %v7321_v53 = vld [vmem:[#allocation8 + $0x57c] ss:$28 sps:$4 sm:$0xff]  }
 0x379   :  { %4590 = vmatpush2.bf16.msra.mxu1 %v7295_v50  ;;  %v7318_v50 = vld [vmem:[#allocation8 + $0x1c4] ss:$28 sps:$4 sm:$0xff]  }
 0x37a   :  { %4591 = vmatprep.subr.bf16.mxu1 %v7303_v30  ;;  %v7316_v30 = vld [vmem:[#allocation8 + $0x1c0] ss:$28 sps:$4 sm:$0xff]  }
 0x37d   :  { %4592 = vmatpush2.bf16.msra.mxu1 %v7301_v29  ;;  %v7319_v29 = vld [vmem:[#allocation8 + $0x578] ss:$28 sps:$4 sm:$0xff]  }
 0x37e   :  { %4593 = vmatprep.subr.bf16.mxu1 %v7309_v54  ;;  %v7327_v54 = vld [vmem:[#allocation8 + $0x544] ss:$28 sps:$4 sm:$0xff]  }
 0x381   :  { %4594 = vmatpush2.bf16.msra.mxu1 %v7307_v32  ;;  %v7324_v32 = vld [vmem:[#allocation8 + $0x88c] ss:$28 sps:$4 sm:$0xff]  }
 0x382   :  { %4595 = vmatprep.subr.bf16.mxu1 %v7315_v47  ;;  %v7375_v47 = vld [vmem:[#allocation8 + $0xa14] ss:$28 sps:$4 sm:$0xff]  }
 0x385   :  { %4596 = vmatpush2.bf16.msra.mxu1 %v7313_v48  ;;  %v7378_v48 = vld [vmem:[#allocation8 + $0x44] ss:$28 sps:$4 sm:$0xff]  }
 0x386   :  { %4597 = vmatprep.subr.bf16.mxu1 %v7321_v53  ;;  %v7381_v53 = vld [vmem:[#allocation8 + $0x9dc] ss:$28 sps:$4 sm:$0xff]  }
 0x389   :  { %4598 = vmatpush2.bf16.msra.mxu1 %v7319_v29  ;;  %v7384_v29 = vld [vmem:[#allocation8 + $0xc] ss:$28 sps:$4 sm:$0xff]  }
 0x38a   :  { %4599 = vmatprep.subr.bf16.mxu1 %v7327_v54  ;;  %v7387_v54 = vld [vmem:[#allocation8 + $0x9a4] ss:$28 sps:$4 sm:$0xff]  }
 0x3f0   :  { %v6903_v61 = vpop.f32.mrf.mxu0  ;;  %v6868_v62 = vpop.f32.mrf.mxu1 }
 0x3f2   :  { %v6904_v9 = vpop.f32.mrf.mxu0  ;;  %v6869_v7 = vpop.f32.mrf.mxu1 }
 0x3f3   :  { %v6870_v4 = vadd.f32 %v6869_v7, %v6868_v62  ;;  %v6905_v57 = vadd.f32 %v6904_v9, %v6903_v61  ;;  %v7325_v61 = vld [vmem:[#allocation8 + $0x540] ss:$28 sps:$4 sm:$0xff]  }
 0x3f4   :  { %4600 = vmatpush2.bf16.msra.mxu1 %v7325_v61  ;;  %v7336_v9 = vld [vmem:[#allocation8 + $0xa84] ss:$28 sps:$4 sm:$0xff]   ;;  %v7390_v61 = vld [vmem:[#allocation8 + $0x354] ss:$28 sps:$4 sm:$0xff]  }
 0x3f5   :  { %v1886_v13 = vadd.f32 %v6905_v57, %v6870_v4  ;;  %4665 = vmatprep.subr.bf16.mxu1 %v7336_v9  ;;  %v7385_v9 = vld [vmem:[#allocation8 + $0x9a0] ss:$28 sps:$4 sm:$0xff]  }
 0x3f6   :  { %v2025_v3 = vpop.f32.mrf.mxu0 }
 0x3f8   :  { %v7032_v28 = vpop.f32.mrf.mxu0 }
 0x410   :  { %v6938_v55 = vpop.f32.mrf.mxu1 }
 0x412   :  { %v6939_v12 = vpop.f32.mrf.mxu1 }
 0x413   :  { %v6940_v16 = vadd.f32 %v6939_v12, %v6938_v55  ;;  %v7322_v55 = vld [vmem:[#allocation8 + $0x888] ss:$28 sps:$4 sm:$0xff]  }
 0x415   :  { %v1956_v17 = vadd.f32 %v6940_v16, %v1886_v13 }
 0x417   :  { %v2026_v18 = vadd.f32 %v2025_v3, %v1956_v17  ;;  %v7330_v17 = vld [vmem:[#allocation8 + $0x854] ss:$28 sps:$4 sm:$0xff]  }
 0x419   :  { %v2029_v19 = vmul.f32 0.0051020407, %v2026_v18 }
 0x41b   :  { %v2030_v20 = vadd.f32 1e-05, %v2029_v19 }
 0x41d   :  { %7723 = vrsqrt.f32 %v2030_v20  ;;  %v7334_v20 = vld [vmem:[#allocation8 + $0xa80] ss:$28 sps:$4 sm:$0xff]  }
 0x42a   :  { %v7724_v21 = vpop.eup %7723 }
 0x42b   :  { %6348 = vmatmul.mubr.msk.f32.vlgmr.msra.gmra.mxu0 %vm1430_vm3, %v7724_v21 }
 0x42c   :  { %6350 = vmatpush1.msk.msra.mxu0 %vm1434_vm2, %v10013_v22  ;;  %2170 = vmatprep.mubr.f32.mxu0 %v9989_v56 }
 0x42d   :  { %6352 = vmatprep.subr.msk.mxu0 %vm1434_vm2, %v8916_v11  ;;  %v7234_v11 = vld [vmem:[#allocation8 + $0x154] ss:$28 sps:$4 sm:$0xff]  }
 0x42f   :  { %6351 = vmatmul.mubr.msk.f32.vlgmr.msra.gmra.mxu0 %vm1430_vm3, %v7724_v21 }
 0x430   :  { %6353 = vmatpush1.msk.msra.mxu0 %vm1434_vm2, %v8912_v10  ;;  %2241 = vmatprep.mubr.f32.mxu0 %v9989_v56  ;;  %v7232_v10 = vld [vmem:[#allocation8 + $0x150] ss:$28 sps:$4 sm:$0xff]  }
 0x431   :  { %7033 = vmatprep.subr.mxu0 %v9989_v56 }
 0x433   :  { %6354 = vmatmul.mubr.msk.f32.vlgmr.msra.gmra.mxu0 %vm1430_vm3, %v7724_v21 }
 0x434   :  { %7034 = vmatpush3.msk.msra.mxu0 %vm1434_vm2, %v8921_v27  ;;  %7035 = vmatprep.mubr.msk.f32.mxu0 %vm7947_vm0, %v9989_v56  ;;  %v7252_v27 = vld [vmem:[#allocation8 + $0xac] ss:$28 sps:$4 sm:$0xff]   ;;  %vm5309_vm2 = vcmask 128004  }
 0x435   :  { %4528 = vmatprep.subr.bf16.mxu0 %v7231_v23 }
 0x437   :  { %7036 = vmatmul.mubr.msk.f32.vlgmr.msra.gmra.mxu0 %vm1430_vm3, %v7724_v21 }
 0x438   :  { %4529 = vmatpush1.bf16.msra.mxu0 %v7229_v5 }
 0x439   :  { %4530 = vmatprep.subr.bf16.mxu0 %v7234_v11 }
 0x43c   :  { %4531 = vmatpush1.bf16.msra.mxu0 %v7232_v10  ;;  %v7331_v10 = vld [vmem:[#allocation8 + $0x818] ss:$28 sps:$4 sm:$0xff]  }
 0x43d   :  { %4532 = vmatprep.subr.bf16.mxu0 %v7240_v25 }
 0x440   :  { %4533 = vmatpush1.bf16.msra.mxu0 %v7238_v26 }
 0x441   :  { %4534 = vmatprep.subr.bf16.mxu0 %v7246_v1  ;;  %v7339_v1 = vld [vmem:[#allocation8 + $0x7e4] ss:$28 sps:$4 sm:$0xff]  }
 0x444   :  { %4535 = vmatpush1.bf16.msra.mxu0 %v7244_v59  ;;  %v7948_v59 = vmov 0  }
 0x445   :  { %4536 = vmatprep.subr.bf16.mxu0 %v7252_v27  ;;  %v7340_v27 = vld [vmem:[#allocation8 + $0x190] ss:$28 sps:$4 sm:$0xff]  }
 0x448   :  { %4537 = vmatpush1.bf16.msra.mxu0 %v7250_v60 }
 0x449   :  { %4538 = vmatprep.subr.bf16.mxu0 %v7258_v2  ;;  %v7345_v2 = vld [vmem:[#allocation8 + $0x7ac] ss:$28 sps:$4 sm:$0xff]  }
 0x44c   :  { %4539 = vmatpush1.bf16.msra.mxu0 %v7256_v6  ;;  %v7348_v6 = vld [vmem:[#allocation8 + $0x15c] ss:$28 sps:$4 sm:$0xff]  }
 0x44d   :  { %4540 = vmatprep.subr.bf16.mxu0 %v7264_v63  ;;  %v7346_v63 = vld [vmem:[#allocation8 + $0x158] ss:$28 sps:$4 sm:$0xff]  }
 0x450   :  { %4541 = vmatpush1.bf16.msra.mxu0 %v7262_v14  ;;  %v7351_v14 = vld [vmem:[#allocation8 + $0x774] ss:$28 sps:$4 sm:$0xff]  }
 0x451   :  { %4542 = vmatprep.subr.bf16.mxu0 %v7270_v15  ;;  %v7354_v15 = vld [vmem:[#allocation8 + $0x124] ss:$28 sps:$4 sm:$0xff]  }
 0x454   :  { %4543 = vmatpush1.bf16.msra.mxu0 %v7268_v33  ;;  %v7349_v33 = vld [vmem:[#allocation8 + $0x770] ss:$28 sps:$4 sm:$0xff]  }
 0x455   :  { %4544 = vmatprep.subr.bf16.mxu0 %v7276_v34  ;;  %v7352_v34 = vld [vmem:[#allocation8 + $0x120] ss:$28 sps:$4 sm:$0xff]  }
 0x458   :  { %4545 = vmatpush2.bf16.msra.mxu0 %v7274_v35  ;;  %v7357_v35 = vld [vmem:[#allocation8 + $0x73c] ss:$28 sps:$4 sm:$0xff]  }
 0x459   :  { %4546 = vmatprep.subr.bf16.mxu0 %v7282_v36  ;;  %v7360_v36 = vld [vmem:[#allocation8 + $0xec] ss:$28 sps:$4 sm:$0xff]  }
 0x45c   :  { %4547 = vmatpush2.bf16.msra.mxu0 %v7280_v37  ;;  %v7355_v37 = vld [vmem:[#allocation8 + $0x738] ss:$28 sps:$4 sm:$0xff]  }
 0x45d   :  { %4548 = vmatprep.subr.bf16.mxu0 %v7288_v38  ;;  %v7358_v38 = vld [vmem:[#allocation8 + $0xe8] ss:$28 sps:$4 sm:$0xff]  }
 0x460   :  { %4549 = vmatpush2.bf16.msra.mxu0 %v7286_v39  ;;  %v7363_v39 = vld [vmem:[#allocation8 + $0x704] ss:$28 sps:$4 sm:$0xff]  }
 0x461   :  { %4550 = vmatprep.subr.bf16.mxu0 %v7294_v40  ;;  %v7366_v40 = vld [vmem:[#allocation8 + $0xb4] ss:$28 sps:$4 sm:$0xff]  }
 0x464   :  { %4551 = vmatpush2.bf16.msra.mxu0 %v7292_v41  ;;  %v7361_v41 = vld [vmem:[#allocation8 + $0x700] ss:$28 sps:$4 sm:$0xff]  }
 0x465   :  { %4552 = vmatprep.subr.bf16.mxu0 %v7300_v42  ;;  %v7364_v42 = vld [vmem:[#allocation8 + $0xb0] ss:$28 sps:$4 sm:$0xff]  }
 0x468   :  { %4553 = vmatpush2.bf16.msra.mxu0 %v7298_v43  ;;  %v7369_v43 = vld [vmem:[#allocation8 + $0xa4c] ss:$28 sps:$4 sm:$0xff]  }
 0x469   :  { %4554 = vmatprep.subr.bf16.mxu0 %v7306_v44  ;;  %v7372_v44 = vld [vmem:[#allocation8 + $0x7c] ss:$28 sps:$4 sm:$0xff]  }
 0x46c   :  { %4555 = vmatpush2.bf16.msra.mxu0 %v7304_v45  ;;  %v7367_v45 = vld [vmem:[#allocation8 + $0xa48] ss:$28 sps:$4 sm:$0xff]  }
 0x46d   :  { %4556 = vmatprep.subr.bf16.mxu0 %v7312_v46  ;;  %v7370_v46 = vld [vmem:[#allocation8 + $0x78] ss:$28 sps:$4 sm:$0xff]  }
 0x470   :  { %4557 = vmatpush2.bf16.msra.mxu0 %v7310_v49  ;;  %v7373_v49 = vld [vmem:[#allocation8 + $0xa10] ss:$28 sps:$4 sm:$0xff]  }
 0x471   :  { %4558 = vmatprep.subr.bf16.mxu0 %v7318_v50  ;;  %v7376_v50 = vld [vmem:[#allocation8 + $0x40] ss:$28 sps:$4 sm:$0xff]  }
 0x474   :  { %4559 = vmatpush2.bf16.msra.mxu0 %v7316_v30  ;;  %v7379_v30 = vld [vmem:[#allocation8 + $0x9d8] ss:$28 sps:$4 sm:$0xff]  }
 0x475   :  { %4610 = vmatprep.subr.bf16.mxu0 %v7324_v32  ;;  %v7382_v32 = vld [vmem:[#allocation8 + $0x8] ss:$28 sps:$4 sm:$0xff]  }
 0x4eb   :  { %v2101_v3 = vpop.f32.mrf.mxu0 }
 0x4ec   :  { %v2318_v28 = vmul.f32 %v2101_v3, %v9091_v58  ;;  %v7388_v3 = vld [vmem:[#allocation8 + $0x350] ss:$28 sps:$4 sm:$0xff]  }
 0x4ed   :  { %v2103_v62 = vpop.f32.mrf.mxu0 }
 0x4ee   :  { %v2319_v7 = vmul.f32 %v2103_v62, %v9097_v31  ;;  %v9190_v12 = vpack.c.bf16 %v2318_v28, %v2318_v28  ;;  %v7328_v31 = vld [vmem:[#allocation8 + $0x850] ss:$28 sps:$4 sm:$0xff]   ;;  %v7396_v62 = vld [vmem:[#allocation8 + $0x31c] ss:$28 sps:$4 sm:$0xff]  }
 0x4ef   :  { %v2172_v4 = vpop.f32.mrf.mxu0  ;;  %v7393_v28 = vld [vmem:[#allocation8 + $0x96c] ss:$28 sps:$4 sm:$0xff]  }
 0x4f0   :  { %v9188_v57 = vpack.c.bf16 %v2319_v7, %v2319_v7  ;;  %v2320_v13 = vmul.f32 %v2172_v4, %v9094_v51  ;;  %v7333_v51 = vld [vmem:[#allocation8 + $0x81c] ss:$28 sps:$4 sm:$0xff]   ;;  %v7391_v7 = vld [vmem:[#allocation8 + $0x968] ss:$28 sps:$4 sm:$0xff]  }
 0x4f1   :  { %v2174_v16 = vpop.f32.mrf.mxu0  ;;  %v7394_v4 = vld [vmem:[#allocation8 + $0x318] ss:$28 sps:$4 sm:$0xff]  }
 0x4f2   :  { %v2321_v18 = vmul.f32 %v2174_v16, %v9100_v52  ;;  %4560 = vmatprep.mubr.bf16.mxu0 %v9188_v57  ;;  %v9200_v21 = vpack.c.bf16 %v2320_v13, %v2320_v13  ;;  %v7342_v52 = vld [vmem:[#allocation8 + $0x194] ss:$28 sps:$4 sm:$0xff]   ;;  %v7402_v13 = vld [vmem:[#allocation8 + $0x2e4] ss:$28 sps:$4 sm:$0xff]  }
 0x4f3   :  { %v9195_v19 = vpop.f32.mrf.mxu0  ;;  %4561 = vmatmul.mubr.bf16.vlgmr.msra.gmra.mxu0 %v9190_v12  ;;  %v7397_v16 = vld [vmem:[#allocation8 + $0x930] ss:$28 sps:$4 sm:$0xff]  }
 0x4f4   :  { %v9198_v58 = vpack.c.bf16 %v2321_v18, %v2321_v18  ;;  %4611 = vmatpush1.bf16.msra.mxu0 %v7322_v55  ;;  %v7399_v55 = vld [vmem:[#allocation8 + $0x934] ss:$28 sps:$4 sm:$0xff]   ;;  %v7405_v18 = vld [vmem:[#allocation8 + $0x8fc] ss:$28 sps:$4 sm:$0xff]  }
 0x4f5   :  { %v2245_v22 = vpop.f32.mrf.mxu0  ;;  %4612 = vmatprep.subr.bf16.mxu0 %v7330_v17  ;;  %v7400_v17 = vld [vmem:[#allocation8 + $0x2e0] ss:$28 sps:$4 sm:$0xff]  }
 0x4f6   :  { %v2323_v23 = vmul.f32 %v2245_v22, %v9111_v0  ;;  %4601 = vmatprep.mubr.bf16.mxu1 %v9198_v58  ;;  %v7337_v0 = vld [vmem:[#allocation8 + $0x7e0] ss:$28 sps:$4 sm:$0xff]   ;;  %v7406_v22 = vld [vmem:[#allocation8 + $0x2a8] ss:$28 sps:$4 sm:$0xff]  }
 0x4f7   :  { %v2314_v5 = vpop.f32.mrf.mxu0  ;;  %4602 = vmatmul.mubr.bf16.vlgmr.msra.gmra.mxu1 %v9200_v21 }
 0x4f8   :  { %v9205_v11 = vpack.c.bf16 %v2323_v23, %v2323_v23  ;;  %4613 = vmatpush1.bf16.msra.mxu0 %v7328_v31  ;;  %4666 = vmatpush1.bf16.msra.mxu1 %v7334_v20  ;;  %v2324_v25 = vmul.f32 %v2314_v5, %v9114_v8  ;;  %v7343_v8 = vld [vmem:[#allocation8 + $0x7a8] ss:$28 sps:$4 sm:$0xff]   ;;  %v7403_v20 = vld [vmem:[#allocation8 + $0x8f8] ss:$28 sps:$4 sm:$0xff]   ;;  %v7412_v5 = vld [vmem:[#allocation8 + $0x270] ss:$28 sps:$4 sm:$0xff]  }
 0x4f9   :  { %v7037_v26 = vpop.f32.mrf.mxu0  ;;  %4614 = vmatprep.subr.bf16.mxu0 %v7333_v51  ;;  %4683 = vmatprep.mubr.bf16.mxu1 %v7948_v59  ;;  %v7408_v31 = vld [vmem:[#allocation8 + $0x2ac] ss:$28 sps:$4 sm:$0xff]   ;;  %v7411_v51 = vld [vmem:[#allocation8 + $0x8c4] ss:$28 sps:$4 sm:$0xff]   ;;  %v7414_v23 = vld [vmem:[#allocation8 + $0x274] ss:$28 sps:$4 sm:$0xff]  }
 0x4fa   :  { %4642 = vmatprep.mubr.bf16.mxu0 %v9205_v11  ;;  %4692 = vmatprep.subr.bf16.mxu1 %v7342_v52  ;;  %v9210_v60 = vpack.c.bf16 %v2324_v25, %v2324_v25  ;;  %v7409_v52 = vld [vmem:[#allocation8 + $0x8c0] ss:$28 sps:$4 sm:$0xff]   ;;  %v7420_v26 = vld [vmem:[#allocation8 + $0x514] ss:$28 sps:$4 sm:$0xff]  }
 0x4fb   :  { %v7417_v25 = vld [vmem:[#allocation8 + $0x23c] ss:$28 sps:$4 sm:$0xff]  }
 0x4fc   :  { %4615 = vmatpush1.bf16.msra.mxu0 %v7331_v10  ;;  %v2322_v10 = vmul.f32 %v9195_v19, %v9159_v24  ;;  %v7424_v24 = vld [vmem:[#allocation8 + $0x4d8] ss:$28 sps:$4 sm:$0xff]   ;;  %v7429_v19 = vld [vmem:[#allocation8 + $0x1cc] ss:$28 sps:$4 sm:$0xff]  }
 0x4fd   :  { %4616 = vmatprep.subr.bf16.mxu0 %v7339_v1  ;;  %v7415_v1 = vld [vmem:[#allocation8 + $0x238] ss:$28 sps:$4 sm:$0xff]  }
 0x4ff   :  { %6700 = vmatmul.mubr.msk.bf16.vlgmr.msra.gmra.mxu1 %vm1134_vm1, %v9210_v60 }
 0x500   :  { %4617 = vmatpush1.bf16.msra.mxu0 %v7337_v0  ;;  %4693 = vmatpush1.bf16.msra.mxu1 %v7340_v27  ;;  %v7418_v0 = vld [vmem:[#allocation8 + $0x510] ss:$28 sps:$4 sm:$0xff]   ;;  %v9217_v27 = vpack.c.bf16 %v2322_v10, %v2322_v10  ;;  %v7493_v10 = vld [vmem:[#allocation8 + $0x5b8] ss:$28 sps:$4 sm:$0xff]  }
 0x501   :  { %4724 = vmatprep.mubr.bf16.mxu1 %v9188_v57  ;;  %4618 = vmatprep.subr.bf16.mxu0 %v7345_v2  ;;  %v7423_v2 = vld [vmem:[#allocation8 + $0x204] ss:$28 sps:$4 sm:$0xff]  }
 0x502   :  { %4694 = vmatprep.subr.bf16.mxu1 %v7348_v6  ;;  %v7426_v6 = vld [vmem:[#allocation8 + $0x4dc] ss:$28 sps:$4 sm:$0xff]  }
 0x504   :  { %4619 = vmatpush1.bf16.msra.mxu0 %v7343_v8  ;;  %4695 = vmatpush1.bf16.msra.mxu1 %v7346_v63  ;;  %v7421_v8 = vld [vmem:[#allocation8 + $0x200] ss:$28 sps:$4 sm:$0xff]  }
 0x505   :  { %4620 = vmatprep.subr.bf16.mxu0 %v7351_v14  ;;  %4696 = vmatprep.subr.bf16.mxu1 %v7354_v15  ;;  %v7432_v63 = vld [vmem:[#allocation8 + $0x4a4] ss:$28 sps:$4 sm:$0xff]  }
 0x506   :  { %v7427_v14 = vld [vmem:[#allocation8 + $0x1c8] ss:$28 sps:$4 sm:$0xff]   ;;  %v7430_v15 = vld [vmem:[#allocation8 + $0x4a0] ss:$28 sps:$4 sm:$0xff]  }
 0x508   :  { %4621 = vmatpush1.bf16.msra.mxu0 %v7349_v33  ;;  %4697 = vmatpush1.bf16.msra.mxu1 %v7352_v34  ;;  %v7435_v33 = vld [vmem:[#allocation8 + $0x46c] ss:$28 sps:$4 sm:$0xff]   ;;  %v7438_v34 = vld [vmem:[#allocation8 + $0x894] ss:$28 sps:$4 sm:$0xff]  }
 0x509   :  { %4622 = vmatprep.subr.bf16.mxu0 %v7357_v35  ;;  %4698 = vmatprep.subr.bf16.mxu1 %v7360_v36  ;;  %v7433_v35 = vld [vmem:[#allocation8 + $0x468] ss:$28 sps:$4 sm:$0xff]   ;;  %v7436_v36 = vld [vmem:[#allocation8 + $0x890] ss:$28 sps:$4 sm:$0xff]  }
 0x50c   :  { %4623 = vmatpush1.bf16.msra.mxu0 %v7355_v37  ;;  %4699 = vmatpush1.bf16.msra.mxu1 %v7358_v38  ;;  %v7441_v37 = vld [vmem:[#allocation8 + $0x434] ss:$28 sps:$4 sm:$0xff]   ;;  %v7444_v38 = vld [vmem:[#allocation8 + $0x85c] ss:$28 sps:$4 sm:$0xff]  }
 0x50d   :  { %4624 = vmatprep.subr.bf16.mxu0 %v7363_v39  ;;  %4700 = vmatprep.subr.bf16.mxu1 %v7366_v40  ;;  %v7439_v39 = vld [vmem:[#allocation8 + $0x430] ss:$28 sps:$4 sm:$0xff]   ;;  %v7442_v40 = vld [vmem:[#allocation8 + $0x858] ss:$28 sps:$4 sm:$0xff]  }
 0x510   :  { %4625 = vmatpush1.bf16.msra.mxu0 %v7361_v41  ;;  %4701 = vmatpush1.bf16.msra.mxu1 %v7364_v42  ;;  %v7447_v41 = vld [vmem:[#allocation8 + $0x3fc] ss:$28 sps:$4 sm:$0xff]   ;;  %v7450_v42 = vld [vmem:[#allocation8 + $0x824] ss:$28 sps:$4 sm:$0xff]  }
 0x511   :  { %4626 = vmatprep.subr.bf16.mxu0 %v7369_v43  ;;  %4702 = vmatprep.subr.bf16.mxu1 %v7372_v44  ;;  %v7445_v43 = vld [vmem:[#allocation8 + $0x3f8] ss:$28 sps:$4 sm:$0xff]   ;;  %v7448_v44 = vld [vmem:[#allocation8 + $0x820] ss:$28 sps:$4 sm:$0xff]  }
 0x514   :  { %4627 = vmatpush2.bf16.msra.mxu0 %v7367_v45  ;;  %4703 = vmatpush1.bf16.msra.mxu1 %v7370_v46  ;;  %v7453_v45 = vld [vmem:[#allocation8 + $0x3c4] ss:$28 sps:$4 sm:$0xff]   ;;  %v7456_v46 = vld [vmem:[#allocation8 + $0x7ec] ss:$28 sps:$4 sm:$0xff]  }
 0x515   :  { %4628 = vmatprep.subr.bf16.mxu0 %v7375_v47  ;;  %4704 = vmatprep.subr.bf16.mxu1 %v7378_v48  ;;  %v7451_v47 = vld [vmem:[#allocation8 + $0x3c0] ss:$28 sps:$4 sm:$0xff]   ;;  %v7454_v48 = vld [vmem:[#allocation8 + $0x7e8] ss:$28 sps:$4 sm:$0xff]  }
 0x518   :  { %4629 = vmatpush2.bf16.msra.mxu0 %v7373_v49  ;;  %4705 = vmatpush1.bf16.msra.mxu1 %v7376_v50  ;;  %v7459_v49 = vld [vmem:[#allocation8 + $0x38c] ss:$28 sps:$4 sm:$0xff]   ;;  %v7462_v50 = vld [vmem:[#allocation8 + $0x7b4] ss:$28 sps:$4 sm:$0xff]  }
 0x519   :  { %4630 = vmatprep.subr.bf16.mxu0 %v7381_v53  ;;  %4706 = vmatprep.subr.bf16.mxu1 %v7384_v29  ;;  %v7457_v53 = vld [vmem:[#allocation8 + $0x388] ss:$28 sps:$4 sm:$0xff]   ;;  %v7460_v29 = vld [vmem:[#allocation8 + $0x7b0] ss:$28 sps:$4 sm:$0xff]  }
 0x51c   :  { %4631 = vmatpush2.bf16.msra.mxu0 %v7379_v30  ;;  %4707 = vmatpush1.bf16.msra.mxu1 %v7382_v32  ;;  %v7465_v30 = vld [vmem:[#allocation8 + $0x6d4] ss:$28 sps:$4 sm:$0xff]   ;;  %v7468_v32 = vld [vmem:[#allocation8 + $0x77c] ss:$28 sps:$4 sm:$0xff]  }
 0x51d   :  { %4632 = vmatprep.subr.bf16.mxu0 %v7387_v54  ;;  %4708 = vmatprep.subr.bf16.mxu1 %v7390_v61  ;;  %v7463_v54 = vld [vmem:[#allocation8 + $0x6d0] ss:$28 sps:$4 sm:$0xff]   ;;  %v7466_v61 = vld [vmem:[#allocation8 + $0x778] ss:$28 sps:$4 sm:$0xff]  }
 0x520   :  { %4633 = vmatpush2.bf16.msra.mxu0 %v7385_v9  ;;  %4709 = vmatpush2.bf16.msra.mxu1 %v7388_v3  ;;  %v7471_v9 = vld [vmem:[#allocation8 + $0x69c] ss:$28 sps:$4 sm:$0xff]   ;;  %v7474_v3 = vld [vmem:[#allocation8 + $0x744] ss:$28 sps:$4 sm:$0xff]  }
 0x521   :  { %4634 = vmatprep.subr.bf16.mxu0 %v7393_v28  ;;  %4710 = vmatprep.subr.bf16.mxu1 %v7396_v62  ;;  %v7469_v28 = vld [vmem:[#allocation8 + $0x698] ss:$28 sps:$4 sm:$0xff]   ;;  %v7472_v62 = vld [vmem:[#allocation8 + $0x740] ss:$28 sps:$4 sm:$0xff]  }
 0x524   :  { %4635 = vmatpush2.bf16.msra.mxu0 %v7391_v7  ;;  %4711 = vmatpush2.bf16.msra.mxu1 %v7394_v4  ;;  %v7477_v7 = vld [vmem:[#allocation8 + $0x664] ss:$28 sps:$4 sm:$0xff]   ;;  %v7480_v4 = vld [vmem:[#allocation8 + $0x70c] ss:$28 sps:$4 sm:$0xff]  }
 0x525   :  { %4636 = vmatprep.subr.bf16.mxu0 %v7399_v55  ;;  %4712 = vmatprep.subr.bf16.mxu1 %v7402_v13  ;;  %v7475_v55 = vld [vmem:[#allocation8 + $0x660] ss:$28 sps:$4 sm:$0xff]   ;;  %v7478_v13 = vld [vmem:[#allocation8 + $0x708] ss:$28 sps:$4 sm:$0xff]  }
 0x528   :  { %4637 = vmatpush2.bf16.msra.mxu0 %v7397_v16  ;;  %4713 = vmatpush2.bf16.msra.mxu1 %v7400_v17  ;;  %v7483_v16 = vld [vmem:[#allocation8 + $0x62c] ss:$28 sps:$4 sm:$0xff]   ;;  %v7486_v17 = vld [vmem:[#allocation8 + $0xa54] ss:$28 sps:$4 sm:$0xff]  }
 0x529   :  { %4638 = vmatprep.subr.bf16.mxu0 %v7405_v18  ;;  %4714 = vmatprep.subr.bf16.mxu1 %v7408_v31  ;;  %v7481_v18 = vld [vmem:[#allocation8 + $0x628] ss:$28 sps:$4 sm:$0xff]   ;;  %v7484_v31 = vld [vmem:[#allocation8 + $0xa50] ss:$28 sps:$4 sm:$0xff]  }
 0x52c   :  { %4639 = vmatpush2.bf16.msra.mxu0 %v7403_v20  ;;  %4715 = vmatpush2.bf16.msra.mxu1 %v7406_v22  ;;  %v7489_v20 = vld [vmem:[#allocation8 + $0x5f4] ss:$28 sps:$4 sm:$0xff]   ;;  %v7492_v22 = vld [vmem:[#allocation8 + $0xa1c] ss:$28 sps:$4 sm:$0xff]  }
 0x52d   :  { %4640 = vmatprep.subr.bf16.mxu0 %v7411_v51  ;;  %4716 = vmatprep.subr.bf16.mxu1 %v7414_v23  ;;  %v7487_v51 = vld [vmem:[#allocation8 + $0x5f0] ss:$28 sps:$4 sm:$0xff]   ;;  %v7490_v23 = vld [vmem:[#allocation8 + $0xa18] ss:$28 sps:$4 sm:$0xff]  }
 0x530   :  { %4641 = vmatpush2.bf16.msra.mxu0 %v7409_v52  ;;  %4717 = vmatpush2.bf16.msra.mxu1 %v7412_v5  ;;  %v7495_v52 = vld [vmem:[#allocation8 + $0x5bc] ss:$28 sps:$4 sm:$0xff]   ;;  %v7498_v5 = vld [vmem:[#allocation8 + $0x9e4] ss:$28 sps:$4 sm:$0xff]  }
 0x531   :  { %4718 = vmatprep.subr.bf16.mxu1 %v7417_v25  ;;  %4733 = vmatprep.subr.bf16.mxu0 %v7420_v26  ;;  %v7496_v25 = vld [vmem:[#allocation8 + $0x9e0] ss:$28 sps:$4 sm:$0xff]  }
 0x532   :  { %v7501_v26 = vld [vmem:[#allocation8 + $0x584] ss:$28 sps:$4 sm:$0xff]  }
 0x533   :  { %4643 = vmatmul.mubr.bf16.vlgmr.msra.gmra.mxu0 %v9217_v27 }
 0x534   :  { %4719 = vmatpush2.bf16.msra.mxu1 %v7415_v1  ;;  %4734 = vmatpush1.bf16.msra.mxu0 %v7418_v0  ;;  %v7504_v1 = vld [vmem:[#allocation8 + $0x9ac] ss:$28 sps:$4 sm:$0xff]   ;;  %v7499_v0 = vld [vmem:[#allocation8 + $0x580] ss:$28 sps:$4 sm:$0xff]  }
 0x535   :  { %4765 = vmatprep.mubr.bf16.mxu0 %v9198_v58  ;;  %4720 = vmatprep.subr.bf16.mxu1 %v7423_v2  ;;  %v7502_v2 = vld [vmem:[#allocation8 + $0x9a8] ss:$28 sps:$4 sm:$0xff]  }
 0x536   :  { %4735 = vmatprep.subr.bf16.mxu0 %v7426_v6  ;;  %v7507_v6 = vld [vmem:[#allocation8 + $0x54c] ss:$28 sps:$4 sm:$0xff]  }
 0x538   :  { %4721 = vmatpush2.bf16.msra.mxu1 %v7421_v8  ;;  %4736 = vmatpush1.bf16.msra.mxu0 %v7424_v24  ;;  %v7510_v8 = vld [vmem:[#allocation8 + $0x974] ss:$28 sps:$4 sm:$0xff]   ;;  %v7505_v24 = vld [vmem:[#allocation8 + $0x548] ss:$28 sps:$4 sm:$0xff]  }
 0x539   :  { %4722 = vmatprep.subr.bf16.mxu1 %v7429_v19  ;;  %4737 = vmatprep.subr.bf16.mxu0 %v7432_v63  ;;  %v7508_v19 = vld [vmem:[#allocation8 + $0x970] ss:$28 sps:$4 sm:$0xff]   ;;  %v7513_v63 = vld [vmem:[#allocation8 + $0x93c] ss:$28 sps:$4 sm:$0xff]  }
 0x53c   :  { %4723 = vmatpush2.bf16.msra.mxu1 %v7427_v14  ;;  %4738 = vmatpush1.bf16.msra.mxu0 %v7430_v15  ;;  %v7516_v14 = vld [vmem:[#allocation8 + $0xa8c] ss:$28 sps:$4 sm:$0xff]   ;;  %v7511_v15 = vld [vmem:[#allocation8 + $0x938] ss:$28 sps:$4 sm:$0xff]  }
 0x53d   :  { %4739 = vmatprep.subr.bf16.mxu0 %v7435_v33  ;;  %4774 = vmatprep.subr.bf16.mxu1 %v7438_v34  ;;  %v7514_v33 = vld [vmem:[#allocation8 + $0xa88] ss:$28 sps:$4 sm:$0xff]  }
 0x53e   :  { %v7519_v34 = vld [vmem:[#allocation8 + $0x904] ss:$28 sps:$4 sm:$0xff]  }
 0x53f   :  { %4725 = vmatmul.mubr.bf16.vlgmr.msra.gmra.mxu1 %v9190_v12 }
 0x540   :  { %4740 = vmatpush1.bf16.msra.mxu0 %v7433_v35  ;;  %4775 = vmatpush1.bf16.msra.mxu1 %v7436_v36  ;;  %v7522_v35 = vld [vmem:[#allocation8 + $0x19c] ss:$28 sps:$4 sm:$0xff]  }
 0x541   :  { %4806 = vmatprep.mubr.bf16.mxu1 %v9205_v11  ;;  %4741 = vmatprep.subr.bf16.mxu0 %v7441_v37  ;;  %v7517_v36 = vld [vmem:[#allocation8 + $0x900] ss:$28 sps:$4 sm:$0xff]   ;;  %v7525_v37 = vld [vmem:[#allocation8 + $0x8cc] ss:$28 sps:$4 sm:$0xff]  }
 0x542   :  { %4776 = vmatprep.subr.bf16.mxu1 %v7444_v38  ;;  %v7520_v38 = vld [vmem:[#allocation8 + $0x198] ss:$28 sps:$4 sm:$0xff]  }
 0x544   :  { %4742 = vmatpush1.bf16.msra.mxu0 %v7439_v39  ;;  %4777 = vmatpush1.bf16.msra.mxu1 %v7442_v40  ;;  %v7523_v39 = vld [vmem:[#allocation8 + $0x8c8] ss:$28 sps:$4 sm:$0xff]  }
 0x545   :  { %4743 = vmatprep.subr.bf16.mxu0 %v7447_v41  ;;  %4778 = vmatprep.subr.bf16.mxu1 %v7450_v42  ;;  %v7528_v40 = vld [vmem:[#allocation8 + $0x164] ss:$28 sps:$4 sm:$0xff]   ;;  %v7531_v41 = vld [vmem:[#allocation8 + $0x51c] ss:$28 sps:$4 sm:$0xff]  }
 0x546   :  { %v7526_v42 = vld [vmem:[#allocation8 + $0x160] ss:$28 sps:$4 sm:$0xff]  }
 0x548   :  { %4744 = vmatpush1.bf16.msra.mxu0 %v7445_v43  ;;  %4779 = vmatpush1.bf16.msra.mxu1 %v7448_v44  ;;  %v7529_v43 = vld [vmem:[#allocation8 + $0x518] ss:$28 sps:$4 sm:$0xff]   ;;  %v7534_v44 = vld [vmem:[#allocation8 + $0x12c] ss:$28 sps:$4 sm:$0xff]  }
 0x549   :  { %4745 = vmatprep.subr.bf16.mxu0 %v7453_v45  ;;  %4780 = vmatprep.subr.bf16.mxu1 %v7456_v46  ;;  %v7537_v45 = vld [vmem:[#allocation8 + $0x4e4] ss:$28 sps:$4 sm:$0xff]  }
 0x54a   :  { %v7532_v46 = vld [vmem:[#allocation8 + $0x128] ss:$28 sps:$4 sm:$0xff]  }
 0x54c   :  { %4746 = vmatpush1.bf16.msra.mxu0 %v7451_v47  ;;  %4781 = vmatpush1.bf16.msra.mxu1 %v7454_v48  ;;  %v7535_v47 = vld [vmem:[#allocation8 + $0x4e0] ss:$28 sps:$4 sm:$0xff]   ;;  %v7540_v48 = vld [vmem:[#allocation8 + $0xf4] ss:$28 sps:$4 sm:$0xff]  }
 0x54d   :  { %4747 = vmatprep.subr.bf16.mxu0 %v7459_v49  ;;  %4782 = vmatprep.subr.bf16.mxu1 %v7462_v50  ;;  %v7543_v49 = vld [vmem:[#allocation8 + $0x4ac] ss:$28 sps:$4 sm:$0xff]  }
 0x54e   :  { %v7538_v50 = vld [vmem:[#allocation8 + $0xf0] ss:$28 sps:$4 sm:$0xff]  }
 0x550   :  { %4748 = vmatpush1.bf16.msra.mxu0 %v7457_v53  ;;  %4783 = vmatpush1.bf16.msra.mxu1 %v7460_v29  ;;  %v7541_v53 = vld [vmem:[#allocation8 + $0x4a8] ss:$28 sps:$4 sm:$0xff]   ;;  %v7546_v29 = vld [vmem:[#allocation8 + $0xbc] ss:$28 sps:$4 sm:$0xff]  }
 0x551   :  { %4749 = vmatprep.subr.bf16.mxu0 %v7465_v30  ;;  %4784 = vmatprep.subr.bf16.mxu1 %v7468_v32  ;;  %v7549_v30 = vld [vmem:[#allocation8 + $0x474] ss:$28 sps:$4 sm:$0xff]  }
 0x552   :  { %v7544_v32 = vld [vmem:[#allocation8 + $0xb8] ss:$28 sps:$4 sm:$0xff]  }
 0x554   :  { %4750 = vmatpush2.bf16.msra.mxu0 %v7463_v54  ;;  %4785 = vmatpush1.bf16.msra.mxu1 %v7466_v61  ;;  %v7547_v54 = vld [vmem:[#allocation8 + $0x470] ss:$28 sps:$4 sm:$0xff]   ;;  %v7552_v61 = vld [vmem:[#allocation8 + $0x84] ss:$28 sps:$4 sm:$0xff]  }
 0x555   :  { %4751 = vmatprep.subr.bf16.mxu0 %v7471_v9  ;;  %4786 = vmatprep.subr.bf16.mxu1 %v7474_v3  ;;  %v7555_v9 = vld [vmem:[#allocation8 + $0x43c] ss:$28 sps:$4 sm:$0xff]  }
 0x556   :  { %v7550_v3 = vld [vmem:[#allocation8 + $0x80] ss:$28 sps:$4 sm:$0xff]  }
 0x558   :  { %4752 = vmatpush2.bf16.msra.mxu0 %v7469_v28  ;;  %4787 = vmatpush1.bf16.msra.mxu1 %v7472_v62  ;;  %v7553_v28 = vld [vmem:[#allocation8 + $0x438] ss:$28 sps:$4 sm:$0xff]   ;;  %v7558_v62 = vld [vmem:[#allocation8 + $0x4c] ss:$28 sps:$4 sm:$0xff]  }
 0x559   :  { %4753 = vmatprep.subr.bf16.mxu0 %v7477_v7  ;;  %4788 = vmatprep.subr.bf16.mxu1 %v7480_v4  ;;  %v7561_v7 = vld [vmem:[#allocation8 + $0x404] ss:$28 sps:$4 sm:$0xff]  }
 0x55a   :  { %v7556_v4 = vld [vmem:[#allocation8 + $0x48] ss:$28 sps:$4 sm:$0xff]  }
 0x55c   :  { %4754 = vmatpush2.bf16.msra.mxu0 %v7475_v55  ;;  %4789 = vmatpush1.bf16.msra.mxu1 %v7478_v13  ;;  %v7559_v55 = vld [vmem:[#allocation8 + $0x400] ss:$28 sps:$4 sm:$0xff]   ;;  %v7564_v13 = vld [vmem:[#allocation8 + $0x14] ss:$28 sps:$4 sm:$0xff]  }
 0x55d   :  { %4755 = vmatprep.subr.bf16.mxu0 %v7483_v16  ;;  %4790 = vmatprep.subr.bf16.mxu1 %v7486_v17  ;;  %v7567_v16 = vld [vmem:[#allocation8 + $0x3cc] ss:$28 sps:$4 sm:$0xff]  }
 0x55e   :  { %v7562_v17 = vld [vmem:[#allocation8 + $0x10] ss:$28 sps:$4 sm:$0xff]  }
 0x560   :  { %4756 = vmatpush2.bf16.msra.mxu0 %v7481_v18  ;;  %4791 = vmatpush2.bf16.msra.mxu1 %v7484_v31  ;;  %v7565_v18 = vld [vmem:[#allocation8 + $0x3c8] ss:$28 sps:$4 sm:$0xff]   ;;  %v7570_v31 = vld [vmem:[#allocation8 + $0x35c] ss:$28 sps:$4 sm:$0xff]  }
 0x561   :  { %4757 = vmatprep.subr.bf16.mxu0 %v7489_v20  ;;  %4792 = vmatprep.subr.bf16.mxu1 %v7492_v22  ;;  %v7573_v20 = vld [vmem:[#allocation8 + $0x394] ss:$28 sps:$4 sm:$0xff]  }
 0x562   :  { %v7568_v22 = vld [vmem:[#allocation8 + $0x358] ss:$28 sps:$4 sm:$0xff]  }
 0x564   :  { %4758 = vmatpush2.bf16.msra.mxu0 %v7487_v51  ;;  %4793 = vmatpush2.bf16.msra.mxu1 %v7490_v23  ;;  %v7571_v51 = vld [vmem:[#allocation8 + $0x390] ss:$28 sps:$4 sm:$0xff]   ;;  %v7576_v23 = vld [vmem:[#allocation8 + $0x324] ss:$28 sps:$4 sm:$0xff]  }
 0x565   :  { %4759 = vmatprep.subr.bf16.mxu0 %v7495_v52  ;;  %4794 = vmatprep.subr.bf16.mxu1 %v7498_v5  ;;  %v7579_v52 = vld [vmem:[#allocation8 + $0x6dc] ss:$28 sps:$4 sm:$0xff]  }
 0x566   :  { %v7574_v5 = vld [vmem:[#allocation8 + $0x320] ss:$28 sps:$4 sm:$0xff]  }
 0x568   :  { %4760 = vmatpush2.bf16.msra.mxu0 %v7493_v10  ;;  %4795 = vmatpush2.bf16.msra.mxu1 %v7496_v25  ;;  %v7577_v10 = vld [vmem:[#allocation8 + $0x6d8] ss:$28 sps:$4 sm:$0xff]   ;;  %v7582_v25 = vld [vmem:[#allocation8 + $0x2ec] ss:$28 sps:$4 sm:$0xff]  }
 0x569   :  { %4761 = vmatprep.subr.bf16.mxu0 %v7501_v26  ;;  %4796 = vmatprep.subr.bf16.mxu1 %v7504_v1  ;;  %v7585_v26 = vld [vmem:[#allocation8 + $0x6a4] ss:$28 sps:$4 sm:$0xff]  }
 0x56a   :  { %v7580_v1 = vld [vmem:[#allocation8 + $0x2e8] ss:$28 sps:$4 sm:$0xff]  }
 0x56c   :  { %4762 = vmatpush2.bf16.msra.mxu0 %v7499_v0  ;;  %4797 = vmatpush2.bf16.msra.mxu1 %v7502_v2  ;;  %v7583_v0 = vld [vmem:[#allocation8 + $0x6a0] ss:$28 sps:$4 sm:$0xff]   ;;  %v7588_v2 = vld [vmem:[#allocation8 + $0x2b4] ss:$28 sps:$4 sm:$0xff]  }
 0x56d   :  { %4763 = vmatprep.subr.bf16.mxu0 %v7507_v6  ;;  %4798 = vmatprep.subr.bf16.mxu1 %v7510_v8  ;;  %v7591_v6 = vld [vmem:[#allocation8 + $0x66c] ss:$28 sps:$4 sm:$0xff]  }
 0x56e   :  { %v7586_v8 = vld [vmem:[#allocation8 + $0x2b0] ss:$28 sps:$4 sm:$0xff]  }
 0x570   :  { %4764 = vmatpush2.bf16.msra.mxu0 %v7505_v24  ;;  %4799 = vmatpush2.bf16.msra.mxu1 %v7508_v19  ;;  %v7589_v24 = vld [vmem:[#allocation8 + $0x668] ss:$28 sps:$4 sm:$0xff]   ;;  %v7594_v19 = vld [vmem:[#allocation8 + $0x27c] ss:$28 sps:$4 sm:$0xff]  }
 0x571   :  { %4800 = vmatprep.subr.bf16.mxu1 %v7513_v63  ;;  %4829 = vmatprep.subr.bf16.mxu0 %v7516_v14  ;;  %v7597_v63 = vld [vmem:[#allocation8 + $0x634] ss:$28 sps:$4 sm:$0xff]  }
 0x572   :  { %v7592_v14 = vld [vmem:[#allocation8 + $0x278] ss:$28 sps:$4 sm:$0xff]  }
 0x573   :  { %4766 = vmatmul.mubr.bf16.vlgmr.msra.gmra.mxu0 %v9200_v21 }
 0x574   :  { %4801 = vmatpush2.bf16.msra.mxu1 %v7511_v15  ;;  %4830 = vmatpush1.bf16.msra.mxu0 %v7514_v33  ;;  %v7595_v15 = vld [vmem:[#allocation8 + $0x630] ss:$28 sps:$4 sm:$0xff]   ;;  %v7600_v33 = vld [vmem:[#allocation8 + $0x244] ss:$28 sps:$4 sm:$0xff]  }
 0x575   :  { %4802 = vmatprep.subr.bf16.mxu1 %v7519_v34  ;;  %4847 = vmatprep.mubr.bf16.mxu0 %v7948_v59  ;;  %v7603_v34 = vld [vmem:[#allocation8 + $0x5fc] ss:$28 sps:$4 sm:$0xff]  }
 0x576   :  { %4856 = vmatprep.subr.bf16.mxu0 %v7522_v35  ;;  %v7598_v35 = vld [vmem:[#allocation8 + $0x240] ss:$28 sps:$4 sm:$0xff]  }
 0x578   :  { %4803 = vmatpush2.bf16.msra.mxu1 %v7517_v36  ;;  %v7601_v36 = vld [vmem:[#allocation8 + $0x5f8] ss:$28 sps:$4 sm:$0xff]  }
 0x579   :  { %4804 = vmatprep.subr.bf16.mxu1 %v7525_v37  ;;  %v7606_v37 = vld [vmem:[#allocation8 + $0x20c] ss:$28 sps:$4 sm:$0xff]  }
 0x57b   :  { %6701 = vmatmul.mubr.msk.bf16.vlgmr.msra.gmra.mxu0 %vm1134_vm1, %v9210_v60 }
 0x57c   :  { %4857 = vmatpush1.bf16.msra.mxu0 %v7520_v38  ;;  %4805 = vmatpush2.bf16.msra.mxu1 %v7523_v39  ;;  %v7609_v38 = vld [vmem:[#allocation8 + $0x5c4] ss:$28 sps:$4 sm:$0xff]   ;;  %v9230_v39 = vld [vmem:[#allocation10] sm:$0x7f] }
 0x57d   :  { %4888 = vmatprep.mubr.bf16.mxu0 %v9188_v57  ;;  %4858 = vmatprep.subr.bf16.mxu0 %v7528_v40  ;;  %v7604_v40 = vld [vmem:[#allocation8 + $0x208] ss:$28 sps:$4 sm:$0xff]  }
 0x57e   :  { %4897 = vmatprep.subr.bf16.mxu1 %v7531_v41  ;;  %v7607_v41 = vld [vmem:[#allocation8 + $0x5c0] ss:$28 sps:$4 sm:$0xff]  }
 0x57f   :  { %4807 = vmatmul.mubr.bf16.vlgmr.msra.gmra.mxu1 %v9217_v27 }
 0x580   :  { %4859 = vmatpush1.bf16.msra.mxu0 %v7526_v42  ;;  %4898 = vmatpush1.bf16.msra.mxu1 %v7529_v43  ;;  %v7612_v42 = vld [vmem:[#allocation8 + $0x1d4] ss:$28 sps:$4 sm:$0xff]   ;;  %v7615_v43 = vld [vmem:[#allocation8 + $0x58c] ss:$28 sps:$4 sm:$0xff]  }
 0x581   :  { %4929 = vmatprep.mubr.bf16.mxu1 %v9198_v58  ;;  %4860 = vmatprep.subr.bf16.mxu0 %v7534_v44  ;;  %v10014_v44 = vld [vmem:[#allocation22_spill] sm:$0xff] }
 0x582   :  { %4899 = vmatprep.subr.bf16.mxu1 %v7537_v45  ;;  %v2729_v45 = vrot.slane %v9230_v39, %v10014_v44 }
 0x584   :  { %4861 = vmatpush1.bf16.msra.mxu0 %v7532_v46  ;;  %4900 = vmatpush1.bf16.msra.mxu1 %v7535_v47  ;;  %v10015_v47 = vld [vmem:[#allocation20_spill] sm:$0xff] }
 0x585   :  { %4862 = vmatprep.subr.bf16.mxu0 %v7540_v48  ;;  %4901 = vmatprep.subr.bf16.mxu1 %v7543_v49  ;;  %v2733_v48 = vrot.slane %v9230_v39, %v10015_v47  ;;  %v7610_v49 = vld [vmem:[#allocation8 + $0x1d0] ss:$28 sps:$4 sm:$0xff]  }
 0x588   :  { %4863 = vmatpush1.bf16.msra.mxu0 %v7538_v50  ;;  %4902 = vmatpush1.bf16.msra.mxu1 %v7541_v53  ;;  %v7613_v50 = vld [vmem:[#allocation8 + $0x588] ss:$28 sps:$4 sm:$0xff]  }
 0x589   :  { %4864 = vmatprep.subr.bf16.mxu0 %v7546_v29  ;;  %4903 = vmatprep.subr.bf16.mxu1 %v7549_v30  ;;  %v7618_v29 = vld [vmem:[#allocation8 + $0x89c] ss:$28 sps:$4 sm:$0xff]   ;;  %v7621_v30 = vld [vmem:[#allocation8 + $0x554] ss:$28 sps:$4 sm:$0xff]  }
 0x58c   :  { %4865 = vmatpush1.bf16.msra.mxu0 %v7544_v32  ;;  %4904 = vmatpush1.bf16.msra.mxu1 %v7547_v54 }
 0x58d   :  { %4866 = vmatprep.subr.bf16.mxu0 %v7552_v61  ;;  %4905 = vmatprep.subr.bf16.mxu1 %v7555_v9 }
 0x590   :  { %4867 = vmatpush1.bf16.msra.mxu0 %v7550_v3  ;;  %4906 = vmatpush1.bf16.msra.mxu1 %v7553_v28  ;;  %v7616_v28 = vld [vmem:[#allocation8 + $0x898] ss:$28 sps:$4 sm:$0xff]  }
 0x591   :  { %4868 = vmatprep.subr.bf16.mxu0 %v7558_v62  ;;  %4907 = vmatprep.subr.bf16.mxu1 %v7561_v7 }
 0x594   :  { %4869 = vmatpush1.bf16.msra.mxu0 %v7556_v4  ;;  %4908 = vmatpush1.bf16.msra.mxu1 %v7559_v55  ;;  %v7619_v4 = vld [vmem:[#allocation8 + $0x550] ss:$28 sps:$4 sm:$0xff]   ;;  %v7624_v55 = vld [vmem:[#allocation8 + $0x864] ss:$28 sps:$4 sm:$0xff]  }
 0x595   :  { %4870 = vmatprep.subr.bf16.mxu0 %v7564_v13  ;;  %4909 = vmatprep.subr.bf16.mxu1 %v7567_v16  ;;  %v7630_v16 = vld [vmem:[#allocation8 + $0xa94] ss:$28 sps:$4 sm:$0xff]  }
 0x598   :  { %4871 = vmatpush1.bf16.msra.mxu0 %v7562_v17  ;;  %4910 = vmatpush1.bf16.msra.mxu1 %v7565_v18  ;;  %v7622_v18 = vld [vmem:[#allocation8 + $0x860] ss:$28 sps:$4 sm:$0xff]  }
 0x599   :  { %4872 = vmatprep.subr.bf16.mxu0 %v7570_v31  ;;  %4911 = vmatprep.subr.bf16.mxu1 %v7573_v20  ;;  %v7627_v20 = vld [vmem:[#allocation8 + $0x82c] ss:$28 sps:$4 sm:$0xff]  }
 0x59c   :  { %4873 = vmatpush2.bf16.msra.mxu0 %v7568_v22  ;;  %4912 = vmatpush1.bf16.msra.mxu1 %v7571_v51  ;;  %v7628_v22 = vld [vmem:[#allocation8 + $0xa90] ss:$28 sps:$4 sm:$0xff]   ;;  %v7634_v51 = vld [vmem:[#allocation8 + $0x360] ss:$28 sps:$4 sm:$0xff]  }
 0x59d   :  { %4874 = vmatprep.subr.bf16.mxu0 %v7576_v23  ;;  %4913 = vmatprep.subr.bf16.mxu1 %v7579_v52  ;;  %v7625_v52 = vld [vmem:[#allocation8 + $0x828] ss:$28 sps:$4 sm:$0xff]  }
 0x5a0   :  { %4875 = vmatpush2.bf16.msra.mxu0 %v7574_v5  ;;  %4914 = vmatpush2.bf16.msra.mxu1 %v7577_v10  ;;  %v7633_v10 = vld [vmem:[#allocation8 + $0x7f4] ss:$28 sps:$4 sm:$0xff]  }
 0x5a1   :  { %4876 = vmatprep.subr.bf16.mxu0 %v7582_v25  ;;  %4915 = vmatprep.subr.bf16.mxu1 %v7585_v26  ;;  %v7631_v26 = vld [vmem:[#allocation8 + $0x7f0] ss:$28 sps:$4 sm:$0xff]  }
 0x5a4   :  { %4877 = vmatpush2.bf16.msra.mxu0 %v7580_v1  ;;  %4916 = vmatpush2.bf16.msra.mxu1 %v7583_v0  ;;  %v7635_v0 = vld [vmem:[#allocation8 + $0x1a0] ss:$28 sps:$4 sm:$0xff]  }
 0x5a5   :  { %4878 = vmatprep.subr.bf16.mxu0 %v7588_v2  ;;  %4917 = vmatprep.subr.bf16.mxu1 %v7591_v6  ;;  %v7638_v2 = vld [vmem:[#allocation8 + $0x7bc] ss:$28 sps:$4 sm:$0xff]   ;;  %v7639_v6 = vld [vmem:[#allocation8 + $0x328] ss:$28 sps:$4 sm:$0xff]  }
 0x5a8   :  { %4879 = vmatpush2.bf16.msra.mxu0 %v7586_v8  ;;  %4918 = vmatpush2.bf16.msra.mxu1 %v7589_v24  ;;  %v7636_v8 = vld [vmem:[#allocation8 + $0x7b8] ss:$28 sps:$4 sm:$0xff]   ;;  %v7640_v24 = vld [vmem:[#allocation8 + $0x168] ss:$28 sps:$4 sm:$0xff]  }
 0x5a9   :  { %4880 = vmatprep.subr.bf16.mxu0 %v7594_v19  ;;  %4919 = vmatprep.subr.bf16.mxu1 %v7597_v63  ;;  %v7643_v19 = vld [vmem:[#allocation8 + $0x784] ss:$28 sps:$4 sm:$0xff]  }
 0x5aa   :  { %v7641_v63 = vld [vmem:[#allocation8 + $0x780] ss:$28 sps:$4 sm:$0xff]  }
 0x5ac   :  { %4881 = vmatpush2.bf16.msra.mxu0 %v7592_v14  ;;  %4920 = vmatpush2.bf16.msra.mxu1 %v7595_v15  ;;  %v7645_v14 = vld [vmem:[#allocation8 + $0x130] ss:$28 sps:$4 sm:$0xff]  }
 0x5ad   :  { %4882 = vmatprep.subr.bf16.mxu0 %v7600_v33  ;;  %4921 = vmatprep.subr.bf16.mxu1 %v7603_v34  ;;  %v7648_v15 = vld [vmem:[#allocation8 + $0x74c] ss:$28 sps:$4 sm:$0xff]   ;;  %v7649_v33 = vld [vmem:[#allocation8 + $0x2b8] ss:$28 sps:$4 sm:$0xff]  }
 0x5ae   :  { %v7646_v34 = vld [vmem:[#allocation8 + $0x748] ss:$28 sps:$4 sm:$0xff]  }
 0x5b0   :  { %4883 = vmatpush2.bf16.msra.mxu0 %v7598_v35  ;;  %4922 = vmatpush2.bf16.msra.mxu1 %v7601_v36  ;;  %v7650_v35 = vld [vmem:[#allocation8 + $0xf8] ss:$28 sps:$4 sm:$0xff]  }
 0x5b1   :  { %4884 = vmatprep.subr.bf16.mxu0 %v7606_v37  ;;  %4923 = vmatprep.subr.bf16.mxu1 %v7609_v38  ;;  %v7653_v36 = vld [vmem:[#allocation8 + $0x714] ss:$28 sps:$4 sm:$0xff]   ;;  %v7655_v38 = vld [vmem:[#allocation8 + $0xc0] ss:$28 sps:$4 sm:$0xff]  }
 0x5b2   :  { %v7651_v37 = vld [vmem:[#allocation8 + $0x710] ss:$28 sps:$4 sm:$0xff]  }
 0x5b3   :  { %v4562_v46 = vpop.f32.mrf.mxu0 }
 0x5b4   :  { %4885 = vmatpush2.bf16.msra.mxu0 %v7604_v40  ;;  %4924 = vmatpush2.bf16.msra.mxu1 %v7607_v41  ;;  %v4563_v32 = vadd.f32 %v4562_v46, %v2729_v45  ;;  %v7658_v40 = vld [vmem:[#allocation8 + $0xa5c] ss:$28 sps:$4 sm:$0xff]   ;;  %v7659_v41 = vld [vmem:[#allocation8 + $0x248] ss:$28 sps:$4 sm:$0xff]   ;;  %v7664_v46 = vld [vmem:[#allocation8 + $0x210] ss:$28 sps:$4 sm:$0xff]  }
 0x5b5   :  { %v4564_v53 = vpop.f32.mrf.mxu0  ;;  %4886 = vmatprep.subr.bf16.mxu0 %v7612_v42  ;;  %4925 = vmatprep.subr.bf16.mxu1 %v7615_v43  ;;  %v7656_v42 = vld [vmem:[#allocation8 + $0xa58] ss:$28 sps:$4 sm:$0xff]   ;;  %v7660_v43 = vld [vmem:[#allocation8 + $0x88] ss:$28 sps:$4 sm:$0xff]  }
 0x5b6   :  { %v4565_v9 = vadd.f32 %v4564_v53, %v2733_v48  ;;  %v7663_v45 = vld [vmem:[#allocation8 + $0xa24] ss:$28 sps:$4 sm:$0xff]   ;;  %v7669_v53 = vld [vmem:[#allocation8 + $0x1d8] ss:$28 sps:$4 sm:$0xff]  }
 0x5b7   :  { %v4566_v54 = vpop.f32.mrf.mxu0  ;;  %v4603_v61 = vpop.f32.mrf.mxu1  ;;  %v7661_v48 = vld [vmem:[#allocation8 + $0xa20] ss:$28 sps:$4 sm:$0xff]  }
 0x5b8   :  { %4887 = vmatpush2.bf16.msra.mxu0 %v7610_v49  ;;  %v9236_v3 = vadd.f32 %v4603_v61, %v4563_v32  ;;  %4926 = vmatpush2.bf16.msra.mxu1 %v7613_v50  ;;  %v7665_v49 = vld [vmem:[#allocation8 + $0x50] ss:$28 sps:$4 sm:$0xff]   ;;  %v7674_v54 = vld [vmem:[#allocation8 + $0x6e0] ss:$28 sps:$4 sm:$0xff]  }
 0x5b9   :  { %v4567_v62 = vpop.f32.mrf.mxu0  ;;  %v4605_v7 = vpop.f32.mrf.mxu1  ;;  %4938 = vmatprep.subr.bf16.mxu0 %v7618_v29  ;;  %4927 = vmatprep.subr.bf16.mxu1 %v7621_v30  ;;  %v7668_v50 = vld [vmem:[#allocation8 + $0x9ec] ss:$28 sps:$4 sm:$0xff]   ;;  %v7670_v30 = vld [vmem:[#allocation8 + $0x18] ss:$28 sps:$4 sm:$0xff]  }
 0x5ba   :  { %v9238_v13 = vadd.f32 %v4605_v7, %v4565_v9  ;;  %v7666_v29 = vld [vmem:[#allocation8 + $0x9e8] ss:$28 sps:$4 sm:$0xff]   ;;  %v7673_v32 = vld [vmem:[#allocation8 + $0x9b4] ss:$28 sps:$4 sm:$0xff]   ;;  %v7675_v9 = vld [vmem:[#allocation8 + $0x520] ss:$28 sps:$4 sm:$0xff]  }
 0x5bb   :  { %4889 = vmatmul.mubr.bf16.vlgmr.msra.gmra.mxu0 %v9190_v12  ;;  %v4607_v17 = vpop.f32.mrf.mxu1  ;;  %v7671_v61 = vld [vmem:[#allocation8 + $0x9b0] ss:$28 sps:$4 sm:$0xff]   ;;  %v7679_v62 = vld [vmem:[#allocation8 + $0x6a8] ss:$28 sps:$4 sm:$0xff]   ;;  %v7676_v7 = vld [vmem:[#allocation8 + $0x978] ss:$28 sps:$4 sm:$0xff]  }
 0x5bc   :  { %4939 = vmatpush1.bf16.msra.mxu0 %v7616_v28  ;;  %4970 = vmatprep.mubr.bf16.mxu0 %v9205_v11  ;;  %v7678_v28 = vld [vmem:[#allocation8 + $0x97c] ss:$28 sps:$4 sm:$0xff]  }
 0x5bd   :  { %4928 = vmatpush2.bf16.msra.mxu1 %v7619_v4  ;;  %v4608_v31 = vpop.f32.mrf.mxu1  ;;  %4940 = vmatprep.subr.bf16.mxu0 %v7624_v55  ;;  %v7680_v4 = vld [vmem:[#allocation8 + $0x4e8] ss:$28 sps:$4 sm:$0xff]   ;;  %v7681_v17 = vld [vmem:[#allocation8 + $0x940] ss:$28 sps:$4 sm:$0xff]  }
 0x5be   :  { %4993 = vmatprep.subr.bf16.mxu1 %v7630_v16  ;;  %v7683_v55 = vld [vmem:[#allocation8 + $0x944] ss:$28 sps:$4 sm:$0xff]   ;;  %v7684_v16 = vld [vmem:[#allocation8 + $0x670] ss:$28 sps:$4 sm:$0xff]  }
 0x5bf   :  { %v9242_v23 = vpop.f32.mrf.mxu1  ;;  %v7688_v31 = vld [vmem:[#allocation8 + $0x90c] ss:$28 sps:$4 sm:$0xff]  }
 0x5c0   :  { %4930 = vmatmul.mubr.bf16.vlgmr.msra.gmra.mxu1 %v9200_v21  ;;  %4941 = vmatpush1.bf16.msra.mxu0 %v7622_v18  ;;  %v7685_v18 = vld [vmem:[#allocation8 + $0x4b0] ss:$28 sps:$4 sm:$0xff]  }
 0x5c1   :  { %v9245_v5 = vpop.f32.mrf.mxu1  ;;  %4942 = vmatprep.subr.bf16.mxu0 %v7627_v20  ;;  %4994 = vmatpush1.bf16.msra.mxu1 %v7628_v22  ;;  %v7689_v20 = vld [vmem:[#allocation8 + $0x638] ss:$28 sps:$4 sm:$0xff]  }
 0x5c2   :  { %5011 = vmatprep.mubr.bf16.mxu1 %v7948_v59  ;;  %6946 = vmatprep.subr.bf16.mxu1 %v7634_v51  ;;  %v7644_v59 = vld [vmem:[#allocation8 + $0x2f0] ss:$28 sps:$4 sm:$0xff]   ;;  %v7690_v22 = vld [vmem:[#allocation8 + $0x478] ss:$28 sps:$4 sm:$0xff]  }
 0x5c3   :  { %v4689_v25 = vpop.f32.mrf.mxu1  ;;  %v7693_v51 = vld [vmem:[#allocation8 + $0x8d4] ss:$28 sps:$4 sm:$0xff]  }
 0x5c4   :  { %4943 = vmatpush1.bf16.msra.mxu0 %v7625_v52  ;;  %v7691_v25 = vld [vmem:[#allocation8 + $0x8d0] ss:$28 sps:$4 sm:$0xff]  }
 0x5c5   :  { %v4690_v1 = vpop.f32.mrf.mxu1  ;;  %4944 = vmatprep.subr.bf16.mxu0 %v7633_v10 }
 0x5c6   :  { %v7695_v1 = vld [vmem:[#allocation8 + $0x440] ss:$28 sps:$4 sm:$0xff]  }
 0x5c8   :  { %4945 = vmatpush1.bf16.msra.mxu0 %v7631_v26  ;;  %6702 = vmatmul.mubr.msk.bf16.vlgmr.msra.gmra.mxu1 %vm1134_vm1, %v9210_v60 }
 0x5c9   :  { %6947 = vmatpush3.bf16.msra.mxu1 %v7635_v0  ;;  %5052 = vmatprep.mubr.bf16.mxu1 %v9188_v57  ;;  %v7654_v57 = vld [vmem:[#allocation8 + $0x280] ss:$28 sps:$4 sm:$0xff]  }
 0x5ca   :  { %4946 = vmatprep.subr.bf16.mxu0 %v7638_v2  ;;  %6948 = vmatprep.subr.bf16.mxu1 %v7639_v6  ;;  %v7697_v0 = vld [vmem:[#allocation8 + $0xa60] ss:$28 sps:$4 sm:$0xff]  }
 0x5cc   :  { %4947 = vmatpush1.bf16.msra.mxu0 %v7636_v8  ;;  %v7696_v8 = vld [vmem:[#allocation8 + $0x5c8] ss:$28 sps:$4 sm:$0xff]  }
 0x5cd   :  { %6949 = vmatpush3.bf16.msra.mxu1 %v7640_v24  ;;  %4948 = vmatprep.subr.bf16.mxu0 %v7643_v19 }
 0x5ce   :  { %6950 = vmatprep.subr.bf16.mxu1 %v7644_v59 }
 0x5d0   :  { %4949 = vmatpush1.bf16.msra.mxu0 %v7641_v63  ;;  %v7698_v63 = vld [vmem:[#allocation8 + $0x408] ss:$28 sps:$4 sm:$0xff]  }
 0x5d1   :  { %6951 = vmatpush3.bf16.msra.mxu1 %v7645_v14  ;;  %4950 = vmatprep.subr.bf16.mxu0 %v7648_v15  ;;  %v7701_v14 = vld [vmem:[#allocation8 + $0xa28] ss:$28 sps:$4 sm:$0xff]   ;;  %v7700_v15 = vld [vmem:[#allocation8 + $0x590] ss:$28 sps:$4 sm:$0xff]  }
 0x5d2   :  { %6952 = vmatprep.subr.bf16.mxu1 %v7649_v33  ;;  %v7704_v33 = vld [vmem:[#allocation8 + $0x558] ss:$28 sps:$4 sm:$0xff]  }
 0x5d4   :  { %4951 = vmatpush1.bf16.msra.mxu0 %v7646_v34 }
 0x5d5   :  { %6953 = vmatpush3.bf16.msra.mxu1 %v7650_v35  ;;  %4952 = vmatprep.subr.bf16.mxu0 %v7653_v36  ;;  %v7707_v35 = vld [vmem:[#allocation8 + $0x830] ss:$28 sps:$4 sm:$0xff]  }
 0x5d6   :  { %6954 = vmatprep.subr.bf16.mxu1 %v7654_v57  ;;  %v7706_v57 = vld [vmem:[#allocation8 + $0x398] ss:$28 sps:$4 sm:$0xff]  }
 0x5d8   :  { %4953 = vmatpush1.bf16.msra.mxu0 %v7651_v37  ;;  %v7708_v37 = vld [vmem:[#allocation8 + $0x9b8] ss:$28 sps:$4 sm:$0xff]  }
 0x5d9   :  { %6955 = vmatpush3.bf16.msra.mxu1 %v7655_v38  ;;  %4954 = vmatprep.subr.bf16.mxu0 %v7658_v40  ;;  %v7709_v40 = vld [vmem:[#allocation8 + $0x7f8] ss:$28 sps:$4 sm:$0xff]  }
 0x5da   :  { %6956 = vmatprep.subr.bf16.mxu1 %v7659_v41  ;;  %v7710_v41 = vld [vmem:[#allocation8 + $0x980] ss:$28 sps:$4 sm:$0xff]  }
 0x5dc   :  { %4955 = vmatpush2.bf16.msra.mxu0 %v7656_v42  ;;  %v7712_v42 = vld [vmem:[#allocation8 + $0xa98] ss:$28 sps:$4 sm:$0xff]  }
 0x5dd   :  { %6957 = vmatpush3.bf16.msra.mxu1 %v7660_v43  ;;  %4956 = vmatprep.subr.bf16.mxu0 %v7663_v45  ;;  %v7711_v43 = vld [vmem:[#allocation8 + $0x7c0] ss:$28 sps:$4 sm:$0xff]   ;;  %v7713_v45 = vld [vmem:[#allocation8 + $0x948] ss:$28 sps:$4 sm:$0xff]  }
 0x5de   :  { %6958 = vmatprep.subr.bf16.mxu1 %v7664_v46  ;;  %v7714_v46 = vld [vmem:[#allocation8 + $0x788] ss:$28 sps:$4 sm:$0xff]  }
 0x5e0   :  { %4957 = vmatpush2.bf16.msra.mxu0 %v7661_v48  ;;  %v7715_v48 = vld [vmem:[#allocation8 + $0x910] ss:$28 sps:$4 sm:$0xff]  }
 0x5e1   :  { %6959 = vmatpush3.bf16.msra.mxu1 %v7665_v49  ;;  %4958 = vmatprep.subr.bf16.mxu0 %v7668_v50  ;;  %v7716_v49 = vld [vmem:[#allocation8 + $0x750] ss:$28 sps:$4 sm:$0xff]   ;;  %v7717_v50 = vld [vmem:[#allocation8 + $0x8d8] ss:$28 sps:$4 sm:$0xff]  }
 0x5e2   :  { %6960 = vmatprep.subr.bf16.mxu1 %v7669_v53  ;;  %v10016_v53 = vld [vmem:[#allocation19_spill] sm:$0xff] }
 0x5e4   :  { %4959 = vmatpush2.bf16.msra.mxu0 %v7666_v29  ;;  %v2737_v29 = vrot.slane %v9230_v39, %v10016_v53 }
 0x5e5   :  { %6961 = vmatpush3.bf16.msra.mxu1 %v7670_v30  ;;  %4960 = vmatprep.subr.bf16.mxu0 %v7673_v32  ;;  %v10017_v30 = vld [vmem:[#allocation21_spill] sm:$0xff] }
 0x5e6   :  { %6968 = vmatprep.subr.bf16.mxu1 %v7674_v54  ;;  %v2741_v32 = vrot.slane %v9230_v39, %v10017_v30 }
 0x5e8   :  { %5053 = vmatmul.mubr.bf16.vlgmr.msra.gmra.mxu1 %v9190_v12  ;;  %4961 = vmatpush2.bf16.msra.mxu0 %v7671_v61  ;;  %v7686_v12 = vld [vmem:[#allocation8 + $0x908] ss:$28 sps:$4 sm:$0xff]  }
 0x5e9   :  { %6969 = vmatpush3.bf16.msra.mxu1 %v7675_v9  ;;  %5092 = vmatprep.mubr.bf16.mxu1 %v9198_v58  ;;  %v7694_v58 = vld [vmem:[#allocation8 + $0x600] ss:$28 sps:$4 sm:$0xff]  }
 0x5ea   :  { %4962 = vmatprep.subr.bf16.mxu0 %v7678_v28  ;;  %6970 = vmatprep.subr.bf16.mxu1 %v7679_v62 }
 0x5ec   :  { %4963 = vmatpush2.bf16.msra.mxu0 %v7676_v7 }
 0x5ed   :  { %6971 = vmatpush3.bf16.msra.mxu1 %v7680_v4  ;;  %4964 = vmatprep.subr.bf16.mxu0 %v7683_v55 }
 0x5ee   :  { %6972 = vmatprep.subr.bf16.mxu1 %v7684_v16 }
 0x5f0   :  { %4965 = vmatpush2.bf16.msra.mxu0 %v7681_v17 }
 0x5f1   :  { %6973 = vmatpush3.bf16.msra.mxu1 %v7685_v18  ;;  %4966 = vmatprep.subr.bf16.mxu0 %v7688_v31 }
 0x5f2   :  { %6974 = vmatprep.subr.bf16.mxu1 %v7689_v20 }
 0x5f3   :  { %v4644_v52 = vpop.f32.mrf.mxu0 }
 0x5f4   :  { %v4645_v10 = vadd.f32 %v4644_v52, %v9236_v3  ;;  %4967 = vmatpush2.bf16.msra.mxu0 %v7686_v12  ;;  %v7699_v3 = vld [vmem:[#allocation8 + $0x8a0] ss:$28 sps:$4 sm:$0xff]  }
 0x5f5   :  { %6975 = vmatpush3.bf16.msra.mxu1 %v7690_v22  ;;  %v4646_v26 = vpop.f32.mrf.mxu0  ;;  %4968 = vmatprep.subr.bf16.mxu0 %v7693_v51 }
 0x5f6   :  { %v9255_v2 = vadd.f32 %v9242_v23, %v4645_v10  ;;  %v4647_v6 = vadd.f32 %v4646_v26, %v9238_v13  ;;  %6976 = vmatprep.subr.bf16.mxu1 %v7694_v58  ;;  %v7703_v13 = vld [vmem:[#allocation8 + $0x868] ss:$28 sps:$4 sm:$0xff]   ;;  %v7702_v23 = vld [vmem:[#allocation8 + $0x3d0] ss:$28 sps:$4 sm:$0xff]  }
 0x5f7   :  { %v4648_v24 = vpop.f32.mrf.mxu0  ;;  %v10018_v10 = vld [vmem:[#allocation41_spill] sm:$0xff] }
 0x5f8   :  { %v9259_v19 = vadd.f32 %v9245_v5, %v4647_v6  ;;  %4969 = vmatpush2.bf16.msra.mxu0 %v7691_v25  ;;  %v7705_v5 = vld [vmem:[#allocation8 + $0x9f0] ss:$28 sps:$4 sm:$0xff]   ;;  %v2745_v25 = vrot.slane %v9230_v39, %v10018_v10  ;;  %vm5180_vm5 = vcmp.ge.f32.partialorder %v9255_v2, 0.0 }
 0x5f9   :  { %6977 = vmatpush3.bf16.msra.mxu1 %v7695_v1  ;;  %v4649_v59 = vpop.f32.mrf.mxu0  ;;  %6990 = vmatprep.subr.bf16.mxu0 %v7697_v0  ;;  %v10019_v1 = vld [vmem:[#allocation40_spill] sm:$0xff] }
 0x5fa   :  { %6978 = vmatprep.subr.bf16.mxu1 %v7696_v8  ;;  %v2749_v0 = vrot.slane %v9230_v39, %v10019_v1  ;;  %vm5181_vm4 = vcmp.ge.f32.partialorder %v9259_v19, 0.0 }
 0x5fb   :  { %4971 = vmatmul.mubr.bf16.vlgmr.msra.gmra.mxu0 %v9217_v27 }
 0x5fc   :  { %6991 = vmatpush3.bf16.msra.mxu0 %v7699_v3  ;;  %5132 = vmatprep.mubr.bf16.mxu0 %v9205_v11 }
 0x5fd   :  { %6979 = vmatpush3.bf16.msra.mxu1 %v7698_v63  ;;  %6992 = vmatprep.subr.bf16.mxu0 %v7701_v14 }
 0x5fe   :  { %6980 = vmatprep.subr.bf16.mxu1 %v7700_v15 }
 0x5ff   :  { %v4726_v34 = vpop.f32.mrf.mxu1 }
 0x600   :  { %6993 = vmatpush3.bf16.msra.mxu0 %v7703_v13  ;;  %v4727_v54 = vadd.f32 %v4726_v34, %v2737_v29 }
 0x601   :  { %6981 = vmatpush3.bf16.msra.mxu1 %v7702_v23  ;;  %v4728_v36 = vpop.f32.mrf.mxu1  ;;  %6994 = vmatprep.subr.bf16.mxu0 %v7705_v5 }
 0x602   :  { %6982 = vmatprep.subr.bf16.mxu1 %v7704_v33  ;;  %v4729_v9 = vadd.f32 %v4728_v36, %v2741_v32 }
 0x603   :  { %v4730_v38 = vpop.f32.mrf.mxu1 }
 0x604   :  { %6995 = vmatpush3.bf16.msra.mxu0 %v7707_v35 }
 0x605   :  { %6983 = vmatpush3.bf16.msra.mxu1 %v7706_v57  ;;  %v4731_v11 = vpop.f32.mrf.mxu1  ;;  %6996 = vmatprep.subr.bf16.mxu0 %v7708_v37 }
 0x606   :  { %7038 = vmatprep.subr.bf16.mxu1 %v9989_v56 }
 0x608   :  { %5093 = vmatmul.mubr.bf16.vlgmr.msra.gmra.mxu1 %v9200_v21  ;;  %6997 = vmatpush3.bf16.msra.mxu0 %v7709_v40  ;;  %v7718_v21 = vld [vmem:[#allocation8 + $0x718] ss:$28 sps:$4 sm:$0xff]  }
 0x609   :  { %6998 = vmatprep.subr.bf16.mxu0 %v7710_v41  ;;  %7039 = vmatpush3.bf16.msra.mxu1 %v7712_v42 }
 0x60a   :  { %7040 = vmatprep.mubr.msk.bf16.mxu1 %vm7947_vm0, %v9989_v56  ;;  %vm5307_vm0 = vcmask 1043458  }
 0x60c   :  { %6999 = vmatpush3.bf16.msra.mxu0 %v7711_v43 }
 0x60d   :  { %7000 = vmatprep.subr.bf16.mxu0 %v7713_v45 }
 0x610   :  { %7041 = vmatmul.mubr.msk.bf16.vlgmr.msra.gmra.mxu1 %vm1134_vm1, %v9210_v60  ;;  %7001 = vmatpush3.bf16.msra.mxu0 %v7714_v46  ;;  %vm5308_vm1 = vmor %vm5307_vm0, %vm5201_vm7 }
 0x611   :  { %7002 = vmatprep.subr.bf16.mxu0 %v7715_v48  ;;  %vm9309_vm3 = vmor %vm5309_vm2, %vm5308_vm1 }
 0x614   :  { %7003 = vmatpush3.bf16.msra.mxu0 %v7716_v49 }
 0x615   :  { %7004 = vmatprep.subr.bf16.mxu0 %v7717_v50 }
 0x618   :  { %7005 = vmatpush3.bf16.msra.mxu0 %v7718_v21 }
 0x61b   :  { %5133 = vmatmul.mubr.bf16.vlgmr.msra.gmra.mxu0 %v9217_v27 }
 0x633   :  { %v4767_v61 = vpop.f32.mrf.mxu0 }
 0x634   :  { %v4768_v60 = vadd.f32 %v4767_v61, %v4727_v54  ;;  %v5188_v54 = vmul.f32 0.1, %v9259_v19 }
 0x635   :  { %v4769_v28 = vpop.f32.mrf.mxu0 }
 0x636   :  { %v4770_v62 = vadd.f32 %v4769_v28, %v4729_v9  ;;  %v5187_v9 = vmul.f32 0.1, %v9255_v2 }
 0x637   :  { %v4771_v7 = vpop.f32.mrf.mxu0 }
 0x639   :  { %v4772_v4 = vpop.f32.mrf.mxu0 }
 0x63a   :  { %v5194_v4 = vsel %vm5180_vm5, %v9255_v2, %v5187_v9  ;;  %vm5603_vm5 = vcmask 220160  }
 0x63b   :  { %v4849_v55 = vpop.f32.mrf.mxu0 }
 0x63d   :  { %v4851_v16 = vpop.f32.mrf.mxu0 }
 0x63f   :  { %v4808_v17 = vpop.f32.mrf.mxu1  ;;  %v4853_v18 = vpop.f32.mrf.mxu0 }
 0x640   :  { %v4809_v31 = vadd.f32 %v4808_v17, %v4768_v60 }
 0x641   :  { %v4810_v27 = vpop.f32.mrf.mxu1  ;;  %v4854_v20 = vpop.f32.mrf.mxu0 }
 0x642   :  { %v4850_v12 = vadd.f32 %v4849_v55, %v4809_v31  ;;  %v4811_v22 = vadd.f32 %v4810_v27, %v4770_v62  ;;  %v5195_v62 = vsel %vm5181_vm4, %v9259_v19, %v5188_v54  ;;  %v10020_v31 = vld [vmem:[#allocation42_spill] sm:$0xff]  ;;  %vm5403_vm4 = vcmask 236544  }
 0x643   :  { %v4812_v51 = vpop.f32.mrf.mxu1  ;;  %v5203_v18 = vsel %vm5201_vm7, %v5195_v62, 0.0  ;;  %v2753_v27 = vrot.slane %v9230_v39, %v10020_v31 }
 0x644   :  { %v4852_v58 = vadd.f32 %v4851_v16, %v4811_v22  ;;  %v5189_v60 = vmul.f32 0.1, %v4850_v12  ;;  %vm5182_vm6 = vcmp.ge.f32.partialorder %v4850_v12, 0.0  ;;  %v5202_v51 = vsel %vm5201_vm7, %v5194_v4, 0.0 }
 0x645   :  { %v4813_v52 = vpop.f32.mrf.mxu1  ;;  %v5204_v19 = vadd.f32 %v5203_v18, %v5202_v51 }
 0x646   :  { %v5196_v55 = vsel %vm5182_vm6, %v4850_v12, %v5189_v60  ;;  %v5190_v16 = vmul.f32 0.1, %v4852_v58  ;;  %vm5183_vm8 = vcmp.ge.f32.partialorder %v4852_v58, 0.0  ;;  %vm5521_vm6 = vcmask 228352  }
 0x647   :  { %v5205_v52 = vsel %vm5201_vm7, %v5196_v55, 0.0 }
 0x67b   :  { %v4890_v26 = vpop.f32.mrf.mxu0 }
 0x67c   :  { %v4891_v8 = vadd.f32 %v4890_v26, %v2745_v25  ;;  %v5197_v25 = vsel %vm5183_vm8, %v4852_v58, %v5190_v16  ;;  %vm5969_vm8 = vcmask 826368  }
 0x67d   :  { %v4892_v6 = vpop.f32.mrf.mxu0 }
 0x67e   :  { %v4893_v59 = vadd.f32 %v4892_v6, %v2749_v0 }
 0x67f   :  { %v4894_v24 = vpop.f32.mrf.mxu0 }
 0x680   :  { %v4931_v3 = vpop.f32.mrf.mxu1 }
 0x681   :  { %v4932_v63 = vadd.f32 %v4931_v3, %v4891_v8  ;;  %v4895_v14 = vpop.f32.mrf.mxu0  ;;  %v5206_v8 = vadd.f32 %v5205_v52, %v5204_v19  ;;  %v5207_v3 = vsel %vm5201_vm7, %v5197_v25, 0.0 }
 0x682   :  { %v4933_v15 = vpop.f32.mrf.mxu1 }
 0x683   :  { %v4934_v13 = vadd.f32 %v4933_v15, %v4893_v59 }
 0x684   :  { %v4935_v23 = vpop.f32.mrf.mxu1 }
 0x685   :  { %v5208_v23 = vadd.f32 %v5207_v3, %v5206_v8 }
 0x686   :  { %v4936_v5 = vpop.f32.mrf.mxu1 }
 0x688   :  { %v5013_v33 = vpop.f32.mrf.mxu1 }
 0x68a   :  { %v5015_v34 = vpop.f32.mrf.mxu1 }
 0x68c   :  { %v5017_v35 = vpop.f32.mrf.mxu1 }
 0x68e   :  { %v5018_v36 = vpop.f32.mrf.mxu1 }
 0x6a8   :  { %v6962_v57 = vpop.f32.mrf.mxu1 }
 0x6aa   :  { %v6963_v37 = vpop.f32.mrf.mxu1 }
 0x6ab   :  { %v6964_v20 = vadd.f32 %v6963_v37, %v6962_v57 }
 0x6ac   :  { %v6965_v38 = vpop.f32.mrf.mxu1 }
 0x6ad   :  { %v5055_v12 = vadd.f32 %v6964_v20, %v2753_v27 }
 0x6ae   :  { %v6966_v40 = vpop.f32.mrf.mxu1 }
 0x6bb   :  { %v4972_v11 = vpop.f32.mrf.mxu0 }
 0x6bc   :  { %v4973_v41 = vadd.f32 %v4972_v11, %v4932_v63 }
 0x6bd   :  { %v4974_v42 = vpop.f32.mrf.mxu0 }
 0x6be   :  { %v5014_v43 = vadd.f32 %v5013_v33, %v4973_v41  ;;  %v4975_v45 = vadd.f32 %v4974_v42, %v4934_v13 }
 0x6bf   :  { %v4976_v46 = vpop.f32.mrf.mxu0 }
 0x6c0   :  { %v5016_v48 = vadd.f32 %v5015_v34, %v4975_v45  ;;  %v5191_v22 = vmul.f32 0.1, %v5014_v43  ;;  %vm5184_vm9 = vcmp.ge.f32.partialorder %v5014_v43, 0.0 }
 0x6c1   :  { %v4977_v49 = vpop.f32.mrf.mxu0 }
 0x6c2   :  { %v5192_v0 = vmul.f32 0.1, %v5016_v48  ;;  %v5198_v6 = vsel %vm5184_vm9, %v5014_v43, %v5191_v22  ;;  %vm5185_vm10 = vcmp.ge.f32.partialorder %v5016_v48, 0.0  ;;  %vm5887_vm9 = vcmask 1039360  }
 0x6c3   :  { %v5209_v14 = vsel %vm5201_vm7, %v5198_v6, 0.0 }
 0x6c4   :  { %v5199_v13 = vsel %vm5185_vm10, %v5016_v48, %v5192_v0  ;;  %v5210_v33 = vadd.f32 %v5209_v14, %v5208_v23  ;;  %vm6133_vm10 = vcmask 809984  }
 0x6c5   :  { %v5211_v34 = vsel %vm5201_vm7, %v5199_v13, 0.0 }
 0x6c6   :  { %v5212_v57 = vadd.f32 %v5211_v34, %v5210_v33 }
 0x6c8   :  { %v6984_v50 = vpop.f32.mrf.mxu1 }
 0x6ca   :  { %v6985_v21 = vpop.f32.mrf.mxu1 }
 0x6cb   :  { %v6986_v2 = vadd.f32 %v6985_v21, %v6984_v50 }
 0x6cc   :  { %v6987_v29 = vpop.f32.mrf.mxu1 }
 0x6cd   :  { %v5095_v39 = vadd.f32 %v6986_v2, %v5055_v12  ;;  %v7949_v2 = vmov 1983009808  }
 0x6ce   :  { %v6988_v32 = vpop.f32.mrf.mxu1 }
 0x6d0   :  { %v5174_v61 = vpop.f32.mrf.mxu1 }
 0x6d2   :  { %v7042_v28 = vpop.f32.mrf.mxu1 }
 0x6d4   :  { %v5177_v7 = vpop.f32.mrf.mxu1 }
 0x6d6   :  { %v7043_v17 = vpop.f32.mrf.mxu1 }
 0x6db   :  { %v7006_v26 = vpop.f32.mrf.mxu0 }
 0x6dd   :  { %v7007_v24 = vpop.f32.mrf.mxu0 }
 0x6de   :  { %v7008_v59 = vadd.f32 %v7007_v24, %v7006_v26  ;;  %v5274_v26 = vunpack.c.l.s4 %v7949_v2 }
 0x6df   :  { %v7009_v63 = vpop.f32.mrf.mxu0 }
 0x6e0   :  { %v5135_v15 = vadd.f32 %v7008_v59, %v5095_v39  ;;  %v5275_v12 = vunpack.c.0.s8 %v5274_v26  ;;  %v10021_v39 = vld [vmem:[#allocation18_spill] sm:$0xff] }
 0x6e1   :  { %v7010_v5 = vpop.f32.mrf.mxu0 }
 0x6e2   :  { %v5175_v58 = vadd.f32 %v5174_v61, %v5135_v15  ;;  %v9302_v59 = vsub.s32 %v5275_v12, %v10021_v39 }
 0x6e4   :  { %vm5186_vm11 = vcmp.ge.f32.partialorder %v5175_v58, 0.0  ;;  %v5193_v35 = vmul.f32 0.1, %v5175_v58  ;;  %10022 = vst [vmem:[#allocation23_spill] sm:$0xff] %v9302_v59 }
 0x6e6   :  { %v5200_v36 = vsel %vm5186_vm11, %v5175_v58, %v5193_v35  ;;  %vm6051_vm11 = vcmask 818176  }
 0x6e7   :  { %v5214_v37 = vsel %vm5213_vm12, %v5200_v36, 0.0 }
 0x6e8   :  { %v5215_v38 = vadd.f32 %v5214_v37, %v5212_v57 }
 0x6ea   :  { %5216 = vadd.xlane.f32.xlu0 %v5215_v38 }
 0x773   :  { %v5217_v40 = vpop.xlane.xlu0 %5216 }
 0x774   :  { %v5219_v11 = vmul.f32 0.0012755102, %v5217_v40 }
 0x776   :  { %v5220_v41 = vsub.f32 %v5194_v4, %v5219_v11  ;;  %v5221_v42 = vsub.f32 %v5195_v62, %v5219_v11  ;;  %v5222_v43 = vsub.f32 %v5196_v55, %v5219_v11  ;;  %v5223_v45 = vsub.f32 %v5197_v25, %v5219_v11 }
 0x777   :  { %v5224_v46 = vsub.f32 %v5198_v6, %v5219_v11  ;;  %v5225_v21 = vsub.f32 %v5199_v13, %v5219_v11  ;;  %v5226_v9 = vsub.f32 %v5200_v36, %v5219_v11  ;;  %v10023_v36 = vmov 0 }
 0x778   :  { %v5227_v48 = vmul.f32 %v5220_v41, %v5220_v41  ;;  %v5228_v49 = vmul.f32 %v5221_v42, %v5221_v42  ;;  %v5229_v50 = vmul.f32 %v5222_v43, %v5222_v43  ;;  %v5230_v29 = vmul.f32 %v5223_v45, %v5223_v45 }
 0x779   :  { %v5231_v60 = vmul.f32 %v5224_v46, %v5224_v46  ;;  %v5232_v4 = vmul.f32 %v5225_v21, %v5225_v21  ;;  %v5233_v16 = vmul.f32 %v5226_v9, %v5226_v9  ;;  %v10024_v36 = vsel %vm9309_vm3, 4294967295, %v10023_v36 }
 0x77a   :  { %v5234_v32 = vsel %vm5201_vm7, %v5227_v48, 0.0  ;;  %v5235_v54 = vsel %vm5201_vm7, %v5228_v49, 0.0  ;;  %v5237_v28 = vsel %vm5201_vm7, %v5229_v50, 0.0  ;;  %v5239_v62 = vsel %vm5201_vm7, %v5230_v29, 0.0  ;;  %10025 = vst [vmem:[#allocation24_spill] sm:$0xff] %v10024_v36 }
 0x77b   :  { %v5236_v61 = vadd.f32 %v5235_v54, %v5234_v32  ;;  %v5241_v17 = vsel %vm5201_vm7, %v5231_v60, 0.0  ;;  %v5243_v27 = vsel %vm5201_vm7, %v5232_v4, 0.0  ;;  %v5245_v22 = vsel %vm5213_vm12, %v5233_v16, 0.0  ;;  %v5834_v36 = vld [vmem:[#allocation11 + $0x5] ss:$8 sm:$0xf] }
 0x77c   :  { %vm5706_vm7 = vcmask 7168  }
 0x77d   :  { %v5238_v7 = vadd.f32 %v5237_v28, %v5236_v61 }
 0x77f   :  { %v5240_v55 = vadd.f32 %v5239_v62, %v5238_v7 }
 0x781   :  { %v5242_v18 = vadd.f32 %v5241_v17, %v5240_v55 }
 0x783   :  { %v5244_v20 = vadd.f32 %v5243_v27, %v5242_v18 }
 0x785   :  { %v5246_v51 = vadd.f32 %v5245_v22, %v5244_v20 }
 0x787   :  { %5247 = vadd.xlane.f32.xlu0 %v5246_v51 }
 0x810   :  { %v5248_v52 = vpop.xlane.xlu0 %5247 }
 0x811   :  { %v5249_v19 = vmul.f32 0.0012755102, %v5248_v52 }
 0x813   :  { %v5250_v25 = vadd.f32 1e-05, %v5249_v19 }
 0x815   :  { %7725 = vrsqrt.f32 %v5250_v25 }
 0x822   :  { %v7726_v0 = vpop.eup %7725 }
 0x823   :  { %v5252_v6 = vmul.f32 %v7726_v0, %v5220_v41  ;;  %v5253_v8 = vmul.f32 %v7726_v0, %v5221_v42  ;;  %v5254_v24 = vmul.f32 %v7726_v0, %v5222_v43  ;;  %v5255_v3 = vmul.f32 %v7726_v0, %v5223_v45 }
 0x824   :  { %v5256_v63 = vmul.f32 %v7726_v0, %v5224_v46  ;;  %v5257_v14 = vmul.f32 %v7726_v0, %v5225_v21  ;;  %v5258_v15 = vmul.f32 %v7726_v0, %v5226_v9 }
 0x825   :  { %v5271_v56 = vcombine.low %v5252_v6, %v5253_v8  ;;  %v5272_v13 = vcombine.low %v5254_v24, %v5255_v3 }
 0x826   :  { %v5288_v23 = vcombine.low %v5256_v63, %v5257_v14  ;;  %v5302_v34 = vrot.slane %v5258_v15, %v9302_v59  ;;  %v5313_v15 = vld [vmem:[#allocation11] ss:$8 sm:$0xf] }
 0x827   :  { %v5279_v5 = vrot.slane %v5271_v56, %v9302_v59  ;;  %v5286_v58 = vrot.slane %v5272_v13, %v9302_v59  ;;  %v5314_v56 = vld [vmem:[#allocation11] ss:$8 sm:$0x70] }
 0x828   :  { %v5295_v33 = vrot.slane %v5288_v23, %v9302_v59 }
 0x829   :  { %v5287_v35 = vcombine.low %v5279_v5, %v5286_v58  ;;  %v7786_v9 = vcombine.low %v5286_v58, %v5286_v58  ;;  %v9466_v58 = vor.u32 %v5314_v56, %v5313_v15 }
 0x82a   :  { %v5303_v57 = vcombine.low %v5295_v33, %v5302_v34  ;;  %v5468_v33 = vld [vmem:[#allocation11 + $0x1] ss:$8 sm:$0xf] }
 0x82b   :  { %5306 = vst [vmem:[#allocation2 + $0x2] sm:$0xff] %v5287_v35  ;;  %v9325_v43 = vrot.slane %v5287_v35, %v9302_v59  ;;  %v9364_v60 = vrot.slane %v7786_v9, %v9302_v59  ;;  %v5469_v34 = vld [vmem:[#allocation11 + $0x1] ss:$8 sm:$0x70] }
 0x82c   :  { %5311 = vst.msk [vmem:[#allocation2 + $0xa] sm:$0x3f] %vm9309_vm3, %v5303_v57  ;;  %v5550_v57 = vld [vmem:[#allocation11 + $0x2] ss:$8 sm:$0xf] }
 0x82d   :  { %v9377_v4 = vcombine.high %v9325_v43, %v9325_v43  ;;  %v9406_v17 = vcombine.high %v9364_v60, %v9364_v60 }
 0x832   :  { %v5316_v37 = vld [vmem:[#allocation2] sm:$0xff] }
 0x833   :  { %v5317_v38 = vld [vmem:[#allocation2 + $0x8] sm:$0x3f]  ;;  %v5363_v40 = vrot.slane %v5316_v37, %v9302_v59  ;;  %v5356_v48 = vcombine.high %v5316_v37, %v5316_v37 }
 0x834   :  { %v5380_v11 = vrot.slane %v5317_v38, %v9302_v59  ;;  %v5635_v41 = vld [vmem:[#allocation2 + $0x8] sm:$0xff]  ;;  %v5373_v50 = vcombine.high %v5317_v38, %v5317_v38 }
 0x835   :  { %5389 = vrot.lane.b32.xlu1 %v5363_v40, %s7950_s3  ;;  %v5680_v42 = vrot.slane %v5635_v41, %v9302_v59  ;;  %v5740_v45 = vld [vmem:[#allocation2 + $0xa] sm:$0x3f]  ;;  %v5370_v49 = vrot.slane %v5356_v48, %v9302_v59  ;;  %v5371_v21 = vcombine.high %v5363_v40, %v5363_v40  ;;  %v5673_v54 = vcombine.high %v5635_v41, %v5635_v41 }
 0x836   :  { %5515 = vrot.lane.b32.xlu0 %v5380_v11, %s7938_s19  ;;  %v9331_v46 = vrot.slane %v5740_v45, %v9302_v59  ;;  %v5387_v29 = vrot.slane %v5373_v50, %v9302_v59  ;;  %v5388_v32 = vcombine.high %v5380_v11, %v5380_v11  ;;  %v5796_v28 = vcombine.high %v5740_v45, %v5740_v45  ;;  %v5551_v37 = vld [vmem:[#allocation11 + $0x2] ss:$8 sm:$0x70] }
 0x837   :  { %v5687_v61 = vrot.slane %v5673_v54, %v9302_v59  ;;  %v5688_v62 = vcombine.high %v5680_v42, %v5680_v42  ;;  %v5372_v16 = vcombine.high %v5370_v49, %v5370_v49  ;;  %v9474_v41 = vor.u32 %v5469_v34, %v5468_v33  ;;  %v5632_v33 = vld [vmem:[#allocation11 + $0x3] ss:$8 sm:$0xf] }
 0x838   :  { %v9370_v7 = vrot.slane %v5796_v28, %v9302_v59  ;;  %v9384_v55 = vcombine.high %v9331_v46, %v9331_v46  ;;  %v5633_v34 = vld [vmem:[#allocation11 + $0x3] ss:$8 sm:$0x70]  ;;  %v5835_v59 = vld [vmem:[#allocation11 + $0x5] ss:$8 sm:$0x70] }
 0x839   :  { %5397 = vrot.lane.b32.xlu1 %v5380_v11, %s7950_s3  ;;  %v5689_v18 = vcombine.high %v5687_v61, %v5687_v61 }
 0x83a   :  { %5690 = vrot.lane.b32.xlu0 %v5363_v40, %s7951_s15 }
 0x83d   :  { %5507 = vrot.lane.b32.xlu1 %v5363_v40, %s7938_s19 }
 0x83e   :  { %5698 = vrot.lane.b32.xlu0 %v5680_v42, %s7951_s15  ;;  %v9476_v42 = vor.u32 %v5551_v37, %v5550_v57  ;;  %v5338_v57 = vrot.slane %v9466_v58, %v10018_v10 }
 0x841   :  { %5589 = vrot.lane.b32.xlu1 %v5363_v40, %s7952_s16  ;;  %v9470_v40 = vld [vmem:[#allocation13] sm:$0x7f] }
 0x842   :  { %5873 = vrot.lane.b32.xlu0 %v9325_v43, %s7953_s17  ;;  %v5428_v48 = vrot.slane %v9470_v40, %v10014_v44 }
 0x845   :  { %5597 = vrot.lane.b32.xlu1 %v5380_v11, %s7952_s16  ;;  %v5322_v11 = vrot.slane %v9466_v58, %v10014_v44 }
 0x846   :  { %5881 = vrot.lane.b32.xlu0 %v9331_v46, %s7953_s17 }
 0x849   :  { %5955 = vrot.lane.b32.xlu1 %v9325_v43, %s7954_s18 }
 0x84a   :  { %6037 = vrot.lane.b32.xlu0 %v9325_v43, %s7955_s20 }
 0x84d   :  { %5963 = vrot.lane.b32.xlu1 %v9331_v46, %s7954_s18 }
 0x84e   :  { %6045 = vrot.lane.b32.xlu0 %v9331_v46, %s7955_s20 }
 0x851   :  { %6119 = vrot.lane.b32.xlu1 %v9325_v43, %s7956_s0 }
 0x852   :  { %5393 = vrot.lane.b32.xlu0 %v5370_v49, %s7950_s3 }
 0x855   :  { %6127 = vrot.lane.b32.xlu1 %v9331_v46, %s7956_s0 }
 0x856   :  { %5511 = vrot.lane.b32.xlu0 %v5370_v49, %s7938_s19 }
 0x859   :  { %5391 = vrot.lane.b32.xlu1 %v5371_v21, %s7950_s3 }
 0x85a   :  { %5519 = vrot.lane.b32.xlu0 %v5387_v29, %s7938_s19 }
 0x85d   :  { %5399 = vrot.lane.b32.xlu1 %v5388_v32, %s7950_s3 }
 0x85e   :  { %5591 = vrot.lane.b32.xlu0 %v5371_v21, %s7952_s16 }
 0x861   :  { %5401 = vrot.lane.b32.xlu1 %v5387_v29, %s7950_s3 }
 0x862   :  { %5599 = vrot.lane.b32.xlu0 %v5388_v32, %s7952_s16 }
 0x865   :  { %5509 = vrot.lane.b32.xlu1 %v5371_v21, %s7938_s19 }
 0x866   :  { %5694 = vrot.lane.b32.xlu0 %v5370_v49, %s7951_s15 }
 0x869   :  { %5517 = vrot.lane.b32.xlu1 %v5388_v32, %s7938_s19  ;;  %v5557_v32 = vrot.slane %v9476_v42, %v10014_v44 }
 0x86a   :  { %5702 = vrot.lane.b32.xlu0 %v5687_v61, %s7951_s15 }
 0x86d   :  { %5593 = vrot.lane.b32.xlu1 %v5370_v49, %s7952_s16 }
 0x86e   :  { %5877 = vrot.lane.b32.xlu0 %v9364_v60, %s7953_s17 }
 0x871   :  { %5601 = vrot.lane.b32.xlu1 %v5387_v29, %s7952_s16  ;;  %v5475_v29 = vrot.slane %v9474_v41, %v10014_v44 }
 0x872   :  { %5885 = vrot.lane.b32.xlu0 %v9370_v7, %s7953_s17 }
 0x875   :  { %5692 = vrot.lane.b32.xlu1 %v5371_v21, %s7951_s15 }
 0x876   :  { %5957 = vrot.lane.b32.xlu0 %v9377_v4, %s7954_s18 }
 0x879   :  { %5700 = vrot.lane.b32.xlu1 %v5688_v62, %s7951_s15 }
 0x87a   :  { %5965 = vrot.lane.b32.xlu0 %v9384_v55, %s7954_s18 }
 0x87d   :  { %5875 = vrot.lane.b32.xlu1 %v9377_v4, %s7953_s17 }
 0x87e   :  { %6041 = vrot.lane.b32.xlu0 %v9364_v60, %s7955_s20 }
 0x881   :  { %5883 = vrot.lane.b32.xlu1 %v9384_v55, %s7953_s17 }
 0x882   :  { %6049 = vrot.lane.b32.xlu0 %v9370_v7, %s7955_s20 }
 0x885   :  { %5959 = vrot.lane.b32.xlu1 %v9364_v60, %s7954_s18 }
 0x886   :  { %6121 = vrot.lane.b32.xlu0 %v9377_v4, %s7956_s0 }
 0x889   :  { %5967 = vrot.lane.b32.xlu1 %v9370_v7, %s7954_s18 }
 0x88a   :  { %5595 = vrot.lane.b32.xlu0 %v5372_v16, %s7952_s16 }
 0x88d   :  { %6039 = vrot.lane.b32.xlu1 %v9377_v4, %s7955_s20 }
 0x88e   :  { %5961 = vrot.lane.b32.xlu0 %v9406_v17, %s7954_s18 }
 0x891   :  { %6047 = vrot.lane.b32.xlu1 %v9384_v55, %s7955_s20 }
 0x892   :  { %6125 = vrot.lane.b32.xlu0 %v9406_v17, %s7956_s0 }
 0x895   :  { %6123 = vrot.lane.b32.xlu1 %v9364_v60, %s7956_s0 }
 0x896   :  { %6129 = vrot.lane.b32.xlu0 %v9384_v55, %s7956_s0 }
 0x899   :  { %5395 = vrot.lane.b32.xlu1 %v5372_v16, %s7950_s3 }
 0x89d   :  { %5513 = vrot.lane.b32.xlu1 %v5372_v16, %s7938_s19 }
 0x8a1   :  { %5696 = vrot.lane.b32.xlu1 %v5372_v16, %s7951_s15 }
 0x8a5   :  { %5704 = vrot.lane.b32.xlu1 %v5689_v18, %s7951_s15 }
 0x8a7   :  { %v5390_v27 = vpop.permute.xlu1 %5389 }
 0x8a8   :  { %v9424_v20 = vpop.permute.xlu0 %5515 }
 0x8a9   :  { %10026 = vst [vmem:[#allocation25_spill] sm:$0xff] %v9424_v20  ;;  %5879 = vrot.lane.b32.xlu1 %v9406_v17, %s7953_s17 }
 0x8ab   :  { %v9428_v22 = vpop.permute.xlu1 %5397 }
 0x8ac   :  { %10027 = vst [vmem:[#allocation26_spill] sm:$0xff] %v9428_v22  ;;  %v9430_v51 = vpop.permute.xlu0 %5690 }
 0x8ad   :  { %6043 = vrot.lane.b32.xlu1 %v9406_v17, %s7955_s20 }
 0x8af   :  { %v5508_v52 = vpop.permute.xlu1 %5507 }
 0x8b0   :  { %v9434_v19 = vpop.permute.xlu0 %5698 }
 0x8b1   :  { %10028 = vst [vmem:[#allocation27_spill] sm:$0xff] %v9434_v19  ;;  %6131 = vrot.lane.b32.xlu1 %v9370_v7, %s7956_s0 }
 0x8b3   :  { %v5590_v25 = vpop.permute.xlu1 %5589 }
 0x8b4   :  { %v9438_v2 = vpop.permute.xlu0 %5873 }
 0x8b7   :  { %v9440_v26 = vpop.permute.xlu1 %5597 }
 0x8b8   :  { %10029 = vst [vmem:[#allocation28_spill] sm:$0xff] %v9440_v26  ;;  %v9442_v12 = vpop.permute.xlu0 %5881 }
 0x8b9   :  { %10030 = vst [vmem:[#allocation29_spill] sm:$0xff] %v9442_v12 }
 0x8bb   :  { %v9444_v0 = vpop.permute.xlu1 %5955 }
 0x8bc   :  { %v9446_v6 = vpop.permute.xlu0 %6037 }
 0x8bf   :  { %v9448_v8 = vpop.permute.xlu1 %5963 }
 0x8c0   :  { %10031 = vst [vmem:[#allocation30_spill] sm:$0xff] %v9448_v8  ;;  %v9450_v24 = vpop.permute.xlu0 %6045 }
 0x8c3   :  { %v9452_v3 = vpop.permute.xlu1 %6119 }
 0x8c4   :  { %v9454_v39 = vpop.permute.xlu0 %5393 }
 0x8c7   :  { %v9456_v63 = vpop.permute.xlu1 %6127 }
 0x8c8   :  { %v9458_v14 = vpop.permute.xlu0 %5511 }
 0x8c9   :  { %10032 = vst [vmem:[#allocation31_spill] sm:$0xff] %v9458_v14 }
 0x8cb   :  { %v9460_v13 = vpop.permute.xlu1 %5391 }
 0x8cc   :  { %v5404_v23 = vsel %vm5403_vm4, %v5390_v27, %v9460_v13  ;;  %v9464_v5 = vpop.permute.xlu0 %5519 }
 0x8cd   :  { %v5417_v21 = vmul.f32 %v5404_v23, %v5322_v11  ;;  %v5736_v11 = vld [vmem:[#allocation11 + $0x4] ss:$8 sm:$0xf] }
 0x8cf   :  { %v5400_v35 = vpop.permute.xlu1 %5399  ;;  %v5460_v62 = vadd.f32 %v5428_v48, %v5417_v21  ;;  %v5737_v48 = vld [vmem:[#allocation11 + $0x4] ss:$8 sm:$0x70]  ;;  %v5491_v21 = vrot.slane %v9474_v41, %v10018_v10 }
 0x8d0   :  { %v9468_v38 = vpop.permute.xlu0 %5591 }
 0x8d1   :  { %v5604_v61 = vsel %vm5603_vm5, %v5590_v25, %v9468_v38 }
 0x8d2   :  { %v5617_v18 = vmul.f32 %v5604_v61, %v5557_v32  ;;  %v5444_v61 = vrot.slane %v9470_v40, %v10018_v10 }
 0x8d3   :  { %v9478_v45 = vpop.permute.xlu1 %5401 }
 0x8d4   :  { %10033 = vst [vmem:[#allocation32_spill] sm:$0xff] %v9478_v45  ;;  %v9484_v49 = vsel %vm5403_vm4, %v5400_v35, %v9478_v45  ;;  %v9486_v50 = vpop.permute.xlu0 %5599  ;;  %v9545_v45 = vor.u32 %v5835_v59, %v5834_v36 }
 0x8d5   :  { %10034 = vst [vmem:[#allocation33_spill] sm:$0xff] %v9486_v50 }
 0x8d6   :  { %v5841_v59 = vrot.slane %v9545_v45, %v10014_v44 }
 0x8d7   :  { %v9492_v54 = vpop.permute.xlu1 %5509 }
 0x8d8   :  { %v5522_v9 = vsel %vm5521_vm6, %v5508_v52, %v9492_v54  ;;  %v9498_v28 = vpop.permute.xlu0 %5694  ;;  %v5408_v52 = vsel %vm5403_vm4, %v9428_v22, %v5400_v35  ;;  %v9523_v35 = vor.u32 %v5737_v48, %v5736_v11  ;;  %v5916_v48 = vld [vmem:[#allocation11 + $0x6] ss:$8 sm:$0xf] }
 0x8d9   :  { %10035 = vst [vmem:[#allocation43_spill] sm:$0xff] %v9498_v28  ;;  %v5535_v16 = vmul.f32 %v5522_v9, %v5475_v29  ;;  %v9514_v29 = vor.u32 %v5633_v34, %v5632_v33  ;;  %v5421_v9 = vmul.f32 %v5408_v52, %v5338_v57  ;;  %v5573_v34 = vrot.slane %v9476_v42, %v10018_v10 }
 0x8da   :  { %v5745_v57 = vrot.slane %v9523_v35, %v10014_v44  ;;  %v5608_v52 = vsel %vm5603_vm5, %v9440_v26, %v9486_v50  ;;  %v5761_v22 = vrot.slane %v9523_v35, %v10018_v10 }
 0x8db   :  { %v5542_v27 = vadd.f32 %v5535_v16, %v5460_v62  ;;  %v9500_v15 = vpop.permute.xlu1 %5517  ;;  %v5464_v33 = vadd.f32 %v5444_v61, %v5421_v9 }
 0x8dc   :  { %v9502_v56 = vpop.permute.xlu0 %5702  ;;  %v5526_v32 = vsel %vm5521_vm6, %v9424_v20, %v9500_v15 }
 0x8dd   :  { %10036 = vst [vmem:[#allocation34_spill] sm:$0xff] %v9502_v56  ;;  %v5624_v23 = vadd.f32 %v5617_v18, %v5542_v27  ;;  %v5539_v18 = vmul.f32 %v5526_v32, %v5491_v21  ;;  %v5640_v27 = vrot.slane %v9514_v29, %v10014_v44  ;;  %v5917_v21 = vld [vmem:[#allocation11 + $0x6] ss:$8 sm:$0x70]  ;;  %v5621_v56 = vmul.f32 %v5608_v52, %v5573_v34 }
 0x8de   :  { %v9549_v50 = vor.u32 %v5917_v21, %v5916_v48  ;;  %v5857_v21 = vrot.slane %v9545_v45, %v10018_v10 }
 0x8df   :  { %v9506_v25 = vpop.permute.xlu1 %5593  ;;  %v5546_v61 = vadd.f32 %v5539_v18, %v5464_v33 }
 0x8e0   :  { %v9510_v37 = vpop.permute.xlu0 %5877  ;;  %v5923_v34 = vrot.slane %v9549_v50, %v10014_v44 }
 0x8e1   :  { %v5628_v36 = vadd.f32 %v5621_v56, %v5546_v61 }
 0x8e3   :  { %v9521_v62 = vpop.permute.xlu1 %5601 }
 0x8e4   :  { %10037 = vst [vmem:[#allocation35_spill] sm:$0xff] %v9521_v62  ;;  %v9525_v16 = vpop.permute.xlu0 %5885 }
 0x8e5   :  { %10038 = vst [vmem:[#allocation36_spill] sm:$0xff] %v9525_v16  ;;  %v5656_v16 = vrot.slane %v9514_v29, %v10018_v10 }
 0x8e7   :  { %v9531_v20 = vpop.permute.xlu1 %5692 }
 0x8e8   :  { %v5707_v11 = vsel %vm5706_vm7, %v9430_v51, %v9531_v20  ;;  %v9541_v32 = vpop.permute.xlu0 %5957  ;;  %v5819_v51 = vmul.f32 %v9325_v43, %v5745_v57  ;;  %v5823_v43 = vmul.f32 %v9331_v46, %v5761_v22  ;;  %v5405_v46 = vsel %vm5403_vm4, %v9460_v13, %v9454_v39 }
 0x8e9   :  { %v5721_v9 = vmul.f32 %v5707_v11, %v5640_v27  ;;  %v5970_v57 = vsel %vm5969_vm8, %v9444_v0, %v9541_v32  ;;  %v5749_v22 = vrot.slane %v9523_v35, %v10015_v47  ;;  %v5479_v0 = vrot.slane %v9474_v41, %v10015_v47 }
 0x8ea   :  { %v5523_v13 = vsel %vm5521_vm6, %v9492_v54, %v9458_v14  ;;  %v5605_v54 = vsel %vm5603_vm5, %v9468_v38, %v9506_v25  ;;  %v5708_v38 = vsel %vm5706_vm7, %v9531_v20, %v9498_v28 }
 0x8eb   :  { %v5728_v26 = vadd.f32 %v5721_v9, %v5624_v23  ;;  %v9551_v62 = vpop.permute.xlu1 %5700  ;;  %v5983_v9 = vmul.f32 %v5970_v57, %v5923_v34 }
 0x8ec   :  { %v5711_v18 = vsel %vm5706_vm7, %v9434_v19, %v9551_v62  ;;  %v9557_v27 = vpop.permute.xlu0 %5965  ;;  %v6081_v19 = vld [vmem:[#allocation11 + $0x38] ss:$8 sm:$0x70] }
 0x8ed   :  { %10039 = vst [vmem:[#allocation37_spill] sm:$0xff] %v9557_v27  ;;  %v5725_v33 = vmul.f32 %v5711_v18, %v5656_v16  ;;  %v5826_v23 = vadd.f32 %v5819_v51, %v5728_v26  ;;  %v5326_v26 = vrot.slane %v9466_v58, %v10015_v47  ;;  %v5939_v51 = vrot.slane %v9549_v50, %v10018_v10 }
 0x8ef   :  { %v5732_v52 = vadd.f32 %v5725_v33, %v5628_v36  ;;  %v9563_v11 = vpop.permute.xlu1 %5875  ;;  %v5432_v36 = vrot.slane %v9470_v40, %v10015_v47  ;;  %v5974_v33 = vsel %vm5969_vm8, %v9448_v8, %v9557_v27  ;;  %v5769_v8 = vrot.slane %v9523_v35, %v10020_v31  ;;  %v6080_v27 = vld [vmem:[#allocation11 + $0x38] ss:$8 sm:$0xf] }
 0x8f0   :  { %v5888_v48 = vsel %vm5887_vm9, %v9438_v2, %v9563_v11  ;;  %v9572_v56 = vpop.permute.xlu0 %6041  ;;  %v5753_v2 = vrot.slane %v9523_v35, %v10016_v53 }
 0x8f1   :  { %v5901_v16 = vmul.f32 %v5888_v48, %v5841_v59  ;;  %v5830_v61 = vadd.f32 %v5823_v43, %v5732_v52  ;;  %v5561_v43 = vrot.slane %v9476_v42, %v10015_v47 }
 0x8f3   :  { %v5908_v18 = vadd.f32 %v5901_v16, %v5826_v23  ;;  %v9589_v59 = vpop.permute.xlu1 %5883  ;;  %v5418_v23 = vmul.f32 %v5405_v46, %v5326_v26  ;;  %v5765_v16 = vrot.slane %v9523_v35, %v10019_v1  ;;  %v5536_v26 = vmul.f32 %v5523_v13, %v5479_v0 }
 0x8f4   :  { %10040 = vst [vmem:[#allocation38_spill] sm:$0xff] %v9589_v59  ;;  %v5892_v34 = vsel %vm5887_vm9, %v9442_v12, %v9589_v59  ;;  %v9602_v52 = vpop.permute.xlu0 %6049  ;;  %v5757_v12 = vrot.slane %v9523_v35, %v10017_v30  ;;  %v5644_v46 = vrot.slane %v9514_v29, %v10015_v47  ;;  %v5618_v35 = vmul.f32 %v5605_v54, %v5561_v43  ;;  %v10042_v43 = vld [vmem:[#allocation35_spill] sm:$0xff] }
 0x8f5   :  { %10041 = vst [vmem:[#allocation39_spill] sm:$0xff] %v9602_v52  ;;  %v5905_v57 = vmul.f32 %v5892_v34, %v5857_v21  ;;  %v9606_v48 = vadd.f32 %v5983_v9, %v5908_v18  ;;  %v5987_v21 = vmul.f32 %v5974_v33, %v5939_v51  ;;  %v5998_v18 = vld [vmem:[#allocation11 + $0x7] ss:$8 sm:$0xf]  ;;  %v5461_v14 = vadd.f32 %v5432_v36, %v5418_v23 }
 0x8f6   :  { %v5999_v34 = vld [vmem:[#allocation11 + $0x7] ss:$8 sm:$0x70]  ;;  %v5820_v0 = vmul.f32 %v9377_v4, %v5749_v22  ;;  %v9633_v51 = vmul.f32 %v9370_v7, %v5769_v8  ;;  %v9636_v33 = vmul.f32 %v9364_v60, %v5753_v2  ;;  %v9639_v20 = vmul.f32 %v9406_v17, %v5757_v12 }
 0x8f7   :  { %v5912_v9 = vadd.f32 %v5905_v57, %v5830_v61  ;;  %v9619_v52 = vpop.permute.xlu1 %5959  ;;  %v9630_v61 = vmul.f32 %v9384_v55, %v5765_v16  ;;  %v5543_v57 = vadd.f32 %v5536_v26, %v5461_v14  ;;  %v5722_v28 = vmul.f32 %v5708_v38, %v5644_v46  ;;  %v10043_v60 = vld [vmem:[#allocation33_spill] sm:$0xff] }
 0x8f8   :  { %v9624_v59 = vpop.permute.xlu0 %6121  ;;  %v9641_v36 = vor.u32 %v5999_v34, %v5998_v18  ;;  %v9643_v23 = vor.u32 %v6081_v19, %v6080_v27  ;;  %v5342_v7 = vrot.slane %v9466_v58, %v10019_v1  ;;  %v5845_v17 = vrot.slane %v9545_v45, %v10015_v47 }
 0x8f9   :  { %v9627_v13 = vadd.f32 %v5987_v21, %v5912_v9  ;;  %v5625_v8 = vadd.f32 %v5618_v35, %v5543_v57  ;;  %v5448_v14 = vrot.slane %v9470_v40, %v10019_v1  ;;  %v5495_v22 = vrot.slane %v9474_v41, %v10019_v1 }
 0x8fa   :  { %v6005_v19 = vrot.slane %v9641_v36, %v10014_v44  ;;  %v5889_v2 = vsel %vm5887_vm9, %v9563_v11, %v9510_v37  ;;  %v5927_v16 = vrot.slane %v9549_v50, %v10015_v47  ;;  %v6087_v26 = vrot.slane %v9643_v23, %v10014_v44 }
 0x8fb   :  { %v9645_v4 = vpop.permute.xlu1 %5967  ;;  %v5729_v54 = vadd.f32 %v5722_v28, %v5625_v8  ;;  %v5971_v9 = vsel %vm5969_vm8, %v9541_v32, %v9619_v52  ;;  %v6134_v11 = vsel %vm6133_vm10, %v9452_v3, %v9624_v59  ;;  %v5902_v34 = vmul.f32 %v5889_v2, %v5845_v17 }
 0x8fc   :  { %v9655_v12 = vpop.permute.xlu0 %5595  ;;  %v6009_v38 = vrot.slane %v9641_v36, %v10015_v47  ;;  %v5660_v32 = vrot.slane %v9514_v29, %v10019_v1  ;;  %v5984_v21 = vmul.f32 %v5971_v9, %v5927_v16  ;;  %v6147_v44 = vmul.f32 %v6134_v11, %v6087_v26 }
 0x8fd   :  { %v5827_v8 = vadd.f32 %v5820_v0, %v5729_v54  ;;  %v6091_v26 = vrot.slane %v9643_v23, %v10015_v47  ;;  %v5565_v9 = vrot.slane %v9476_v42, %v10016_v53  ;;  %v5569_v11 = vrot.slane %v9476_v42, %v10017_v30 }
 0x8fe   :  { %v5334_v47 = vrot.slane %v9466_v58, %v10017_v30  ;;  %v5487_v27 = vrot.slane %v9474_v41, %v10017_v30 }
 0x8ff   :  { %v6040_v46 = vpop.permute.xlu1 %6039  ;;  %v5909_v54 = vadd.f32 %v5902_v34, %v5827_v8  ;;  %v5422_v8 = vmul.f32 %v9484_v49, %v5342_v7  ;;  %v5609_v49 = vsel %vm5603_vm5, %v10043_v60, %v10042_v43  ;;  %v10044_v7 = vld [vmem:[#allocation34_spill] sm:$0xff] }
 0x900   :  { %v6052_v28 = vsel %vm6051_vm11, %v9446_v6, %v6040_v46  ;;  %v9684_v18 = vpop.permute.xlu0 %5961  ;;  %v6053_v3 = vsel %vm6051_vm11, %v6040_v46, %v9572_v56  ;;  %v6021_v6 = vrot.slane %v9641_v36, %v10018_v10 }
 0x901   :  { %v6065_v35 = vmul.f32 %v6052_v28, %v6005_v19  ;;  %v6066_v16 = vmul.f32 %v6053_v3, %v6009_v38  ;;  %v6103_v19 = vrot.slane %v9643_v23, %v10018_v10  ;;  %v5991_v57 = vadd.f32 %v5984_v21, %v5909_v54 }
 0x902   :  { %v5527_v38 = vsel %vm5521_vm6, %v9500_v15, %v9464_v5  ;;  %v5436_v3 = vrot.slane %v9470_v40, %v10016_v53 }
 0x903   :  { %v6072_v17 = vadd.f32 %v6065_v35, %v9606_v48  ;;  %v9699_v2 = vpop.permute.xlu1 %6047  ;;  %v5540_v55 = vmul.f32 %v5527_v38, %v5495_v22  ;;  %v5465_v22 = vadd.f32 %v5448_v14, %v5422_v8 }
 0x904   :  { %v6056_v46 = vsel %vm6051_vm11, %v9450_v24, %v9699_v2  ;;  %v9710_v0 = vpop.permute.xlu0 %6125 }
 0x905   :  { %v6154_v48 = vadd.f32 %v6147_v44, %v6072_v17  ;;  %v6069_v35 = vmul.f32 %v6056_v46, %v6021_v6  ;;  %v5330_v44 = vrot.slane %v9466_v58, %v10016_v53  ;;  %v5440_v6 = vrot.slane %v9470_v40, %v10017_v30 }
 0x906   :  { %v6073_v17 = vadd.f32 %v6066_v16, %v5991_v57  ;;  %v5712_v57 = vsel %vm5706_vm7, %v9551_v62, %v10044_v7  ;;  %v10046_v62 = vrot.slane %v9466_v58, %v10020_v31  ;;  %v5664_v58 = vrot.slane %v9514_v29, %v10020_v31 }
 0x907   :  { %v9722_v34 = vpop.permute.xlu1 %6123  ;;  %v6076_v54 = vadd.f32 %v6069_v35, %v9627_v13  ;;  %7727 = vtanh.f32 %v6154_v48  ;;  %v10045_v35 = vld [vmem:[#allocation26_spill] sm:$0xff]  ;;  %v5726_v14 = vmul.f32 %v5712_v57, %v5660_v32 }
 0x908   :  { %v6135_v10 = vsel %vm6133_vm10, %v9624_v59, %v9722_v34  ;;  %v9734_v21 = vpop.permute.xlu0 %6129  ;;  %v5483_v59 = vrot.slane %v9474_v41, %v10016_v53 }
 0x909   :  { %v6148_v46 = vmul.f32 %v6135_v10, %v6091_v26  ;;  %v6138_v15 = vsel %vm6133_vm10, %v9456_v63, %v9734_v21 }
 0x90a   :  { %v6151_v28 = vmul.f32 %v6138_v15, %v6103_v19  ;;  %v5648_v15 = vrot.slane %v9514_v29, %v10016_v53 }
 0x90b   :  { %v6155_v16 = vadd.f32 %v6148_v46, %v6073_v17  ;;  %v5396_v26 = vpop.permute.xlu1 %5395  ;;  %v10047_v17 = vld [vmem:[#allocation32_spill] sm:$0xff] }
 0x90c   :  { %v9755_v13 = vadd.f32 %v6151_v28, %v6076_v54  ;;  %v5406_v19 = vsel %vm5403_vm4, %v9454_v39, %v5396_v26  ;;  %v5407_v10 = vsel %vm5403_vm4, %v5396_v26, %v10045_v35  ;;  %v5423_v48 = vmul.f32 %v10047_v17, %v10046_v62  ;;  %v10050_v26 = vld [vmem:[#allocation31_spill] sm:$0xff] }
 0x90d   :  { %7729 = vtanh.f32 %v6155_v16  ;;  %v5419_v60 = vmul.f32 %v5406_v19, %v5330_v44  ;;  %v5420_v38 = vmul.f32 %v5407_v10, %v5334_v47  ;;  %v10048_v28 = vrot.slane %v9476_v42, %v10019_v1 }
 0x90e   :  { %v5547_v54 = vadd.f32 %v5540_v55, %v5465_v22  ;;  %v5652_v44 = vrot.slane %v9514_v29, %v10017_v30  ;;  %v5606_v47 = vsel %vm5603_vm5, %v9506_v25, %v9655_v12  ;;  %v10051_v55 = vld [vmem:[#allocation25_spill] sm:$0xff]  ;;  %v10052_v29 = vrot.slane %v9474_v41, %v10020_v31 }
 0x90f   :  { %v5622_v46 = vmul.f32 %v5609_v49, %v10048_v28  ;;  %v5514_v8 = vpop.permute.xlu1 %5513  ;;  %v10049_v49 = vld [vmem:[#allocation28_spill] sm:$0xff]  ;;  %v5462_v57 = vadd.f32 %v5436_v3, %v5419_v60  ;;  %v5463_v35 = vadd.f32 %v5440_v6, %v5420_v38  ;;  %v10053_v25 = vrot.slane %v9470_v40, %v10020_v31  ;;  %v10057_v60 = vld [vmem:[#allocation43_spill] sm:$0xff] }
 0x910   :  { %v5607_v16 = vsel %vm5603_vm5, %v9655_v12, %v10049_v49  ;;  %v5524_v19 = vsel %vm5521_vm6, %v10050_v26, %v5514_v8  ;;  %v5525_v32 = vsel %vm5521_vm6, %v5514_v8, %v10051_v55  ;;  %v5541_v62 = vmul.f32 %v9464_v5, %v10052_v29  ;;  %v10054_v28 = vld [vmem:[#allocation36_spill] sm:$0xff]  ;;  %v10055_v49 = vld [vmem:[#allocation38_spill] sm:$0xff]  ;;  %v10058_v38 = vld [vmem:[#allocation27_spill] sm:$0xff] }
 0x911   :  { %v5537_v10 = vmul.f32 %v5524_v19, %v5483_v59  ;;  %v5538_v22 = vmul.f32 %v5525_v32, %v5487_v27  ;;  %v5466_v17 = vadd.f32 %v10053_v25, %v5423_v48  ;;  %v5629_v12 = vadd.f32 %v5622_v46, %v5547_v54 }
 0x912   :  { %v5893_v26 = vsel %vm5887_vm9, %v10055_v49, %v10054_v28  ;;  %v5619_v39 = vmul.f32 %v5606_v47, %v5565_v9  ;;  %v5620_v8 = vmul.f32 %v5607_v16, %v5569_v11  ;;  %v10056_v27 = vrot.slane %v9476_v42, %v10020_v31 }
 0x913   :  { %v5544_v3 = vadd.f32 %v5537_v10, %v5462_v57  ;;  %v5545_v6 = vadd.f32 %v5538_v22, %v5463_v35  ;;  %v5697_v59 = vpop.permute.xlu1 %5696  ;;  %v5733_v5 = vadd.f32 %v5726_v14, %v5629_v12  ;;  %v10059_v11 = vrot.slane %v9545_v45, %v10019_v1 }
 0x914   :  { %v5623_v41 = vmul.f32 %v10042_v43, %v10056_v27  ;;  %v5709_v40 = vsel %vm5706_vm7, %v10057_v60, %v5697_v59  ;;  %v5710_v48 = vsel %vm5706_vm7, %v5697_v59, %v10058_v38  ;;  %v6025_v42 = vrot.slane %v9641_v36, %v10019_v1  ;;  %v9827_v22 = vpop.eup %7727 }
 0x915   :  { %v5626_v46 = vadd.f32 %v5619_v39, %v5544_v3  ;;  %v5627_v54 = vadd.f32 %v5620_v8, %v5545_v6  ;;  %v5723_v19 = vmul.f32 %v5709_v40, %v5648_v15  ;;  %v5724_v9 = vmul.f32 %v5710_v48, %v5652_v44  ;;  %v10062_v6 = vld [vmem:[#allocation30_spill] sm:$0xff]  ;;  %v10064_v40 = vld [vmem:[#allocation29_spill] sm:$0xff] }
 0x916   :  { %v5906_v47 = vmul.f32 %v5893_v26, %v10059_v11  ;;  %v6099_v43 = vrot.slane %v9643_v23, %v10017_v30  ;;  %v6095_v14 = vrot.slane %v9643_v23, %v10016_v53  ;;  %v5548_v16 = vadd.f32 %v5541_v62, %v5466_v17 }
 0x917   :  { %v5705_v55 = vpop.permute.xlu1 %5704  ;;  %v5849_v39 = vrot.slane %v9545_v45, %v10016_v53  ;;  %v5853_v15 = vrot.slane %v9545_v45, %v10017_v30  ;;  %v6013_v44 = vrot.slane %v9641_v36, %v10016_v53  ;;  %v5831_v32 = vadd.f32 %v9630_v61, %v5733_v5 }
 0x918   :  { %v5730_v57 = vadd.f32 %v5723_v19, %v5626_v46  ;;  %v5713_v35 = vsel %vm5706_vm7, %v10044_v7, %v5705_v55  ;;  %v6017_v10 = vrot.slane %v9641_v36, %v10017_v30  ;;  %v5630_v29 = vadd.f32 %v5623_v41, %v5548_v16  ;;  %v10061_v7 = vld [vmem:[#allocation37_spill] sm:$0xff]  ;;  %v10063_v41 = vld [vmem:[#allocation39_spill] sm:$0xff] }
 0x919   :  { %v5731_v62 = vadd.f32 %v5724_v9, %v5627_v54  ;;  %v5727_v25 = vmul.f32 %v5713_v35, %v5664_v58  ;;  %v6111_v17 = vrot.slane %v9643_v23, %v10020_v31  ;;  %v10060_v61 = vrot.slane %v9545_v45, %v10020_v31 }
 0x91a   :  { %v9831_v12 = vpop.eup %7729  ;;  %v5913_v26 = vadd.f32 %v5906_v47, %v5831_v32  ;;  %v5975_v8 = vsel %vm5969_vm8, %v10061_v7, %v9645_v4  ;;  %v6107_v3 = vrot.slane %v9643_v23, %v10019_v1  ;;  %v5972_v58 = vsel %vm5969_vm8, %v9619_v52, %v9684_v18 }
 0x91b   :  { %v5907_v49 = vmul.f32 %v10054_v28, %v10060_v61  ;;  %v5973_v59 = vsel %vm5969_vm8, %v9684_v18, %v10062_v6  ;;  %v6175_v45 = vcombine.low %v9827_v22, %v9831_v12  ;;  %v5734_v28 = vadd.f32 %v5727_v25, %v5630_v29  ;;  %v5880_v27 = vpop.permute.xlu1 %5879 }
 0x91c   :  { %v6057_v5 = vsel %vm6051_vm11, %v9699_v2, %v10063_v41  ;;  %v5828_v60 = vadd.f32 %v9636_v33, %v5730_v57  ;;  %v5890_v23 = vsel %vm5887_vm9, %v9510_v37, %v5880_v27  ;;  %v5891_v52 = vsel %vm5887_vm9, %v5880_v27, %v10064_v40 }
 0x91d   :  { %v5832_v38 = vadd.f32 %v9633_v51, %v5734_v28  ;;  %v5829_v18 = vadd.f32 %v9639_v20, %v5731_v62  ;;  %v5903_v48 = vmul.f32 %v5890_v23, %v5849_v39  ;;  %v5904_v46 = vmul.f32 %v5891_v52, %v5853_v15 }
 0x91e   :  { %v10065_v54 = vrot.slane %v9549_v50, %v10019_v1  ;;  %v10066_v2 = vrot.slane %v9549_v50, %v10020_v31  ;;  %v10067_v37 = vrot.slane %v9549_v50, %v10016_v53  ;;  %v10068_v51 = vrot.slane %v9549_v50, %v10017_v30 }
 0x91f   :  { %v6070_v20 = vmul.f32 %v6057_v5, %v6025_v42  ;;  %v5910_v47 = vadd.f32 %v5903_v48, %v5828_v60  ;;  %v5911_v16 = vadd.f32 %v5904_v46, %v5829_v18  ;;  %v6044_v55 = vpop.permute.xlu1 %6043  ;;  %v5914_v39 = vadd.f32 %v5907_v49, %v5832_v38 }
 0x920   :  { %v5988_v19 = vmul.f32 %v5975_v8, %v10065_v54  ;;  %v5989_v33 = vmul.f32 %v9645_v4, %v10066_v2  ;;  %v5985_v9 = vmul.f32 %v5972_v58, %v10067_v37  ;;  %v5986_v11 = vmul.f32 %v5973_v59, %v10068_v51 }
 0x921   :  { %v6137_v1 = vsel %vm6133_vm10, %v9710_v0, %v9456_v63  ;;  %v6136_v4 = vsel %vm6133_vm10, %v9722_v34, %v9710_v0  ;;  %v6054_v53 = vsel %vm6051_vm11, %v9572_v56, %v6044_v55  ;;  %v6055_v30 = vsel %vm6051_vm11, %v6044_v55, %v9450_v24 }
 0x922   :  { %v5992_v50 = vadd.f32 %v5985_v9, %v5910_v47  ;;  %v5993_v42 = vadd.f32 %v5986_v11, %v5911_v16  ;;  %v6067_v15 = vmul.f32 %v6054_v53, %v6013_v44  ;;  %v6068_v32 = vmul.f32 %v6055_v30, %v6017_v10 }
 0x923   :  { %v10069_v57 = vrot.slane %v9641_v36, %v10020_v31  ;;  %v5995_v63 = vadd.f32 %v5988_v19, %v5913_v26  ;;  %v5996_v22 = vadd.f32 %v5989_v33, %v5914_v39  ;;  %v6150_v29 = vmul.f32 %v6137_v1, %v6099_v43  ;;  %v6132_v25 = vpop.permute.xlu1 %6131 }
 0x924   :  { %v6149_v62 = vmul.f32 %v6136_v4, %v6095_v14  ;;  %v6074_v0 = vadd.f32 %v6067_v15, %v5992_v50  ;;  %v6075_v34 = vadd.f32 %v6068_v32, %v5993_v42  ;;  %v6139_v24 = vsel %vm6133_vm10, %v9734_v21, %v6132_v25 }
 0x925   :  { %v6071_v35 = vmul.f32 %v10063_v41, %v10069_v57  ;;  %v6153_v12 = vmul.f32 %v6132_v25, %v6111_v17  ;;  %v6077_v61 = vadd.f32 %v6070_v20, %v5995_v63  ;;  %v6152_v49 = vmul.f32 %v6139_v24, %v6107_v3  ;;  %v10070_v17 = vld [vmem:[#allocation23_spill] sm:$0xff] }
 0x926   :  { %v6156_v44 = vadd.f32 %v6149_v62, %v6074_v0  ;;  %v6157_v10 = vadd.f32 %v6150_v29, %v6075_v34  ;;  %7731 = vtanh.f32 %v9755_v13  ;;  %v6183_v6 = vrot.slane %v6175_v45, %v10070_v17 }
 0x927   :  { %v6078_v56 = vadd.f32 %v6071_v35, %v5996_v22  ;;  %v6159_v36 = vadd.f32 %v6152_v49, %v6077_v61 }
 0x928   :  { %7733 = vtanh.f32 %v6156_v44 }
 0x929   :  { %v6160_v31 = vadd.f32 %v6153_v12, %v6078_v56  ;;  %7735 = vtanh.f32 %v6157_v10 }
 0x92a   :  { %7737 = vtanh.f32 %v6159_v36 }
 0x92b   :  { %7739 = vtanh.f32 %v6160_v31 }
 0x933   :  { %v7732_v43 = vpop.eup %7731 }
 0x935   :  { %v7734_v14 = vpop.eup %7733 }
 0x936   :  { %v7736_v26 = vpop.eup %7735 }
 0x937   :  { %v7738_v7 = vpop.eup %7737  ;;  %v6176_v8 = vcombine.low %v7734_v14, %v7736_v26 }
 0x938   :  { %v7740_v58 = vpop.eup %7739  ;;  %v6192_v21 = vcombine.low %v7732_v43, %v7738_v7 }
 0x939   :  { %v6190_v59 = vrot.slane %v6176_v8, %v10070_v17  ;;  %v6206_v13 = vrot.slane %v7740_v58, %v10070_v17 }
 0x93a   :  { %v6199_v3 = vrot.slane %v6192_v21, %v10070_v17 }
 0x93b   :  { %v6191_v28 = vcombine.low %v6183_v6, %v6190_v59 }
 0x93c   :  { %v6207_v27 = vcombine.low %v6199_v3, %v6206_v13 }
 0x93d   :  { %6210 = vst [vmem:[%s9911_s9] sm:$0xff] %v6191_v28 }
 0x93e   :  { %6211 = vst.msk [vmem:[%s9911_s9 + $0x8] sm:$0x3f] %vm9309_vm3, %v6207_v27 }
 0x93f   :  { %6216 = vsyncpa [#allocation4], 1 }
 0x940   :  { %6217 = vsyncpa [#allocation6], 1 }
 0x941   :  { %6218 = vsyncpa [#allocation9], 1 }
 0x942   :  { %6219 = vsyncpa [#allocation12], 1 }

</bundles_post_ra>
